<compile_context>
chip_gen: v7x
topology: tpu7x:2x2x1
jax: 0.10.0
libtpu: 0.0.40
codegen_flags: <defaults>
</compile_context>

<pallas_src>
import functools

import numpy as np
import jax
import jax.numpy as jnp
from jax import lax
from jax.experimental import pallas as pl
from jax.experimental.pallas import tpu as pltpu


# ----------------------------------------------------------------------------
# Fixed toy architecture (DCGAN-style encoder/decoder injected into NetD)
# ----------------------------------------------------------------------------
NC, NF, KLAT, ISIZE = 3, 8, 16, 16
KSZ = 4
BN_EPS = 1e-5


def _layer_table():
    # (name, kind, Cin, Cout, stride, pad, Hin, Hout, use_bn, act)
    return (
        ("e1", "conv",  NC,     NF,     2, 1, ISIZE,      ISIZE // 2, False, "leaky"),
        ("e2", "conv",  NF,     2 * NF, 2, 1, ISIZE // 2, ISIZE // 4, True,  "leaky"),
        ("e3", "conv",  2 * NF, KLAT,   1, 0, ISIZE // 4, 1,          False, "none"),
        ("d1", "convt", KLAT,   2 * NF, 1, 0, 1,          ISIZE // 4, True,  "relu"),
        ("d2", "convt", 2 * NF, NF,     2, 1, ISIZE // 4, ISIZE // 2, True,  "relu"),
        ("d3", "convt", NF,     NC,     2, 1, ISIZE // 2, ISIZE,      False, "tanh"),
    )


# ----------------------------------------------------------------------------
# Compile-time geometry: S[i,j,m_in,m_out] == 1 iff input pixel m_in feeds
# output pixel m_out through tap (i,j).  Per-sample (no batch block-diagonal).
# ----------------------------------------------------------------------------
@functools.lru_cache(maxsize=None)
def _structure_tensor(kind, stride, pad, hin, hout):
    s = np.zeros((KSZ, KSZ, hin * hin, hout * hout), np.float32)
    for i in range(KSZ):
        for j in range(KSZ):
            for oh in range(hout):
                for ow in range(hout):
                    if kind == "conv":
                        h, w = oh * stride - pad + i, ow * stride - pad + j
                    else:  # conv-transpose: oh = ih*stride - pad + i
                        nh, nw = oh + pad - i, ow + pad - j
                        if nh % stride or nw % stride:
                            continue
                        h, w = nh // stride, nw // stride
                    if 0 <= h < hin and 0 <= w < hin:
                        s[i, j, h * hin + w, oh * hout + ow] = 1.0
    return s


# ----------------------------------------------------------------------------
# One-time (outside jit) parameter packing: PyTorch conv/convT weights ->
# dense per-sample operators A_l [Cin*Hin^2, Cout*Hout^2] (bf16), plus
# broadcast-ready bias / BN vectors.
# ----------------------------------------------------------------------------
def pack_params(params):
    packed = {}
    for (name, kind, cin, cout, stride, pad, hin, hout, use_bn, _act) in _layer_table():
        s = jnp.asarray(_structure_tensor(kind, stride, pad, hin, hout))
        w = params[name + "_w"].astype(jnp.float32)
        if kind == "conv":          # PyTorch Conv2d weight: [Cout, Cin, kh, kw]
            a4 = jnp.einsum("ocij,ijmn->cmon", w, s)
        else:                       # PyTorch ConvTranspose2d weight: [Cin, Cout, kh, kw]
            a4 = jnp.einsum("coij,ijmn->cmon", w, s)
        packed[name + "_A"] = a4.reshape(
            cin * hin * hin, cout * hout * hout).astype(jnp.bfloat16)
        if use_bn:
            packed[name + "_g"] = params[name + "_g"].reshape(1, cout).astype(jnp.float32)
            packed[name + "_beta"] = params[name + "_beta"].reshape(1, cout).astype(jnp.float32)
        else:
            packed[name + "_b"] = jnp.repeat(
                params[name + "_b"].astype(jnp.float32), hout * hout
            ).reshape(1, cout * hout * hout)
    return packed


# ----------------------------------------------------------------------------
# The single fused Pallas kernel
# ----------------------------------------------------------------------------
def _netd_fused_kernel(*refs, cfg):
    """refs = [x, (A, [gamma, beta] | [bias]) per layer ..., enc_out, dec_out].

    Static cfg: tuple of (cout, m_out, use_bn, act, is_latent) per layer.
    Activations flow as f32 [B, C*H*W]; matmul operands bf16, accumulation f32.
    """
    refs = list(refs)
    dec_ref = refs.pop()
    enc_ref = refs.pop()
    it = iter(refs)

    h = next(it)[...]                                        # [B, Cin0*H*W] f32
    for (cout, m_out, use_bn, act_name, is_latent) in cfg:
        a_ref = next(it)                                     # [Cin*Min, Cout*Mout] bf16
        y = jnp.dot(h.astype(jnp.bfloat16), a_ref[...],
                    preferred_element_type=jnp.float32)      # [B, Cout*Mout] f32
        cm = cout * m_out

        if use_bn:
            gamma_ref = next(it)                             # [1, Cout]
            beta_ref = next(it)                              # [1, Cout]
            n = y.shape[0] * m_out
            s1 = jnp.sum(y, axis=0, keepdims=True)           # [1, CM]
            s2 = jnp.sum(y * y, axis=0, keepdims=True)       # [1, CM]
            # 0/1 channel pooling [CM, C] and broadcast [C, CM] masks from iota
            # comparisons (each channel owns m_out consecutive pixel columns).
            rq = lax.broadcasted_iota(jnp.int32, (cm, cout), 0)
            cc = lax.broadcasted_iota(jnp.int32, (cm, cout), 1)
            pool = ((rq >= cc * m_out) & (rq < (cc + 1) * m_out)).astype(jnp.float32)
            rc = lax.broadcasted_iota(jnp.int32, (cout, cm), 0)
            cq = lax.broadcasted_iota(jnp.int32, (cout, cm), 1)
            expand = ((cq >= rc * m_out) & (cq < (rc + 1) * m_out)).astype(jnp.float32)

            mean = jnp.dot(s1, pool, preferred_element_type=jnp.float32) / n  # [1, C]
            ex2 = jnp.dot(s2, pool, preferred_element_type=jnp.float32) / n   # [1, C]
            var = ex2 - mean * mean
            scale = gamma_ref[...] * lax.rsqrt(var + BN_EPS)                  # [1, C]
            shift = beta_ref[...] - mean * scale                              # [1, C]
            y = (y * jnp.dot(scale, expand, preferred_element_type=jnp.float32)
                 + jnp.dot(shift, expand, preferred_element_type=jnp.float32))
        else:
            b_ref = next(it)                                 # [1, Cout*Mout]
            y = y + b_ref[...]

        if act_name == "leaky":
            y = jnp.where(y > 0, y, 0.2 * y)
        elif act_name == "relu":
            y = jnp.maximum(y, 0.0)
        elif act_name == "tanh":
            y = jnp.tanh(y)

        if is_latent:
            enc_ref[...] = y                                 # [B, KLAT]
        h = y

    dec_ref[...] = h                                         # [B, NC*ISIZE*ISIZE]


def _full_block(shape):
    zeros = (0,) * len(shape)
    return pl.BlockSpec(shape, lambda *_args, _z=zeros: _z)


# ----------------------------------------------------------------------------
# Wrapper: the pallas_call (no layout glue needed around it)
# ----------------------------------------------------------------------------
def netd_forward(packed, x):
    """x: [B, 3, 16, 16] NCHW.  Returns (f_enc [B, KLAT], f_dec [B, 3*16*16])."""
    b = x.shape[0]
    x2 = x.reshape(b, NC * ISIZE * ISIZE).astype(jnp.float32)   # NCHW .view(B, -1) layout

    inputs = [x2]
    in_specs = [_full_block(x2.shape)]
    cfg = []
    flops = 0
    bytes_accessed = 4 * b * NC * ISIZE * ISIZE
    for (name, kind, cin, cout, stride, pad, hin, hout, use_bn, act) in _layer_table():
        a = packed[name + "_A"]
        inputs.append(a)
        in_specs.append(_full_block(a.shape))
        k_dim, n_dim = cin * hin * hin, cout * hout * hout
        flops += 2 * b * k_dim * n_dim
        bytes_accessed += 2 * k_dim * n_dim                      # bf16 operator
        if use_bn:
            inputs += [packed[name + "_g"], packed[name + "_beta"]]
            in_specs += [_full_block((1, cout)), _full_block((1, cout))]
            flops += 4 * 2 * n_dim * cout                        # pool/broadcast matmuls
            bytes_accessed += 8 * cout
        else:
            inputs.append(packed[name + "_b"])
            in_specs.append(_full_block((1, n_dim)))
            bytes_accessed += 4 * n_dim
        cfg.append((cout, hout * hout, use_bn, act, name == "e3"))

    out_shape = (jax.ShapeDtypeStruct((b, KLAT), jnp.float32),
                 jax.ShapeDtypeStruct((b, NC * ISIZE * ISIZE), jnp.float32))
    out_specs = (_full_block((b, KLAT)), _full_block((b, NC * ISIZE * ISIZE)))
    bytes_accessed += 4 * (b * KLAT + b * NC * ISIZE * ISIZE)
    transcendentals = b * NC * ISIZE * ISIZE + 6 * 2 * NF        # tanh + rsqrt (advisory)

    kernel = functools.partial(_netd_fused_kernel, cfg=tuple(cfg))
    f_enc, f_dec = pl.pallas_call(
        kernel,
        out_shape=out_shape,
        grid=(1,),
        in_specs=in_specs,
        out_specs=out_specs,
        compiler_params=pltpu.CompilerParams(dimension_semantics=("arbitrary",)),
        cost_estimate=pl.CostEstimate(flops=int(flops),
                                      transcendentals=int(transcendentals),
                                      bytes_accessed=int(bytes_accessed)),
    )(*inputs)
    return f_enc, f_dec


# ----------------------------------------------------------------------------
# Parameters (PyTorch layouts) and a plain-JAX f32 reference for checking
# ----------------------------------------------------------------------------
def init_params(key):
    ks = jax.random.split(key, 12)
    std = 0.02  # DCGAN weights_init: normal(0, 0.02)
    p = {}
    p["e1_w"] = std * jax.random.normal(ks[0], (NF, NC, 4, 4), jnp.float32)
    p["e2_w"] = std * jax.random.normal(ks[1], (2 * NF, NF, 4, 4), jnp.float32)
    p["e3_w"] = std * jax.random.normal(ks[2], (KLAT, 2 * NF, 4, 4), jnp.float32)
    p["d1_w"] = std * jax.random.normal(ks[3], (KLAT, 2 * NF, 4, 4), jnp.float32)
    p["d2_w"] = std * jax.random.normal(ks[4], (2 * NF, NF, 4, 4), jnp.float32)
    p["d3_w"] = std * jax.random.normal(ks[5], (NF, NC, 4, 4), jnp.float32)
    for idx, (name, cout) in enumerate([("e1", NF), ("e2", 2 * NF), ("e3", KLAT),
                                        ("d1", 2 * NF), ("d2", NF), ("d3", NC)]):
        kb, kg, kbeta = jax.random.split(ks[6 + idx], 3)
        p[name + "_b"] = 0.1 * jax.random.normal(kb, (cout,), jnp.float32)
        p[name + "_g"] = 1.0 + 0.05 * jax.random.normal(kg, (cout,), jnp.float32)
        p[name + "_beta"] = 0.1 * jax.random.normal(kbeta, (cout,), jnp.float32)
    return p


def _bn_train(y, gamma, beta, eps=BN_EPS):
    mean = y.mean(axis=(0, 2, 3), keepdims=True)
    var = ((y - mean) ** 2).mean(axis=(0, 2, 3), keepdims=True)
    return (y - mean) * lax.rsqrt(var + eps) * gamma.reshape(1, -1, 1, 1) \
        + beta.reshape(1, -1, 1, 1)


def _conv_ref(x, w, stride, pad):
    return lax.conv_general_dilated(
        x, w, window_strides=(stride, stride), padding=[(pad, pad), (pad, pad)],
        dimension_numbers=("NCHW", "OIHW", "NCHW"))


def _convt_ref(x, w, stride, pad):
    w_eq = jnp.flip(w, axis=(2, 3)).transpose(1, 0, 2, 3)      # [Cout, Cin, kh, kw]
    return lax.conv_general_dilated(
        x, w_eq, window_strides=(1, 1),
        padding=[(KSZ - 1 - pad, KSZ - 1 - pad)] * 2,
        lhs_dilation=(stride, stride),
        dimension_numbers=("NCHW", "OIHW", "NCHW"))


def netd_reference(params, x):
    h = _conv_ref(x, params["e1_w"], 2, 1) + params["e1_b"].reshape(1, -1, 1, 1)
    h = jnp.where(h > 0, h, 0.2 * h)
    h = _conv_ref(h, params["e2_w"], 2, 1)
    h = _bn_train(h, params["e2_g"], params["e2_beta"])
    h = jnp.where(h > 0, h, 0.2 * h)
    f_enc = _conv_ref(h, params["e3_w"], 1, 0) + params["e3_b"].reshape(1, -1, 1, 1)
    g = _convt_ref(f_enc, params["d1_w"], 1, 0)
    g = jnp.maximum(_bn_train(g, params["d1_g"], params["d1_beta"]), 0.0)
    g = _convt_ref(g, params["d2_w"], 2, 1)
    g = jnp.maximum(_bn_train(g, params["d2_g"], params["d2_beta"]), 0.0)
    f_dec = jnp.tanh(_convt_ref(g, params["d3_w"], 2, 1)
                     + params["d3_b"].reshape(1, -1, 1, 1))
    b = x.shape[0]
    return f_enc.reshape(b, -1), f_dec.reshape(b, -1)


if __name__ == "__main__":
    key = jax.random.PRNGKey(0)
    pkey, xkey = jax.random.split(key)
    params = init_params(pkey)
    packed = pack_params(params)         # one-time weight repacking, outside jit
    x = jax.random.normal(xkey, (2, NC, ISIZE, ISIZE), jnp.float32)   # NCHW

    fwd = jax.jit(netd_forward)
    f_enc, f_dec = fwd(packed, x)
    jax.block_until_ready((f_enc, f_dec))

    assert f_enc.shape == (2, KLAT), f_enc.shape
    assert f_dec.shape == (2, NC * ISIZE * ISIZE), f_dec.shape
    assert bool(jnp.all(jnp.isfinite(f_enc))) and bool(jnp.all(jnp.isfinite(f_dec)))

    # Numerical check against a plain-JAX f32 reference (kernel uses bf16 MXU operands).
    r_enc, r_dec = jax.jit(netd_reference)(params, x)
    err_enc = float(jnp.max(jnp.abs(f_enc - r_enc)))
    err_dec = float(jnp.max(jnp.abs(f_dec - r_dec)))
    assert err_enc < 5e-2, ("f_enc mismatch", err_enc)
    assert err_dec < 5e-2, ("f_dec mismatch", err_dec)

    print("KERNEL_OK")
</pallas_src>

<mosaic_0001>
module attributes {stable_mosaic.version = 11 : i64} {
  func.func @_netd_fused_kernel(%arg0: i32, %arg1: memref<2x768xf32, #tpu.memory_space<vmem>>, %arg2: memref<768x512xbf16, #tpu.memory_space<vmem>>, %arg3: memref<1x512xf32, #tpu.memory_space<vmem>>, %arg4: memref<512x256xbf16, #tpu.memory_space<vmem>>, %arg5: memref<1x16xf32, #tpu.memory_space<vmem>>, %arg6: memref<1x16xf32, #tpu.memory_space<vmem>>, %arg7: memref<256x16xbf16, #tpu.memory_space<vmem>>, %arg8: memref<1x16xf32, #tpu.memory_space<vmem>>, %arg9: memref<16x256xbf16, #tpu.memory_space<vmem>>, %arg10: memref<1x16xf32, #tpu.memory_space<vmem>>, %arg11: memref<1x16xf32, #tpu.memory_space<vmem>>, %arg12: memref<256x512xbf16, #tpu.memory_space<vmem>>, %arg13: memref<1x8xf32, #tpu.memory_space<vmem>>, %arg14: memref<1x8xf32, #tpu.memory_space<vmem>>, %arg15: memref<512x768xbf16, #tpu.memory_space<vmem>>, %arg16: memref<1x768xf32, #tpu.memory_space<vmem>>, %arg17: memref<2x16xf32, #tpu.memory_space<vmem>>, %arg18: memref<2x768xf32, #tpu.memory_space<vmem>>) attributes {dimension_semantics = [#tpu.dimension_semantics<arbitrary>], iteration_bounds = array<i64: 1>, scalar_prefetch = 0 : i64, scratch_operands = 0 : i64, tpu.core_type = #tpu.core_type<tc>, window_params = [{pipeline_mode = #tpu.pipeline_mode<synchronous>, transform_indices = @transform_0, window_bounds = array<i64: 2, 768>}, {pipeline_mode = #tpu.pipeline_mode<synchronous>, transform_indices = @transform_1, window_bounds = array<i64: 768, 512>}, {pipeline_mode = #tpu.pipeline_mode<synchronous>, transform_indices = @transform_2, window_bounds = array<i64: 1, 512>}, {pipeline_mode = #tpu.pipeline_mode<synchronous>, transform_indices = @transform_3, window_bounds = array<i64: 512, 256>}, {pipeline_mode = #tpu.pipeline_mode<synchronous>, transform_indices = @transform_4, window_bounds = array<i64: 1, 16>}, {pipeline_mode = #tpu.pipeline_mode<synchronous>, transform_indices = @transform_5, window_bounds = array<i64: 1, 16>}, {pipeline_mode = #tpu.pipeline_mode<synchronous>, transform_indices = @transform_6, window_bounds = array<i64: 256, 16>}, {pipeline_mode = #tpu.pipeline_mode<synchronous>, transform_indices = @transform_7, window_bounds = array<i64: 1, 16>}, {pipeline_mode = #tpu.pipeline_mode<synchronous>, transform_indices = @transform_8, window_bounds = array<i64: 16, 256>}, {pipeline_mode = #tpu.pipeline_mode<synchronous>, transform_indices = @transform_9, window_bounds = array<i64: 1, 16>}, {pipeline_mode = #tpu.pipeline_mode<synchronous>, transform_indices = @transform_10, window_bounds = array<i64: 1, 16>}, {pipeline_mode = #tpu.pipeline_mode<synchronous>, transform_indices = @transform_11, window_bounds = array<i64: 256, 512>}, {pipeline_mode = #tpu.pipeline_mode<synchronous>, transform_indices = @transform_12, window_bounds = array<i64: 1, 8>}, {pipeline_mode = #tpu.pipeline_mode<synchronous>, transform_indices = @transform_13, window_bounds = array<i64: 1, 8>}, {pipeline_mode = #tpu.pipeline_mode<synchronous>, transform_indices = @transform_14, window_bounds = array<i64: 512, 768>}, {pipeline_mode = #tpu.pipeline_mode<synchronous>, transform_indices = @transform_15, window_bounds = array<i64: 1, 768>}, {pipeline_mode = #tpu.pipeline_mode<synchronous>, transform_indices = @transform_16, window_bounds = array<i64: 2, 16>}, {pipeline_mode = #tpu.pipeline_mode<synchronous>, transform_indices = @transform_17, window_bounds = array<i64: 2, 768>}]} {
    %c0 = arith.constant 0 : index
    %c0_0 = arith.constant 0 : index
    %0 = vector.load %arg1[%c0, %c0_0] : memref<2x768xf32, #tpu.memory_space<vmem>>, vector<2x768xf32>
    %1 = arith.truncf %0 : vector<2x768xf32> to vector<2x768xbf16>
    %c0_1 = arith.constant 0 : index
    %c0_2 = arith.constant 0 : index
    %2 = vector.load %arg2[%c0_1, %c0_2] : memref<768x512xbf16, #tpu.memory_space<vmem>>, vector<768x512xbf16>
    %cst = arith.constant dense<0.000000e+00> : vector<2x512xf32>
    %3 = tpu.matmul %1, %2, %cst {dimension_numbers = #tpu.dot_dimension_numbers<[1], [0], [0], [1], [0, 0, 1, 1], [], []>} : vector<2x768xbf16>, vector<768x512xbf16>, vector<2x512xf32> -> vector<2x512xf32>
    %c0_3 = arith.constant 0 : index
    %c0_4 = arith.constant 0 : index
    %4 = vector.load %arg3[%c0_3, %c0_4] : memref<1x512xf32, #tpu.memory_space<vmem>>, vector<1x512xf32>
    %5 = vector.broadcast %4 : vector<1x512xf32> to vector<2x512xf32>
    %6 = arith.addf %3, %5 : vector<2x512xf32>
    %cst_5 = arith.constant 0.000000e+00 : f32
    %7 = vector.broadcast %cst_5 : f32 to vector<2x512xf32>
    %8 = arith.cmpf ogt, %6, %7 : vector<2x512xf32>
    %cst_6 = arith.constant 2.000000e-01 : f32
    %9 = vector.broadcast %cst_6 : f32 to vector<2x512xf32>
    %10 = arith.mulf %9, %6 : vector<2x512xf32>
    %11 = arith.select %8, %6, %10 : vector<2x512xi1>, vector<2x512xf32>
    %12 = arith.truncf %11 : vector<2x512xf32> to vector<2x512xbf16>
    %c0_7 = arith.constant 0 : index
    %c0_8 = arith.constant 0 : index
    %13 = vector.load %arg4[%c0_7, %c0_8] : memref<512x256xbf16, #tpu.memory_space<vmem>>, vector<512x256xbf16>
    %cst_9 = arith.constant dense<0.000000e+00> : vector<2x256xf32>
    %14 = tpu.matmul %12, %13, %cst_9 {dimension_numbers = #tpu.dot_dimension_numbers<[1], [0], [0], [1], [0, 0, 1, 1], [], []>} : vector<2x512xbf16>, vector<512x256xbf16>, vector<2x256xf32> -> vector<2x256xf32>
    %cst_10 = arith.constant dense<0.000000e+00> : vector<256xf32>
    %15 = vector.multi_reduction <add>, %14, %cst_10 [0] : vector<2x256xf32> to vector<256xf32>
    %16 = vector.shape_cast %15 : vector<256xf32> to vector<1x256xf32>
    %17 = arith.mulf %14, %14 : vector<2x256xf32>
    %cst_11 = arith.constant dense<0.000000e+00> : vector<256xf32>
    %18 = vector.multi_reduction <add>, %17, %cst_11 [0] : vector<2x256xf32> to vector<256xf32>
    %19 = vector.shape_cast %18 : vector<256xf32> to vector<1x256xf32>
    %20 = tpu.iota {dimensions = array<i32: 0>} : vector<256x16xi32>
    %21 = tpu.iota {dimensions = array<i32: 1>} : vector<256x16xi32>
    %c16_i32 = arith.constant 16 : i32
    %22 = vector.broadcast %c16_i32 : i32 to vector<256x16xi32>
    %23 = arith.muli %21, %22 : vector<256x16xi32>
    %24 = arith.cmpi sge, %20, %23 : vector<256x16xi32>
    %c1_i32 = arith.constant 1 : i32
    %25 = vector.broadcast %c1_i32 : i32 to vector<256x16xi32>
    %26 = arith.addi %21, %25 : vector<256x16xi32>
    %c16_i32_12 = arith.constant 16 : i32
    %27 = vector.broadcast %c16_i32_12 : i32 to vector<256x16xi32>
    %28 = arith.muli %26, %27 : vector<256x16xi32>
    %29 = arith.cmpi slt, %20, %28 : vector<256x16xi32>
    %30 = arith.andi %24, %29 : vector<256x16xi1>
    %31 = arith.extui %30 : vector<256x16xi1> to vector<256x16xi32>
    %32 = arith.sitofp %31 : vector<256x16xi32> to vector<256x16xf32>
    %33 = tpu.iota {dimensions = array<i32: 0>} : vector<16x256xi32>
    %34 = tpu.iota {dimensions = array<i32: 1>} : vector<16x256xi32>
    %c16_i32_13 = arith.constant 16 : i32
    %35 = vector.broadcast %c16_i32_13 : i32 to vector<16x256xi32>
    %36 = arith.muli %33, %35 : vector<16x256xi32>
    %37 = arith.cmpi sge, %34, %36 : vector<16x256xi32>
    %c1_i32_14 = arith.constant 1 : i32
    %38 = vector.broadcast %c1_i32_14 : i32 to vector<16x256xi32>
    %39 = arith.addi %33, %38 : vector<16x256xi32>
    %c16_i32_15 = arith.constant 16 : i32
    %40 = vector.broadcast %c16_i32_15 : i32 to vector<16x256xi32>
    %41 = arith.muli %39, %40 : vector<16x256xi32>
    %42 = arith.cmpi slt, %34, %41 : vector<16x256xi32>
    %43 = arith.andi %37, %42 : vector<16x256xi1>
    %44 = arith.extui %43 : vector<16x256xi1> to vector<16x256xi32>
    %45 = arith.sitofp %44 : vector<16x256xi32> to vector<16x256xf32>
    %cst_16 = arith.constant dense<0.000000e+00> : vector<1x16xf32>
    %46 = tpu.matmul %16, %32, %cst_16 {dimension_numbers = #tpu.dot_dimension_numbers<[1], [0], [0], [1], [0, 0, 1, 1], [], []>} : vector<1x256xf32>, vector<256x16xf32>, vector<1x16xf32> -> vector<1x16xf32>
    %cst_17 = arith.constant 3.200000e+01 : f32
    %47 = vector.broadcast %cst_17 : f32 to vector<1x16xf32>
    %48 = arith.divf %46, %47 : vector<1x16xf32>
    %cst_18 = arith.constant dense<0.000000e+00> : vector<1x16xf32>
    %49 = tpu.matmul %19, %32, %cst_18 {dimension_numbers = #tpu.dot_dimension_numbers<[1], [0], [0], [1], [0, 0, 1, 1], [], []>} : vector<1x256xf32>, vector<256x16xf32>, vector<1x16xf32> -> vector<1x16xf32>
    %cst_19 = arith.constant 3.200000e+01 : f32
    %50 = vector.broadcast %cst_19 : f32 to vector<1x16xf32>
    %51 = arith.divf %49, %50 : vector<1x16xf32>
    %52 = arith.mulf %48, %48 : vector<1x16xf32>
    %53 = arith.subf %51, %52 : vector<1x16xf32>
    %c0_20 = arith.constant 0 : index
    %c0_21 = arith.constant 0 : index
    %54 = vector.load %arg5[%c0_20, %c0_21] : memref<1x16xf32, #tpu.memory_space<vmem>>, vector<1x16xf32>
    %cst_22 = arith.constant 9.99999974E-6 : f32
    %55 = vector.broadcast %cst_22 : f32 to vector<1x16xf32>
    %56 = arith.addf %53, %55 : vector<1x16xf32>
    %57 = math.rsqrt %56 : vector<1x16xf32>
    %58 = arith.mulf %54, %57 : vector<1x16xf32>
    %c0_23 = arith.constant 0 : index
    %c0_24 = arith.constant 0 : index
    %59 = vector.load %arg6[%c0_23, %c0_24] : memref<1x16xf32, #tpu.memory_space<vmem>>, vector<1x16xf32>
    %60 = arith.mulf %48, %58 : vector<1x16xf32>
    %61 = arith.subf %59, %60 : vector<1x16xf32>
    %cst_25 = arith.constant dense<0.000000e+00> : vector<1x256xf32>
    %62 = tpu.matmul %58, %45, %cst_25 {dimension_numbers = #tpu.dot_dimension_numbers<[1], [0], [0], [1], [0, 0, 1, 1], [], []>} : vector<1x16xf32>, vector<16x256xf32>, vector<1x256xf32> -> vector<1x256xf32>
    %63 = vector.broadcast %62 : vector<1x256xf32> to vector<2x256xf32>
    %64 = arith.mulf %14, %63 : vector<2x256xf32>
    %cst_26 = arith.constant dense<0.000000e+00> : vector<1x256xf32>
    %65 = tpu.matmul %61, %45, %cst_26 {dimension_numbers = #tpu.dot_dimension_numbers<[1], [0], [0], [1], [0, 0, 1, 1], [], []>} : vector<1x16xf32>, vector<16x256xf32>, vector<1x256xf32> -> vector<1x256xf32>
    %66 = vector.broadcast %65 : vector<1x256xf32> to vector<2x256xf32>
    %67 = arith.addf %64, %66 : vector<2x256xf32>
    %cst_27 = arith.constant 0.000000e+00 : f32
    %68 = vector.broadcast %cst_27 : f32 to vector<2x256xf32>
    %69 = arith.cmpf ogt, %67, %68 : vector<2x256xf32>
    %cst_28 = arith.constant 2.000000e-01 : f32
    %70 = vector.broadcast %cst_28 : f32 to vector<2x256xf32>
    %71 = arith.mulf %70, %67 : vector<2x256xf32>
    %72 = arith.select %69, %67, %71 : vector<2x256xi1>, vector<2x256xf32>
    %73 = arith.truncf %72 : vector<2x256xf32> to vector<2x256xbf16>
    %c0_29 = arith.constant 0 : index
    %c0_30 = arith.constant 0 : index
    %74 = vector.load %arg7[%c0_29, %c0_30] : memref<256x16xbf16, #tpu.memory_space<vmem>>, vector<256x16xbf16>
    %cst_31 = arith.constant dense<0.000000e+00> : vector<2x16xf32>
    %75 = tpu.matmul %73, %74, %cst_31 {dimension_numbers = #tpu.dot_dimension_numbers<[1], [0], [0], [1], [0, 0, 1, 1], [], []>} : vector<2x256xbf16>, vector<256x16xbf16>, vector<2x16xf32> -> vector<2x16xf32>
    %c0_32 = arith.constant 0 : index
    %c0_33 = arith.constant 0 : index
    %76 = vector.load %arg8[%c0_32, %c0_33] : memref<1x16xf32, #tpu.memory_space<vmem>>, vector<1x16xf32>
    %77 = vector.broadcast %76 : vector<1x16xf32> to vector<2x16xf32>
    %78 = arith.addf %75, %77 : vector<2x16xf32>
    %c0_34 = arith.constant 0 : index
    %c0_35 = arith.constant 0 : index
    %79 = vector.load %arg17[%c0_34, %c0_35] : memref<2x16xf32, #tpu.memory_space<vmem>>, vector<2x16xf32>
    tpu.vector_store %arg17[%c0_34, %c0_35], %78 {strides = array<i32>} : memref<2x16xf32, #tpu.memory_space<vmem>>, vector<2x16xf32>,
    %80 = arith.truncf %78 : vector<2x16xf32> to vector<2x16xbf16>
    %c0_36 = arith.constant 0 : index
    %c0_37 = arith.constant 0 : index
    %81 = vector.load %arg9[%c0_36, %c0_37] : memref<16x256xbf16, #tpu.memory_space<vmem>>, vector<16x256xbf16>
    %cst_38 = arith.constant dense<0.000000e+00> : vector<2x256xf32>
    %82 = tpu.matmul %80, %81, %cst_38 {dimension_numbers = #tpu.dot_dimension_numbers<[1], [0], [0], [1], [0, 0, 1, 1], [], []>} : vector<2x16xbf16>, vector<16x256xbf16>, vector<2x256xf32> -> vector<2x256xf32>
    %cst_39 = arith.constant dense<0.000000e+00> : vector<256xf32>
    %83 = vector.multi_reduction <add>, %82, %cst_39 [0] : vector<2x256xf32> to vector<256xf32>
    %84 = vector.shape_cast %83 : vector<256xf32> to vector<1x256xf32>
    %85 = arith.mulf %82, %82 : vector<2x256xf32>
    %cst_40 = arith.constant dense<0.000000e+00> : vector<256xf32>
    %86 = vector.multi_reduction <add>, %85, %cst_40 [0] : vector<2x256xf32> to vector<256xf32>
    %87 = vector.shape_cast %86 : vector<256xf32> to vector<1x256xf32>
    %88 = tpu.iota {dimensions = array<i32: 0>} : vector<256x16xi32>
    %89 = tpu.iota {dimensions = array<i32: 1>} : vector<256x16xi32>
    %c16_i32_41 = arith.constant 16 : i32
    %90 = vector.broadcast %c16_i32_41 : i32 to vector<256x16xi32>
    %91 = arith.muli %89, %90 : vector<256x16xi32>
    %92 = arith.cmpi sge, %88, %91 : vector<256x16xi32>
    %c1_i32_42 = arith.constant 1 : i32
    %93 = vector.broadcast %c1_i32_42 : i32 to vector<256x16xi32>
    %94 = arith.addi %89, %93 : vector<256x16xi32>
    %c16_i32_43 = arith.constant 16 : i32
    %95 = vector.broadcast %c16_i32_43 : i32 to vector<256x16xi32>
    %96 = arith.muli %94, %95 : vector<256x16xi32>
    %97 = arith.cmpi slt, %88, %96 : vector<256x16xi32>
    %98 = arith.andi %92, %97 : vector<256x16xi1>
    %99 = arith.extui %98 : vector<256x16xi1> to vector<256x16xi32>
    %100 = arith.sitofp %99 : vector<256x16xi32> to vector<256x16xf32>
    %101 = tpu.iota {dimensions = array<i32: 0>} : vector<16x256xi32>
    %102 = tpu.iota {dimensions = array<i32: 1>} : vector<16x256xi32>
    %c16_i32_44 = arith.constant 16 : i32
    %103 = vector.broadcast %c16_i32_44 : i32 to vector<16x256xi32>
    %104 = arith.muli %101, %103 : vector<16x256xi32>
    %105 = arith.cmpi sge, %102, %104 : vector<16x256xi32>
    %c1_i32_45 = arith.constant 1 : i32
    %106 = vector.broadcast %c1_i32_45 : i32 to vector<16x256xi32>
    %107 = arith.addi %101, %106 : vector<16x256xi32>
    %c16_i32_46 = arith.constant 16 : i32
    %108 = vector.broadcast %c16_i32_46 : i32 to vector<16x256xi32>
    %109 = arith.muli %107, %108 : vector<16x256xi32>
    %110 = arith.cmpi slt, %102, %109 : vector<16x256xi32>
    %111 = arith.andi %105, %110 : vector<16x256xi1>
    %112 = arith.extui %111 : vector<16x256xi1> to vector<16x256xi32>
    %113 = arith.sitofp %112 : vector<16x256xi32> to vector<16x256xf32>
    %cst_47 = arith.constant dense<0.000000e+00> : vector<1x16xf32>
    %114 = tpu.matmul %84, %100, %cst_47 {dimension_numbers = #tpu.dot_dimension_numbers<[1], [0], [0], [1], [0, 0, 1, 1], [], []>} : vector<1x256xf32>, vector<256x16xf32>, vector<1x16xf32> -> vector<1x16xf32>
    %cst_48 = arith.constant 3.200000e+01 : f32
    %115 = vector.broadcast %cst_48 : f32 to vector<1x16xf32>
    %116 = arith.divf %114, %115 : vector<1x16xf32>
    %cst_49 = arith.constant dense<0.000000e+00> : vector<1x16xf32>
    %117 = tpu.matmul %87, %100, %cst_49 {dimension_numbers = #tpu.dot_dimension_numbers<[1], [0], [0], [1], [0, 0, 1, 1], [], []>} : vector<1x256xf32>, vector<256x16xf32>, vector<1x16xf32> -> vector<1x16xf32>
    %cst_50 = arith.constant 3.200000e+01 : f32
    %118 = vector.broadcast %cst_50 : f32 to vector<1x16xf32>
    %119 = arith.divf %117, %118 : vector<1x16xf32>
    %120 = arith.mulf %116, %116 : vector<1x16xf32>
    %121 = arith.subf %119, %120 : vector<1x16xf32>
    %c0_51 = arith.constant 0 : index
    %c0_52 = arith.constant 0 : index
    %122 = vector.load %arg10[%c0_51, %c0_52] : memref<1x16xf32, #tpu.memory_space<vmem>>, vector<1x16xf32>
    %cst_53 = arith.constant 9.99999974E-6 : f32
    %123 = vector.broadcast %cst_53 : f32 to vector<1x16xf32>
    %124 = arith.addf %121, %123 : vector<1x16xf32>
    %125 = math.rsqrt %124 : vector<1x16xf32>
    %126 = arith.mulf %122, %125 : vector<1x16xf32>
    %c0_54 = arith.constant 0 : index
    %c0_55 = arith.constant 0 : index
    %127 = vector.load %arg11[%c0_54, %c0_55] : memref<1x16xf32, #tpu.memory_space<vmem>>, vector<1x16xf32>
    %128 = arith.mulf %116, %126 : vector<1x16xf32>
    %129 = arith.subf %127, %128 : vector<1x16xf32>
    %cst_56 = arith.constant dense<0.000000e+00> : vector<1x256xf32>
    %130 = tpu.matmul %126, %113, %cst_56 {dimension_numbers = #tpu.dot_dimension_numbers<[1], [0], [0], [1], [0, 0, 1, 1], [], []>} : vector<1x16xf32>, vector<16x256xf32>, vector<1x256xf32> -> vector<1x256xf32>
    %131 = vector.broadcast %130 : vector<1x256xf32> to vector<2x256xf32>
    %132 = arith.mulf %82, %131 : vector<2x256xf32>
    %cst_57 = arith.constant dense<0.000000e+00> : vector<1x256xf32>
    %133 = tpu.matmul %129, %113, %cst_57 {dimension_numbers = #tpu.dot_dimension_numbers<[1], [0], [0], [1], [0, 0, 1, 1], [], []>} : vector<1x16xf32>, vector<16x256xf32>, vector<1x256xf32> -> vector<1x256xf32>
    %134 = vector.broadcast %133 : vector<1x256xf32> to vector<2x256xf32>
    %135 = arith.addf %132, %134 : vector<2x256xf32>
    %cst_58 = arith.constant 0.000000e+00 : f32
    %136 = vector.broadcast %cst_58 : f32 to vector<2x256xf32>
    %137 = arith.maximumf %135, %136 : vector<2x256xf32>
    %138 = arith.truncf %137 : vector<2x256xf32> to vector<2x256xbf16>
    %c0_59 = arith.constant 0 : index
    %c0_60 = arith.constant 0 : index
    %139 = vector.load %arg12[%c0_59, %c0_60] : memref<256x512xbf16, #tpu.memory_space<vmem>>, vector<256x512xbf16>
    %cst_61 = arith.constant dense<0.000000e+00> : vector<2x512xf32>
    %140 = tpu.matmul %138, %139, %cst_61 {dimension_numbers = #tpu.dot_dimension_numbers<[1], [0], [0], [1], [0, 0, 1, 1], [], []>} : vector<2x256xbf16>, vector<256x512xbf16>, vector<2x512xf32> -> vector<2x512xf32>
    %cst_62 = arith.constant dense<0.000000e+00> : vector<512xf32>
    %141 = vector.multi_reduction <add>, %140, %cst_62 [0] : vector<2x512xf32> to vector<512xf32>
    %142 = vector.shape_cast %141 : vector<512xf32> to vector<1x512xf32>
    %143 = arith.mulf %140, %140 : vector<2x512xf32>
    %cst_63 = arith.constant dense<0.000000e+00> : vector<512xf32>
    %144 = vector.multi_reduction <add>, %143, %cst_63 [0] : vector<2x512xf32> to vector<512xf32>
    %145 = vector.shape_cast %144 : vector<512xf32> to vector<1x512xf32>
    %146 = tpu.iota {dimensions = array<i32: 0>} : vector<512x8xi32>
    %147 = tpu.iota {dimensions = array<i32: 1>} : vector<512x8xi32>
    %c64_i32 = arith.constant 64 : i32
    %148 = vector.broadcast %c64_i32 : i32 to vector<512x8xi32>
    %149 = arith.muli %147, %148 : vector<512x8xi32>
    %150 = arith.cmpi sge, %146, %149 : vector<512x8xi32>
    %c1_i32_64 = arith.constant 1 : i32
    %151 = vector.broadcast %c1_i32_64 : i32 to vector<512x8xi32>
    %152 = arith.addi %147, %151 : vector<512x8xi32>
    %c64_i32_65 = arith.constant 64 : i32
    %153 = vector.broadcast %c64_i32_65 : i32 to vector<512x8xi32>
    %154 = arith.muli %152, %153 : vector<512x8xi32>
    %155 = arith.cmpi slt, %146, %154 : vector<512x8xi32>
    %156 = arith.andi %150, %155 : vector<512x8xi1>
    %157 = arith.extui %156 : vector<512x8xi1> to vector<512x8xi32>
    %158 = arith.sitofp %157 : vector<512x8xi32> to vector<512x8xf32>
    %159 = tpu.iota {dimensions = array<i32: 0>} : vector<8x512xi32>
    %160 = tpu.iota {dimensions = array<i32: 1>} : vector<8x512xi32>
    %c64_i32_66 = arith.constant 64 : i32
    %161 = vector.broadcast %c64_i32_66 : i32 to vector<8x512xi32>
    %162 = arith.muli %159, %161 : vector<8x512xi32>
    %163 = arith.cmpi sge, %160, %162 : vector<8x512xi32>
    %c1_i32_67 = arith.constant 1 : i32
    %164 = vector.broadcast %c1_i32_67 : i32 to vector<8x512xi32>
    %165 = arith.addi %159, %164 : vector<8x512xi32>
    %c64_i32_68 = arith.constant 64 : i32
    %166 = vector.broadcast %c64_i32_68 : i32 to vector<8x512xi32>
    %167 = arith.muli %165, %166 : vector<8x512xi32>
    %168 = arith.cmpi slt, %160, %167 : vector<8x512xi32>
    %169 = arith.andi %163, %168 : vector<8x512xi1>
    %170 = arith.extui %169 : vector<8x512xi1> to vector<8x512xi32>
    %171 = arith.sitofp %170 : vector<8x512xi32> to vector<8x512xf32>
    %cst_69 = arith.constant dense<0.000000e+00> : vector<1x8xf32>
    %172 = tpu.matmul %142, %158, %cst_69 {dimension_numbers = #tpu.dot_dimension_numbers<[1], [0], [0], [1], [0, 0, 1, 1], [], []>} : vector<1x512xf32>, vector<512x8xf32>, vector<1x8xf32> -> vector<1x8xf32>
    %cst_70 = arith.constant 1.280000e+02 : f32
    %173 = vector.broadcast %cst_70 : f32 to vector<1x8xf32>
    %174 = arith.divf %172, %173 : vector<1x8xf32>
    %cst_71 = arith.constant dense<0.000000e+00> : vector<1x8xf32>
    %175 = tpu.matmul %145, %158, %cst_71 {dimension_numbers = #tpu.dot_dimension_numbers<[1], [0], [0], [1], [0, 0, 1, 1], [], []>} : vector<1x512xf32>, vector<512x8xf32>, vector<1x8xf32> -> vector<1x8xf32>
    %cst_72 = arith.constant 1.280000e+02 : f32
    %176 = vector.broadcast %cst_72 : f32 to vector<1x8xf32>
    %177 = arith.divf %175, %176 : vector<1x8xf32>
    %178 = arith.mulf %174, %174 : vector<1x8xf32>
    %179 = arith.subf %177, %178 : vector<1x8xf32>
    %c0_73 = arith.constant 0 : index
    %c0_74 = arith.constant 0 : index
    %180 = vector.load %arg13[%c0_73, %c0_74] : memref<1x8xf32, #tpu.memory_space<vmem>>, vector<1x8xf32>
    %cst_75 = arith.constant 9.99999974E-6 : f32
    %181 = vector.broadcast %cst_75 : f32 to vector<1x8xf32>
    %182 = arith.addf %179, %181 : vector<1x8xf32>
    %183 = math.rsqrt %182 : vector<1x8xf32>
    %184 = arith.mulf %180, %183 : vector<1x8xf32>
    %c0_76 = arith.constant 0 : index
    %c0_77 = arith.constant 0 : index
    %185 = vector.load %arg14[%c0_76, %c0_77] : memref<1x8xf32, #tpu.memory_space<vmem>>, vector<1x8xf32>
    %186 = arith.mulf %174, %184 : vector<1x8xf32>
    %187 = arith.subf %185, %186 : vector<1x8xf32>
    %cst_78 = arith.constant dense<0.000000e+00> : vector<1x512xf32>
    %188 = tpu.matmul %184, %171, %cst_78 {dimension_numbers = #tpu.dot_dimension_numbers<[1], [0], [0], [1], [0, 0, 1, 1], [], []>} : vector<1x8xf32>, vector<8x512xf32>, vector<1x512xf32> -> vector<1x512xf32>
    %189 = vector.broadcast %188 : vector<1x512xf32> to vector<2x512xf32>
    %190 = arith.mulf %140, %189 : vector<2x512xf32>
    %cst_79 = arith.constant dense<0.000000e+00> : vector<1x512xf32>
    %191 = tpu.matmul %187, %171, %cst_79 {dimension_numbers = #tpu.dot_dimension_numbers<[1], [0], [0], [1], [0, 0, 1, 1], [], []>} : vector<1x8xf32>, vector<8x512xf32>, vector<1x512xf32> -> vector<1x512xf32>
    %192 = vector.broadcast %191 : vector<1x512xf32> to vector<2x512xf32>
    %193 = arith.addf %190, %192 : vector<2x512xf32>
    %cst_80 = arith.constant 0.000000e+00 : f32
    %194 = vector.broadcast %cst_80 : f32 to vector<2x512xf32>
    %195 = arith.maximumf %193, %194 : vector<2x512xf32>
    %196 = arith.truncf %195 : vector<2x512xf32> to vector<2x512xbf16>
    %c0_81 = arith.constant 0 : index
    %c0_82 = arith.constant 0 : index
    %197 = vector.load %arg15[%c0_81, %c0_82] : memref<512x768xbf16, #tpu.memory_space<vmem>>, vector<512x768xbf16>
    %cst_83 = arith.constant dense<0.000000e+00> : vector<2x768xf32>
    %198 = tpu.matmul %196, %197, %cst_83 {dimension_numbers = #tpu.dot_dimension_numbers<[1], [0], [0], [1], [0, 0, 1, 1], [], []>} : vector<2x512xbf16>, vector<512x768xbf16>, vector<2x768xf32> -> vector<2x768xf32>
    %c0_84 = arith.constant 0 : index
    %c0_85 = arith.constant 0 : index
    %199 = vector.load %arg16[%c0_84, %c0_85] : memref<1x768xf32, #tpu.memory_space<vmem>>, vector<1x768xf32>
    %200 = vector.broadcast %199 : vector<1x768xf32> to vector<2x768xf32>
    %201 = arith.addf %198, %200 : vector<2x768xf32>
    %202 = math.tanh %201 : vector<2x768xf32>
    %c0_86 = arith.constant 0 : index
    %c0_87 = arith.constant 0 : index
    %203 = vector.load %arg18[%c0_86, %c0_87] : memref<2x768xf32, #tpu.memory_space<vmem>>, vector<2x768xf32>
    tpu.vector_store %arg18[%c0_86, %c0_87], %202 {strides = array<i32>} : memref<2x768xf32, #tpu.memory_space<vmem>>, vector<2x768xf32>,
    return
  }
  func.func @transform_0(%arg0: i32) -> (i32, i32) {
    %c0_i32 = arith.constant 0 : i32
    %c0_i32_0 = arith.constant 0 : i32
    %c0_i32_1 = arith.constant 0 : i32
    return %c0_i32, %c0_i32_0 : i32, i32
  }
  func.func @transform_1(%arg0: i32) -> (i32, i32) {
    %c0_i32 = arith.constant 0 : i32
    %c0_i32_0 = arith.constant 0 : i32
    %c0_i32_1 = arith.constant 0 : i32
    return %c0_i32, %c0_i32_0 : i32, i32
  }
  func.func @transform_2(%arg0: i32) -> (i32, i32) {
    %c0_i32 = arith.constant 0 : i32
    %c0_i32_0 = arith.constant 0 : i32
    %c0_i32_1 = arith.constant 0 : i32
    return %c0_i32, %c0_i32_0 : i32, i32
  }
  func.func @transform_3(%arg0: i32) -> (i32, i32) {
    %c0_i32 = arith.constant 0 : i32
    %c0_i32_0 = arith.constant 0 : i32
    %c0_i32_1 = arith.constant 0 : i32
    return %c0_i32, %c0_i32_0 : i32, i32
  }
  func.func @transform_4(%arg0: i32) -> (i32, i32) {
    %c0_i32 = arith.constant 0 : i32
    %c0_i32_0 = arith.constant 0 : i32
    %c0_i32_1 = arith.constant 0 : i32
    return %c0_i32, %c0_i32_0 : i32, i32
  }
  func.func @transform_5(%arg0: i32) -> (i32, i32) {
    %c0_i32 = arith.constant 0 : i32
    %c0_i32_0 = arith.constant 0 : i32
    %c0_i32_1 = arith.constant 0 : i32
    return %c0_i32, %c0_i32_0 : i32, i32
  }
  func.func @transform_6(%arg0: i32) -> (i32, i32) {
    %c0_i32 = arith.constant 0 : i32
    %c0_i32_0 = arith.constant 0 : i32
    %c0_i32_1 = arith.constant 0 : i32
    return %c0_i32, %c0_i32_0 : i32, i32
  }
  func.func @transform_7(%arg0: i32) -> (i32, i32) {
    %c0_i32 = arith.constant 0 : i32
    %c0_i32_0 = arith.constant 0 : i32
    %c0_i32_1 = arith.constant 0 : i32
    return %c0_i32, %c0_i32_0 : i32, i32
  }
  func.func @transform_8(%arg0: i32) -> (i32, i32) {
    %c0_i32 = arith.constant 0 : i32
    %c0_i32_0 = arith.constant 0 : i32
    %c0_i32_1 = arith.constant 0 : i32
    return %c0_i32, %c0_i32_0 : i32, i32
  }
  func.func @transform_9(%arg0: i32) -> (i32, i32) {
    %c0_i32 = arith.constant 0 : i32
    %c0_i32_0 = arith.constant 0 : i32
    %c0_i32_1 = arith.constant 0 : i32
    return %c0_i32, %c0_i32_0 : i32, i32
  }
  func.func @transform_10(%arg0: i32) -> (i32, i32) {
    %c0_i32 = arith.constant 0 : i32
    %c0_i32_0 = arith.constant 0 : i32
    %c0_i32_1 = arith.constant 0 : i32
    return %c0_i32, %c0_i32_0 : i32, i32
  }
  func.func @transform_11(%arg0: i32) -> (i32, i32) {
    %c0_i32 = arith.constant 0 : i32
    %c0_i32_0 = arith.constant 0 : i32
    %c0_i32_1 = arith.constant 0 : i32
    return %c0_i32, %c0_i32_0 : i32, i32
  }
  func.func @transform_12(%arg0: i32) -> (i32, i32) {
    %c0_i32 = arith.constant 0 : i32
    %c0_i32_0 = arith.constant 0 : i32
    %c0_i32_1 = arith.constant 0 : i32
    return %c0_i32, %c0_i32_0 : i32, i32
  }
  func.func @transform_13(%arg0: i32) -> (i32, i32) {
    %c0_i32 = arith.constant 0 : i32
    %c0_i32_0 = arith.constant 0 : i32
    %c0_i32_1 = arith.constant 0 : i32
    return %c0_i32, %c0_i32_0 : i32, i32
  }
  func.func @transform_14(%arg0: i32) -> (i32, i32) {
    %c0_i32 = arith.constant 0 : i32
    %c0_i32_0 = arith.constant 0 : i32
    %c0_i32_1 = arith.constant 0 : i32
    return %c0_i32, %c0_i32_0 : i32, i32
  }
  func.func @transform_15(%arg0: i32) -> (i32, i32) {
    %c0_i32 = arith.constant 0 : i32
    %c0_i32_0 = arith.constant 0 : i32
    %c0_i32_1 = arith.constant 0 : i32
    return %c0_i32, %c0_i32_0 : i32, i32
  }
  func.func @transform_16(%arg0: i32) -> (i32, i32) {
    %c0_i32 = arith.constant 0 : i32
    %c0_i32_0 = arith.constant 0 : i32
    %c0_i32_1 = arith.constant 0 : i32
    return %c0_i32, %c0_i32_0 : i32, i32
  }
  func.func @transform_17(%arg0: i32) -> (i32, i32) {
    %c0_i32 = arith.constant 0 : i32
    %c0_i32_0 = arith.constant 0 : i32
    %c0_i32_1 = arith.constant 0 : i32
    return %c0_i32, %c0_i32_0 : i32, i32
  }
}

</mosaic_0001>

<bundles_post_ra>
// kernel: netd_forward.1
= control target key start
LH: loop header
LB: loop body
LE: loop exit
PB: predicated region body
PF: predicated region fallthrough
CT: control target
= control target key end

     0   :  { %s10829_s0 = inlined_call_operand.vmem [shape: f32[2,768], index: 0, kind: input, shape index: {}]   ;;  %s10830_s1 = inlined_call_operand.hbm [shape: bf16[768,512], index: 1, kind: input, shape index: {}]   ;;  %s10831_s2 = inlined_call_operand.vmem [shape: f32[1,512], index: 2, kind: input, shape index: {}]   ;;  %s10832_s3 = inlined_call_operand.hbm [shape: bf16[512,256], index: 3, kind: input, shape index: {}]   ;;  %s10833_s4 = inlined_call_operand.vmem [shape: f32[1,16], index: 4, kind: input, shape index: {}]   ;;  %s10834_s5 = inlined_call_operand.vmem [shape: f32[1,16], index: 5, kind: input, shape index: {}]   ;;  %s10835_s6 = inlined_call_operand.vmem [shape: bf16[256,16], index: 6, kind: input, shape index: {}]   ;;  %s10836_s7 = inlined_call_operand.vmem [shape: f32[1,16], index: 7, kind: input, shape index: {}]   ;;  %s10837_s8 = inlined_call_operand.vmem [shape: bf16[16,256], index: 8, kind: input, shape index: {}]   ;;  %s10838_s9 = inlined_call_operand.vmem [shape: f32[1,16], index: 9, kind: input, shape index: {}]   ;;  %s10839_s10 = inlined_call_operand.vmem [shape: f32[1,16], index: 10, kind: input, shape index: {}]   ;;  %s10840_s11 = inlined_call_operand.hbm [shape: bf16[256,512], index: 11, kind: input, shape index: {}]   ;;  %s10841_s12 = inlined_call_operand.vmem [shape: f32[1,8], index: 12, kind: input, shape index: {}]   ;;  %s10842_s13 = inlined_call_operand.vmem [shape: f32[1,8], index: 13, kind: input, shape index: {}]   ;;  %s10843_s14 = inlined_call_operand.hbm [shape: bf16[512,768], index: 14, kind: input, shape index: {}]   ;;  %s10844_s15 = inlined_call_operand.vmem [shape: f32[1,768], index: 15, kind: input, shape index: {}]   ;;  %s10845_s16 = inlined_call_operand.hbm [shape: f32[2,16], index: 16, kind: output, shape index: {0}]   ;;  %s10846_s17 = inlined_call_operand.hbm [shape: f32[2,768], index: 17, kind: output, shape index: {1}]  }
   0x1   :  { %11039 = sst [smem:[#allocation55_spill]] %s10829_s0 }
   0x2   :  { %11040 = sst [smem:[#allocation56_spill]] %s10830_s1 }
   0x3   :  { %11041 = sst [smem:[#allocation57_spill]] %s10846_s17 }
   0x4   :  { %23 = vsyncpa [#allocation3], 0 }
   0x5   :  { %24 = vsyncpa [#allocation6], 0 }
   0x6   :  { %25 = vsyncpa [#allocation9], 0 }
   0x7   :  { %26 = vsyncpa [#allocation4], 0 }
   0x8   :  { %27 = vsyncpa [#allocation12], 0  ;;  %s8770_s24 = smov [#allocation5]   ;;  %s8628_s28 = scalar_lea.hbm %s10832_s3, 8192 }
   0x9   :  { %s49_s25 = sshll.u32 %s8770_s24, 4  ;;  %p8629_p0 = scmp.ne.s32.totalorder %s10832_s3, %s8628_s28  ;;  %s50_s25 = int_to_ptr.vmem [resolvable:$true] %s49_s25 }
   0xa   :  { %p8632_p1 = scmp.lt.u32.totalorder %s8628_s28, %s10832_s3 }
   0xc   :  { %p8634_p2 = pnand %p8632_p1, %p8629_p0 }
   0xe   :  { %8637 = shalt.err (!%p8634_p2)
}
   0xf   :  { %s8638_s19 = scalar_lea.vmem %s50_s25, 8192  ;;  %p8643_p4 = scmp.lt.s32.totalorder %s50_s25, %s50_s25 }
  0x10   :  { %p8639_p3 = scmp.ne.s32.totalorder %s50_s25, %s8638_s19  ;;  %p8644_p5 = scmp.lt.s32.totalorder %s8638_s19, %s8638_s19 }
  0x12   :  { %p8645_p6 = por %p8644_p5, %p8643_p4 }
  0x14   :  { %p8646_p7 = pnand %p8645_p6, %p8639_p3 }
  0x16   :  { %8649 = shalt.err (!%p8646_p7)
}
  0x17   :  { %s8771_s1 = smov 128   ;;  %s8772_s20 = smov 8  }
  0x18   :  { %55 = dma.hbm_to_vmem [thread:$0]  %s10832_s3, 8192, %s50_s25, [#allocation6], %s8771_s1, %s8771_s1, %s8772_s20  }
  0x19   :  { %s8773_s23 = smov [#allocation2]   ;;  %s11042_s28 = sld [smem:[#allocation56_spill]] }
  0x1a   :  { %s35_s24 = sshll.u32 %s8773_s23, 4  ;;  %s36_s24 = int_to_ptr.vmem [resolvable:$true] %s35_s24 }
  0x1f   :  { %s8650_s29 = scalar_lea.hbm %s11042_s28, 24576 }
  0x20   :  { %p8651_p8 = scmp.ne.s32.totalorder %s11042_s28, %s8650_s29  ;;  %p8654_p9 = scmp.lt.u32.totalorder %s8650_s29, %s11042_s28 }
  0x22   :  { %p8656_p10 = pnand %p8654_p9, %p8651_p8 }
  0x24   :  { %8659 = shalt.err (!%p8656_p10)
}
  0x25   :  { %s8660_s17 = scalar_lea.vmem %s36_s24, 24576  ;;  %p8665_p12 = scmp.lt.s32.totalorder %s36_s24, %s36_s24 }
  0x26   :  { %p8661_p11 = scmp.ne.s32.totalorder %s36_s24, %s8660_s17  ;;  %p8666_p13 = scmp.lt.s32.totalorder %s8660_s17, %s8660_s17 }
  0x28   :  { %p8667_p0 = por %p8666_p13, %p8665_p12 }
  0x2a   :  { %p8668_p1 = pnand %p8667_p0, %p8661_p11 }
  0x2c   :  { %8671 = shalt.err (!%p8668_p1)
}
  0x2d   :  { %s8774_s3 = smov 256   ;;  %s8775_s25 = smov 16  }
  0x2e   :  { %41 = dma.hbm_to_vmem [thread:$0]  %s11042_s28, 24576, %s36_s24, [#allocation3], %s8774_s3, %s8774_s3, %s8775_s25  }
  0x2f   :  { %s8776_s21 = smov [#allocation7]   ;;  %s8777_s23 = smov [#allocation8]  }
  0x30   :  { %s75_s22 = sshll.u32 %s8776_s21, 4  ;;  %s91_s26 = sshll.u32 %s8777_s23, 4  ;;  %s76_s22 = int_to_ptr.vmem [resolvable:$true] %s75_s22  ;;  %s8901_s26 = int_to_ptr.vmem [resolvable:$true] %s91_s26 }
  0x31   :  { %s8672_s17 = scalar_lea.hbm %s10840_s11, 8192 }
  0x32   :  { %p8673_p2 = scmp.ne.s32.totalorder %s10840_s11, %s8672_s17  ;;  %p8676_p3 = scmp.lt.u32.totalorder %s8672_s17, %s10840_s11 }
  0x34   :  { %p8678_p4 = pnand %p8676_p3, %p8673_p2 }
  0x36   :  { %8681 = shalt.err (!%p8678_p4)
}
  0x37   :  { %s8682_s24 = scalar_lea.vmem %s76_s22, 8192  ;;  %p8687_p6 = scmp.lt.s32.totalorder %s76_s22, %s76_s22 }
  0x38   :  { %p8683_p5 = scmp.ne.s32.totalorder %s76_s22, %s8682_s24  ;;  %p8688_p7 = scmp.lt.s32.totalorder %s8682_s24, %s8682_s24 }
  0x3a   :  { %p8689_p8 = por %p8688_p7, %p8687_p6 }
  0x3c   :  { %p8690_p9 = pnand %p8689_p8, %p8683_p5 }
  0x3e   :  { %8693 = shalt.err (!%p8690_p9)
}
  0x3f   :  { %81 = dma.hbm_to_vmem [thread:$0]  %s10840_s11, 8192, %s76_s22, [#allocation6], %s8774_s3, %s8774_s3, %s8775_s25  }
  0x40   :  { %s8694_s23 = scalar_lea.hbm %s10843_s14, 24576 }
  0x41   :  { %p8695_p10 = scmp.ne.s32.totalorder %s10843_s14, %s8694_s23  ;;  %p8698_p11 = scmp.lt.u32.totalorder %s8694_s23, %s10843_s14 }
  0x43   :  { %p8700_p12 = pnand %p8698_p11, %p8695_p10 }
  0x45   :  { %8703 = shalt.err (!%p8700_p12)
}
  0x46   :  { %s8704_s30 = scalar_lea.vmem %s8901_s26, 24576  ;;  %p8709_p0 = scmp.lt.s32.totalorder %s8901_s26, %s8901_s26 }
  0x47   :  { %p8705_p13 = scmp.ne.s32.totalorder %s8901_s26, %s8704_s30  ;;  %p8710_p1 = scmp.lt.s32.totalorder %s8704_s30, %s8704_s30 }
  0x49   :  { %p8711_p2 = por %p8710_p1, %p8709_p0 }
  0x4b   :  { %p8712_p3 = pnand %p8711_p2, %p8705_p13 }
  0x4d   :  { %8715 = shalt.err (!%p8712_p3)
}
  0x4e   :  { %s8778_s11 = smov 384   ;;  %s8779_s3 = smov 24  }
  0x4f   :  { %97 = dma.hbm_to_vmem [thread:$0]  %s10843_s14, 24576, %s8901_s26, [#allocation9], %s8778_s11, %s8778_s11, %s8779_s3  }
  0x50   :  { %8760 = dma.done.wait [#allocation3], 24576  }
  0x51   :  { %8761 = vsyncadd [#allocation3], 4294942720 }
  0x52   :  { %8762 = dma.done.wait [#allocation6], 16384  }
  0x53   :  { %8763 = vsyncadd [#allocation6], 4294950912 }
  0x54   :  { %8764 = dma.done.wait [#allocation9], 24576  }
  0x55   :  { %8765 = vsyncadd [#allocation9], 4294942720  ;;  %v7822_v0 = vld [vmem:[#allocation2 + $0x4] ss:$16 sps:$4 sm:$0xff]   ;;  %v7826_v2 = vld [vmem:[#allocation2] ss:$16 sps:$4 sm:$0xff]   ;;  %v121_v38 = vlaneseq }
  0x56   :  { %v7824_v1 = vld [vmem:[#allocation2 + $0x204] ss:$16 sps:$4 sm:$0xff]   ;;  %1328 = vmatprep.subr.bf16.mxu1 %v7822_v0  ;;  %v7827_v3 = vld [vmem:[#allocation2 + $0x200] ss:$16 sps:$4 sm:$0xff]   ;;  %v8780_v36 = vmov 1983009808  }
  0x57   :  { %1369 = vmatprep.subr.bf16.mxu0 %v7824_v1  ;;  %v7828_v4 = vld [vmem:[#allocation2 + $0x24] ss:$16 sps:$4 sm:$0xff]   ;;  %1329 = vmatpush1.bf16.msra.mxu1 %v7826_v2  ;;  %v7832_v6 = vld [vmem:[#allocation2 + $0x20] ss:$16 sps:$4 sm:$0xff]   ;;  %v119_v37 = vunpack.c.l.s4 %v8780_v36  ;;  %v8933_v43 = vshrl.u32 %v121_v38, 7  ;;  %s11045_s18 = sld [smem:[#allocation55_spill]] }
  0x58   :  { %1370 = vmatpush1.bf16.msra.mxu0 %v7827_v3  ;;  %v7830_v5 = vld [vmem:[#allocation2 + $0x224] ss:$16 sps:$4 sm:$0xff]   ;;  %1330 = vmatprep.subr.bf16.mxu1 %v7828_v4  ;;  %v7833_v7 = vld [vmem:[#allocation2 + $0x220] ss:$16 sps:$4 sm:$0xff]  }
  0x59   :  { %1371 = vmatprep.subr.bf16.mxu0 %v7830_v5  ;;  %v7834_v8 = vld [vmem:[#allocation2 + $0x44] ss:$16 sps:$4 sm:$0xff]   ;;  %v7838_v10 = vld [vmem:[#allocation2 + $0x40] ss:$16 sps:$4 sm:$0xff]   ;;  %v120_v42 = vunpack.c.0.s8 %v119_v37  ;;  %11043 = vst [vmem:[#allocation18_spill] sm:$0xff] %v8933_v43 }
  0x5a   :  { %v7836_v9 = vld [vmem:[#allocation2 + $0x244] ss:$16 sps:$4 sm:$0xff]   ;;  %v7839_v11 = vld [vmem:[#allocation2 + $0x240] ss:$16 sps:$4 sm:$0xff]   ;;  %v7954_v37 = vld [vmem:[#allocation2 + $0xac] ss:$16 sps:$4 sm:$0xff]  }
  0x5b   :  { %1331 = vmatpush1.bf16.msra.mxu1 %v7832_v6  ;;  %v7840_v12 = vld [vmem:[#allocation2 + $0x64] ss:$16 sps:$4 sm:$0xff]   ;;  %v7844_v14 = vld [vmem:[#allocation2 + $0x60] ss:$16 sps:$4 sm:$0xff]   ;;  %v8936_v49 = vsub.s32 %v120_v42, %v8933_v43  ;;  %v7960_v42 = vld [vmem:[#allocation2 + $0xcc] ss:$16 sps:$4 sm:$0xff]  }
  0x5c   :  { %1372 = vmatpush1.bf16.msra.mxu0 %v7833_v7  ;;  %1332 = vmatprep.subr.bf16.mxu1 %v7834_v8  ;;  %v7842_v13 = vld [vmem:[#allocation2 + $0x264] ss:$16 sps:$4 sm:$0xff]   ;;  %v7845_v15 = vld [vmem:[#allocation2 + $0x260] ss:$16 sps:$4 sm:$0xff]  }
  0x5d   :  { %1373 = vmatprep.subr.bf16.mxu0 %v7836_v9  ;;  %v7846_v16 = vld [vmem:[#allocation2 + $0x84] ss:$16 sps:$4 sm:$0xff]   ;;  %v7850_v18 = vld [vmem:[#allocation2 + $0x80] ss:$16 sps:$4 sm:$0xff]   ;;  %11044 = vst [vmem:[#allocation19_spill] sm:$0xff] %v8936_v49 }
  0x5e   :  { %v7848_v17 = vld [vmem:[#allocation2 + $0x284] ss:$16 sps:$4 sm:$0xff]   ;;  %v7851_v19 = vld [vmem:[#allocation2 + $0x280] ss:$16 sps:$4 sm:$0xff]  }
  0x5f   :  { %1333 = vmatpush1.bf16.msra.mxu1 %v7838_v10  ;;  %v7852_v20 = vld [vmem:[#allocation2 + $0xa4] ss:$16 sps:$4 sm:$0xff]   ;;  %v7856_v22 = vld [vmem:[#allocation2 + $0xa0] ss:$16 sps:$4 sm:$0xff]  }
  0x60   :  { %1374 = vmatpush1.bf16.msra.mxu0 %v7839_v11  ;;  %1334 = vmatprep.subr.bf16.mxu1 %v7840_v12  ;;  %v7854_v21 = vld [vmem:[#allocation2 + $0x2a4] ss:$16 sps:$4 sm:$0xff]   ;;  %v7857_v23 = vld [vmem:[#allocation2 + $0x2a0] ss:$16 sps:$4 sm:$0xff]  }
  0x61   :  { %1375 = vmatprep.subr.bf16.mxu0 %v7842_v13  ;;  %v7858_v24 = vld [vmem:[#allocation2 + $0xc4] ss:$16 sps:$4 sm:$0xff]   ;;  %v7862_v26 = vld [vmem:[#allocation2 + $0xc0] ss:$16 sps:$4 sm:$0xff]  }
  0x62   :  { %v7860_v25 = vld [vmem:[#allocation2 + $0x2c4] ss:$16 sps:$4 sm:$0xff]   ;;  %v7863_v27 = vld [vmem:[#allocation2 + $0x2c0] ss:$16 sps:$4 sm:$0xff]  }
  0x63   :  { %1335 = vmatpush1.bf16.msra.mxu1 %v7844_v14  ;;  %v7864_v28 = vld [vmem:[#allocation2 + $0xe4] ss:$16 sps:$4 sm:$0xff]   ;;  %v7868_v30 = vld [vmem:[#allocation2 + $0xe0] ss:$16 sps:$4 sm:$0xff]  }
  0x64   :  { %1376 = vmatpush1.bf16.msra.mxu0 %v7845_v15  ;;  %1336 = vmatprep.subr.bf16.mxu1 %v7846_v16  ;;  %v7866_v29 = vld [vmem:[#allocation2 + $0x2e4] ss:$16 sps:$4 sm:$0xff]   ;;  %v7869_v31 = vld [vmem:[#allocation2 + $0x2e0] ss:$16 sps:$4 sm:$0xff]   ;;  %v7924_v15 = vld [vmem:[#allocation2 + $0xc] ss:$16 sps:$4 sm:$0xff]  }
  0x65   :  { %1377 = vmatprep.subr.bf16.mxu0 %v7848_v17  ;;  %v7870_v32 = vld [vmem:[#allocation2 + $0x104] ss:$16 sps:$4 sm:$0xff]   ;;  %v7874_v34 = vld [vmem:[#allocation2 + $0x100] ss:$16 sps:$4 sm:$0xff]  }
  0x66   :  { %v7872_v33 = vld [vmem:[#allocation2 + $0x304] ss:$16 sps:$4 sm:$0xff]   ;;  %v7875_v35 = vld [vmem:[#allocation2 + $0x300] ss:$16 sps:$4 sm:$0xff]  }
  0x67   :  { %1337 = vmatpush1.bf16.msra.mxu1 %v7850_v18  ;;  %v7876_v39 = vld [vmem:[#allocation2 + $0x124] ss:$16 sps:$4 sm:$0xff]   ;;  %v7880_v41 = vld [vmem:[#allocation2 + $0x120] ss:$16 sps:$4 sm:$0xff]  }
  0x68   :  { %1378 = vmatpush1.bf16.msra.mxu0 %v7851_v19  ;;  %1338 = vmatprep.subr.bf16.mxu1 %v7852_v20  ;;  %v7878_v40 = vld [vmem:[#allocation2 + $0x324] ss:$16 sps:$4 sm:$0xff]   ;;  %v7881_v44 = vld [vmem:[#allocation2 + $0x320] ss:$16 sps:$4 sm:$0xff]   ;;  %v7922_v19 = vld [vmem:[#allocation2 + $0x8] ss:$16 sps:$4 sm:$0xff]  }
  0x69   :  { %1379 = vmatprep.subr.bf16.mxu0 %v7854_v21  ;;  %v7882_v45 = vld [vmem:[#allocation2 + $0x144] ss:$16 sps:$4 sm:$0xff]   ;;  %v7886_v47 = vld [vmem:[#allocation2 + $0x140] ss:$16 sps:$4 sm:$0xff]   ;;  %v7930_v21 = vld [vmem:[#allocation2 + $0x2c] ss:$16 sps:$4 sm:$0xff]  }
  0x6a   :  { %v7884_v46 = vld [vmem:[#allocation2 + $0x344] ss:$16 sps:$4 sm:$0xff]   ;;  %v7887_v48 = vld [vmem:[#allocation2 + $0x340] ss:$16 sps:$4 sm:$0xff]  }
  0x6b   :  { %1339 = vmatpush1.bf16.msra.mxu1 %v7856_v22  ;;  %v7888_v50 = vld [vmem:[#allocation2 + $0x164] ss:$16 sps:$4 sm:$0xff]   ;;  %v7892_v53 = vld [vmem:[#allocation2 + $0x160] ss:$16 sps:$4 sm:$0xff]  }
  0x6c   :  { %1380 = vmatpush1.bf16.msra.mxu0 %v7857_v23  ;;  %1340 = vmatprep.subr.bf16.mxu1 %v7858_v24  ;;  %v7890_v51 = vld [vmem:[#allocation2 + $0x364] ss:$16 sps:$4 sm:$0xff]   ;;  %v7893_v56 = vld [vmem:[#allocation2 + $0x360] ss:$16 sps:$4 sm:$0xff]   ;;  %v7928_v23 = vld [vmem:[#allocation2 + $0x28] ss:$16 sps:$4 sm:$0xff]  }
  0x6d   :  { %1381 = vmatprep.subr.bf16.mxu0 %v7860_v25  ;;  %v113_v52 = vld [vmem:[%s11045_s18] sm:$0xff]  ;;  %v7936_v25 = vld [vmem:[#allocation2 + $0x4c] ss:$16 sps:$4 sm:$0xff]  }
  0x6e   :  { %v124_v54 = vrot.slane %v113_v52, %v8936_v49  ;;  %v117_v55 = vcombine.high %v113_v52, %v113_v52  ;;  %v7894_v57 = vld [vmem:[#allocation2 + $0x184] ss:$16 sps:$4 sm:$0xff]   ;;  %v7898_v61 = vld [vmem:[#allocation2 + $0x180] ss:$16 sps:$4 sm:$0xff]  }
  0x6f   :  { %1341 = vmatpush1.bf16.msra.mxu1 %v7862_v26  ;;  %v7896_v58 = vld [vmem:[#allocation2 + $0x384] ss:$16 sps:$4 sm:$0xff]   ;;  %v7899_v0 = vld [vmem:[#allocation2 + $0x380] ss:$16 sps:$4 sm:$0xff]  }
  0x70   :  { %1382 = vmatpush1.bf16.msra.mxu0 %v7863_v27  ;;  %1342 = vmatprep.subr.bf16.mxu1 %v7864_v28  ;;  %v132_v59 = vcombine.high %v124_v54, %v124_v54  ;;  %v131_v60 = vrot.slane %v117_v55, %v8936_v49  ;;  %v7900_v1 = vld [vmem:[#allocation2 + $0x1a4] ss:$16 sps:$4 sm:$0xff]   ;;  %v7904_v4 = vld [vmem:[#allocation2 + $0x1a0] ss:$16 sps:$4 sm:$0xff]   ;;  %v8946_v16 = vpack.c.bf16 %v124_v54, %v124_v54  ;;  %v7934_v27 = vld [vmem:[#allocation2 + $0x48] ss:$16 sps:$4 sm:$0xff]  }
  0x71   :  { %1383 = vmatprep.subr.bf16.mxu0 %v7866_v29  ;;  %v7902_v2 = vld [vmem:[#allocation2 + $0x3a4] ss:$16 sps:$4 sm:$0xff]   ;;  %v7905_v5 = vld [vmem:[#allocation2 + $0x3a0] ss:$16 sps:$4 sm:$0xff]   ;;  %v7942_v29 = vld [vmem:[#allocation2 + $0x6c] ss:$16 sps:$4 sm:$0xff]  }
  0x72   :  { %v149_v62 = vpack.c.bf16 %v132_v59, %v132_v59  ;;  %v133_v63 = vcombine.high %v131_v60, %v131_v60  ;;  %v7906_v6 = vld [vmem:[#allocation2 + $0x1c4] ss:$16 sps:$4 sm:$0xff]   ;;  %v7910_v8 = vld [vmem:[#allocation2 + $0x1c0] ss:$16 sps:$4 sm:$0xff]   ;;  %v8948_v18 = vpack.c.bf16 %v131_v60, %v131_v60  ;;  %v7972_v55 = vld [vmem:[#allocation2 + $0x10c] ss:$16 sps:$4 sm:$0xff]  }
  0x73   :  { %1343 = vmatpush1.bf16.msra.mxu1 %v7868_v30  ;;  %v7908_v7 = vld [vmem:[#allocation2 + $0x3c4] ss:$16 sps:$4 sm:$0xff]   ;;  %v7911_v9 = vld [vmem:[#allocation2 + $0x3c0] ss:$16 sps:$4 sm:$0xff]   ;;  %v7978_v59 = vld [vmem:[#allocation2 + $0x12c] ss:$16 sps:$4 sm:$0xff]  }
  0x74   :  { %1384 = vmatpush1.bf16.msra.mxu0 %v7869_v31  ;;  %1344 = vmatprep.subr.bf16.mxu1 %v7870_v32  ;;  %v8943_v3 = vpack.c.bf16 %v133_v63, %v133_v63  ;;  %v7912_v10 = vld [vmem:[#allocation2 + $0x1e4] ss:$16 sps:$4 sm:$0xff]   ;;  %v7916_v12 = vld [vmem:[#allocation2 + $0x1e0] ss:$16 sps:$4 sm:$0xff]   ;;  %v7940_v31 = vld [vmem:[#allocation2 + $0x68] ss:$16 sps:$4 sm:$0xff]  }
  0x75   :  { %1385 = vmatprep.subr.bf16.mxu0 %v7872_v33  ;;  %1360 = vmatprep.mubr.bf16.mxu1 %v149_v62  ;;  %v7914_v11 = vld [vmem:[#allocation2 + $0x3e4] ss:$16 sps:$4 sm:$0xff]   ;;  %v7917_v13 = vld [vmem:[#allocation2 + $0x3e0] ss:$16 sps:$4 sm:$0xff]   ;;  %v7948_v33 = vld [vmem:[#allocation2 + $0x8c] ss:$16 sps:$4 sm:$0xff]  }
  0x76   :  { %1401 = vmatprep.mubr.bf16.mxu0 %v8943_v3  ;;  %v7921_v14 = vld [vmem:[#allocation2 + $0x404] ss:$16 sps:$4 sm:$0xff]   ;;  %v7919_v17 = vld [vmem:[#allocation2 + $0x400] ss:$16 sps:$4 sm:$0xff]   ;;  %v7984_v63 = vld [vmem:[#allocation2 + $0x14c] ss:$16 sps:$4 sm:$0xff]  }
  0x77   :  { %1345 = vmatpush1.bf16.msra.mxu1 %v7874_v34  ;;  %v7927_v20 = vld [vmem:[#allocation2 + $0x424] ss:$16 sps:$4 sm:$0xff]   ;;  %v7925_v22 = vld [vmem:[#allocation2 + $0x420] ss:$16 sps:$4 sm:$0xff]  }
  0x78   :  { %1386 = vmatpush1.bf16.msra.mxu0 %v7875_v35  ;;  %1346 = vmatprep.subr.bf16.mxu1 %v7876_v39  ;;  %v7933_v24 = vld [vmem:[#allocation2 + $0x444] ss:$16 sps:$4 sm:$0xff]   ;;  %v7931_v26 = vld [vmem:[#allocation2 + $0x440] ss:$16 sps:$4 sm:$0xff]   ;;  %v7946_v35 = vld [vmem:[#allocation2 + $0x88] ss:$16 sps:$4 sm:$0xff]  }
  0x79   :  { %1387 = vmatprep.subr.bf16.mxu0 %v7878_v40  ;;  %v7939_v28 = vld [vmem:[#allocation2 + $0x464] ss:$16 sps:$4 sm:$0xff]   ;;  %v7937_v30 = vld [vmem:[#allocation2 + $0x460] ss:$16 sps:$4 sm:$0xff]   ;;  %v7952_v40 = vld [vmem:[#allocation2 + $0xa8] ss:$16 sps:$4 sm:$0xff]  }
  0x7a   :  { %v7945_v32 = vld [vmem:[#allocation2 + $0x484] ss:$16 sps:$4 sm:$0xff]   ;;  %v7943_v34 = vld [vmem:[#allocation2 + $0x480] ss:$16 sps:$4 sm:$0xff]  }
  0x7b   :  { %1347 = vmatpush1.bf16.msra.mxu1 %v7880_v41  ;;  %v7951_v36 = vld [vmem:[#allocation2 + $0x4a4] ss:$16 sps:$4 sm:$0xff]   ;;  %v7949_v39 = vld [vmem:[#allocation2 + $0x4a0] ss:$16 sps:$4 sm:$0xff]  }
  0x7c   :  { %1388 = vmatpush1.bf16.msra.mxu0 %v7881_v44  ;;  %1348 = vmatprep.subr.bf16.mxu1 %v7882_v45  ;;  %v7957_v41 = vld [vmem:[#allocation2 + $0x4c4] ss:$16 sps:$4 sm:$0xff]   ;;  %v8955_v44 = vld.sshfl [vmem:[%s11045_s18 + $0x8] sm:$0x33 pattern:$0x76325410] }
  0x7d   :  { %1389 = vmatprep.subr.bf16.mxu0 %v7884_v46  ;;  %v141_v45 = vcombine.high %v8955_v44, %v8955_v44  ;;  %v7955_v46 = vld [vmem:[#allocation2 + $0x4c0] ss:$16 sps:$4 sm:$0xff]   ;;  %v7969_v54 = vld [vmem:[#allocation2 + $0x504] ss:$16 sps:$4 sm:$0xff]  }
  0x7e   :  { %v7961_v52 = vld [vmem:[#allocation2 + $0x4e0] ss:$16 sps:$4 sm:$0xff]  }
  0x7f   :  { %1349 = vmatpush1.bf16.msra.mxu1 %v7886_v47  ;;  %v7958_v47 = vld [vmem:[#allocation2 + $0xc8] ss:$16 sps:$4 sm:$0xff]   ;;  %v7973_v60 = vld [vmem:[#allocation2 + $0x520] ss:$16 sps:$4 sm:$0xff]  }
  0x80   :  { %1390 = vmatpush1.bf16.msra.mxu0 %v7887_v48  ;;  %1350 = vmatprep.subr.bf16.mxu1 %v7888_v50  ;;  %v7963_v48 = vld [vmem:[#allocation2 + $0x4e4] ss:$16 sps:$4 sm:$0xff]   ;;  %v7966_v50 = vld [vmem:[#allocation2 + $0xec] ss:$16 sps:$4 sm:$0xff]  }
  0x81   :  { %1391 = vmatprep.subr.bf16.mxu0 %v7890_v51  ;;  %v8959_v51 = vpack.c.bf16 %v141_v45, %v141_v45  ;;  %v8114_v45 = vld [vmem:[#allocation5 + $0x10] ss:$8 sps:$4 sm:$0xff]  }
  0x83   :  { %1351 = vmatpush1.bf16.msra.mxu1 %v7892_v53  ;;  %v7964_v53 = vld [vmem:[#allocation2 + $0xe8] ss:$16 sps:$4 sm:$0xff]  }
  0x84   :  { %1392 = vmatpush1.bf16.msra.mxu0 %v7893_v56  ;;  %1352 = vmatprep.subr.bf16.mxu1 %v7894_v57  ;;  %v7967_v56 = vld [vmem:[#allocation2 + $0x500] ss:$16 sps:$4 sm:$0xff]   ;;  %v7970_v57 = vld [vmem:[#allocation2 + $0x108] ss:$16 sps:$4 sm:$0xff]  }
  0x85   :  { %1393 = vmatprep.subr.bf16.mxu0 %v7896_v58  ;;  %v7975_v58 = vld [vmem:[#allocation2 + $0x524] ss:$16 sps:$4 sm:$0xff]  }
  0x87   :  { %1353 = vmatpush1.bf16.msra.mxu1 %v7898_v61  ;;  %v7976_v61 = vld [vmem:[#allocation2 + $0x128] ss:$16 sps:$4 sm:$0xff]  }
  0x88   :  { %1394 = vmatpush1.bf16.msra.mxu0 %v7899_v0  ;;  %1354 = vmatprep.subr.bf16.mxu1 %v7900_v1  ;;  %v7979_v0 = vld [vmem:[#allocation2 + $0x540] ss:$16 sps:$4 sm:$0xff]   ;;  %v7982_v1 = vld [vmem:[#allocation2 + $0x148] ss:$16 sps:$4 sm:$0xff]  }
  0x89   :  { %1395 = vmatprep.subr.bf16.mxu0 %v7902_v2  ;;  %v7987_v2 = vld [vmem:[#allocation2 + $0x564] ss:$16 sps:$4 sm:$0xff]  }
  0x8b   :  { %1355 = vmatpush1.bf16.msra.mxu1 %v7904_v4  ;;  %v7990_v4 = vld [vmem:[#allocation2 + $0x16c] ss:$16 sps:$4 sm:$0xff]  }
  0x8c   :  { %1396 = vmatpush1.bf16.msra.mxu0 %v7905_v5  ;;  %1356 = vmatprep.subr.bf16.mxu1 %v7906_v6  ;;  %v7985_v5 = vld [vmem:[#allocation2 + $0x560] ss:$16 sps:$4 sm:$0xff]   ;;  %v7988_v6 = vld [vmem:[#allocation2 + $0x168] ss:$16 sps:$4 sm:$0xff]  }
  0x8d   :  { %1397 = vmatprep.subr.bf16.mxu0 %v7908_v7  ;;  %v7993_v7 = vld [vmem:[#allocation2 + $0x584] ss:$16 sps:$4 sm:$0xff]  }
  0x8f   :  { %1357 = vmatpush1.bf16.msra.mxu1 %v7910_v8  ;;  %v7996_v8 = vld [vmem:[#allocation2 + $0x18c] ss:$16 sps:$4 sm:$0xff]  }
  0x90   :  { %1398 = vmatpush1.bf16.msra.mxu0 %v7911_v9  ;;  %1358 = vmatprep.subr.bf16.mxu1 %v7912_v10  ;;  %v7991_v9 = vld [vmem:[#allocation2 + $0x580] ss:$16 sps:$4 sm:$0xff]   ;;  %v7994_v10 = vld [vmem:[#allocation2 + $0x188] ss:$16 sps:$4 sm:$0xff]  }
  0x91   :  { %1399 = vmatprep.subr.bf16.mxu0 %v7914_v11  ;;  %v7999_v11 = vld [vmem:[#allocation2 + $0x5a4] ss:$16 sps:$4 sm:$0xff]  }
  0x93   :  { %1359 = vmatpush1.bf16.msra.mxu1 %v7916_v12  ;;  %v8002_v12 = vld [vmem:[#allocation2 + $0x1ac] ss:$16 sps:$4 sm:$0xff]  }
  0x94   :  { %1400 = vmatpush1.bf16.msra.mxu0 %v7917_v13  ;;  %1451 = vmatprep.subr.bf16.mxu1 %v7924_v15  ;;  %v7997_v13 = vld [vmem:[#allocation2 + $0x5a0] ss:$16 sps:$4 sm:$0xff]   ;;  %v8005_v15 = vld [vmem:[#allocation2 + $0x5c4] ss:$16 sps:$4 sm:$0xff]  }
  0x95   :  { %1410 = vmatprep.subr.bf16.mxu0 %v7921_v14  ;;  %v8000_v14 = vld [vmem:[#allocation2 + $0x1a8] ss:$16 sps:$4 sm:$0xff]  }
  0x96   :  { %1361 = vmatmul.mubr.bf16.vlgmr.msra.gmra.mrb[0].mxu1 %v8946_v16 }
  0x97   :  { %1402 = vmatmul.mubr.bf16.vlgmr.msra.gmra.mrb[0].mxu0 %v8948_v18  ;;  %1452 = vmatpush1.bf16.msra.mxu1 %v7922_v19  ;;  %v8003_v19 = vld [vmem:[#allocation2 + $0x5c0] ss:$16 sps:$4 sm:$0xff]  }
  0x98   :  { %1411 = vmatpush1.bf16.msra.mxu0 %v7919_v17  ;;  %1453 = vmatprep.subr.bf16.mxu1 %v7930_v21  ;;  %v8008_v17 = vld [vmem:[#allocation2 + $0x1cc] ss:$16 sps:$4 sm:$0xff]   ;;  %v8011_v21 = vld [vmem:[#allocation2 + $0x5e4] ss:$16 sps:$4 sm:$0xff]  }
  0x99   :  { %1412 = vmatprep.subr.bf16.mxu0 %v7927_v20  ;;  %1483 = vmatprep.mubr.bf16.mxu1 %v149_v62  ;;  %v7981_v62 = vld [vmem:[#allocation2 + $0x544] ss:$16 sps:$4 sm:$0xff]   ;;  %v8006_v20 = vld [vmem:[#allocation2 + $0x1c8] ss:$16 sps:$4 sm:$0xff]  }
  0x9a   :  { %1442 = vmatprep.mubr.bf16.mxu0 %v8959_v51 }
  0x9b   :  { %1454 = vmatpush1.bf16.msra.mxu1 %v7928_v23  ;;  %v8009_v23 = vld [vmem:[#allocation2 + $0x5e0] ss:$16 sps:$4 sm:$0xff]  }
  0x9c   :  { %1413 = vmatpush1.bf16.msra.mxu0 %v7925_v22  ;;  %1455 = vmatprep.subr.bf16.mxu1 %v7936_v25  ;;  %v8014_v22 = vld [vmem:[#allocation2 + $0x1ec] ss:$16 sps:$4 sm:$0xff]  }
  0x9d   :  { %1414 = vmatprep.subr.bf16.mxu0 %v7933_v24  ;;  %v8012_v24 = vld [vmem:[#allocation2 + $0x1e8] ss:$16 sps:$4 sm:$0xff]   ;;  %v8017_v25 = vld [vmem:[#allocation2 + $0x20c] ss:$16 sps:$4 sm:$0xff]  }
  0x9f   :  { %1456 = vmatpush1.bf16.msra.mxu1 %v7934_v27  ;;  %v8015_v27 = vld [vmem:[#allocation2 + $0x208] ss:$16 sps:$4 sm:$0xff]  }
  0xa0   :  { %1415 = vmatpush1.bf16.msra.mxu0 %v7931_v26  ;;  %1457 = vmatprep.subr.bf16.mxu1 %v7942_v29  ;;  %v8964_v26 = vpack.c.bf16 %v8955_v44, %v8955_v44  ;;  %v8018_v29 = vld [vmem:[#allocation2 + $0x228] ss:$16 sps:$4 sm:$0xff]  }
  0xa1   :  { %1416 = vmatprep.subr.bf16.mxu0 %v7939_v28  ;;  %v8020_v28 = vld [vmem:[#allocation2 + $0x22c] ss:$16 sps:$4 sm:$0xff]   ;;  %v8036_v44 = vld [vmem:[#allocation2 + $0x2e8] ss:$16 sps:$4 sm:$0xff]  }
  0xa3   :  { %1458 = vmatpush1.bf16.msra.mxu1 %v7940_v31  ;;  %v8021_v31 = vld [vmem:[#allocation2 + $0x248] ss:$16 sps:$4 sm:$0xff]  }
  0xa4   :  { %1417 = vmatpush1.bf16.msra.mxu0 %v7937_v30  ;;  %1459 = vmatprep.subr.bf16.mxu1 %v7948_v33  ;;  %v8023_v30 = vld [vmem:[#allocation2 + $0x24c] ss:$16 sps:$4 sm:$0xff]   ;;  %v8024_v33 = vld [vmem:[#allocation2 + $0x268] ss:$16 sps:$4 sm:$0xff]  }
  0xa5   :  { %1418 = vmatprep.subr.bf16.mxu0 %v7945_v32  ;;  %v8026_v32 = vld [vmem:[#allocation2 + $0x26c] ss:$16 sps:$4 sm:$0xff]  }
  0xa7   :  { %1460 = vmatpush1.bf16.msra.mxu1 %v7946_v35  ;;  %v8027_v35 = vld [vmem:[#allocation2 + $0x288] ss:$16 sps:$4 sm:$0xff]  }
  0xa8   :  { %1419 = vmatpush1.bf16.msra.mxu0 %v7943_v34  ;;  %1461 = vmatprep.subr.bf16.mxu1 %v7954_v37  ;;  %v8029_v34 = vld [vmem:[#allocation2 + $0x28c] ss:$16 sps:$4 sm:$0xff]   ;;  %v8030_v37 = vld [vmem:[#allocation2 + $0x2a8] ss:$16 sps:$4 sm:$0xff]  }
  0xa9   :  { %1420 = vmatprep.subr.bf16.mxu0 %v7951_v36  ;;  %v8032_v36 = vld [vmem:[#allocation2 + $0x2ac] ss:$16 sps:$4 sm:$0xff]  }
  0xab   :  { %1462 = vmatpush1.bf16.msra.mxu1 %v7952_v40  ;;  %v8111_v40 = vld [vmem:[#allocation5] ss:$8 sps:$4 sm:$0xff]  }
  0xac   :  { %1421 = vmatpush1.bf16.msra.mxu0 %v7949_v39  ;;  %1463 = vmatprep.subr.bf16.mxu1 %v7960_v42  ;;  %v8035_v39 = vld [vmem:[#allocation2 + $0x2cc] ss:$16 sps:$4 sm:$0xff]  }
  0xad   :  { %1422 = vmatprep.subr.bf16.mxu0 %v7957_v41  ;;  %v8113_v41 = vld [vmem:[#allocation5 + $0x4] ss:$8 sps:$4 sm:$0xff]   ;;  %v8116_v42 = vld [vmem:[#allocation5 + $0x14] ss:$8 sps:$4 sm:$0xff]  }
  0xaf   :  { %1464 = vmatpush1.bf16.msra.mxu1 %v7958_v47  ;;  %v8119_v47 = vld [vmem:[#allocation5 + $0x24] ss:$8 sps:$4 sm:$0xff]  }
  0xb0   :  { %1423 = vmatpush1.bf16.msra.mxu0 %v7955_v46  ;;  %1465 = vmatprep.subr.bf16.mxu1 %v7966_v50  ;;  %v8041_v46 = vld [vmem:[#allocation2 + $0x30c] ss:$16 sps:$4 sm:$0xff]   ;;  %v8117_v50 = vld [vmem:[#allocation5 + $0x20] ss:$8 sps:$4 sm:$0xff]  }
  0xb1   :  { %1424 = vmatprep.subr.bf16.mxu0 %v7963_v48  ;;  %v8039_v48 = vld [vmem:[#allocation2 + $0x308] ss:$16 sps:$4 sm:$0xff]  }
  0xb3   :  { %1466 = vmatpush1.bf16.msra.mxu1 %v7964_v53  ;;  %v8122_v53 = vld [vmem:[#allocation5 + $0x34] ss:$8 sps:$4 sm:$0xff]  }
  0xb4   :  { %1425 = vmatpush1.bf16.msra.mxu0 %v7961_v52  ;;  %1467 = vmatprep.subr.bf16.mxu1 %v7972_v55  ;;  %v8044_v52 = vld [vmem:[#allocation2 + $0x32c] ss:$16 sps:$4 sm:$0xff]   ;;  %v8120_v55 = vld [vmem:[#allocation5 + $0x30] ss:$8 sps:$4 sm:$0xff]  }
  0xb5   :  { %1426 = vmatprep.subr.bf16.mxu0 %v7969_v54  ;;  %v8042_v54 = vld [vmem:[#allocation2 + $0x328] ss:$16 sps:$4 sm:$0xff]  }
  0xb7   :  { %1468 = vmatpush1.bf16.msra.mxu1 %v7970_v57  ;;  %v8125_v57 = vld [vmem:[#allocation5 + $0x44] ss:$8 sps:$4 sm:$0xff]  }
  0xb8   :  { %1427 = vmatpush1.bf16.msra.mxu0 %v7967_v56  ;;  %1469 = vmatprep.subr.bf16.mxu1 %v7978_v59  ;;  %v8047_v56 = vld [vmem:[#allocation2 + $0x34c] ss:$16 sps:$4 sm:$0xff]   ;;  %v8123_v59 = vld [vmem:[#allocation5 + $0x40] ss:$8 sps:$4 sm:$0xff]  }
  0xb9   :  { %1428 = vmatprep.subr.bf16.mxu0 %v7975_v58  ;;  %v8045_v58 = vld [vmem:[#allocation2 + $0x348] ss:$16 sps:$4 sm:$0xff]  }
  0xbb   :  { %1470 = vmatpush1.bf16.msra.mxu1 %v7976_v61  ;;  %v8128_v61 = vld [vmem:[#allocation5 + $0x54] ss:$8 sps:$4 sm:$0xff]  }
  0xbc   :  { %1429 = vmatpush1.bf16.msra.mxu0 %v7973_v60  ;;  %1471 = vmatprep.subr.bf16.mxu1 %v7984_v63  ;;  %v8050_v60 = vld [vmem:[#allocation2 + $0x36c] ss:$16 sps:$4 sm:$0xff]   ;;  %v8126_v63 = vld [vmem:[#allocation5 + $0x50] ss:$8 sps:$4 sm:$0xff]  }
  0xbd   :  { %1430 = vmatprep.subr.bf16.mxu0 %v7981_v62  ;;  %v8048_v62 = vld [vmem:[#allocation2 + $0x368] ss:$16 sps:$4 sm:$0xff]  }
  0xbf   :  { %1472 = vmatpush1.bf16.msra.mxu1 %v7982_v1  ;;  %v8131_v1 = vld [vmem:[#allocation5 + $0x64] ss:$8 sps:$4 sm:$0xff]  }
  0xc0   :  { %1431 = vmatpush1.bf16.msra.mxu0 %v7979_v0  ;;  %1473 = vmatprep.subr.bf16.mxu1 %v7990_v4  ;;  %v8053_v0 = vld [vmem:[#allocation2 + $0x38c] ss:$16 sps:$4 sm:$0xff]   ;;  %v8129_v4 = vld [vmem:[#allocation5 + $0x60] ss:$8 sps:$4 sm:$0xff]  }
  0xc1   :  { %1432 = vmatprep.subr.bf16.mxu0 %v7987_v2  ;;  %v8051_v2 = vld [vmem:[#allocation2 + $0x388] ss:$16 sps:$4 sm:$0xff]  }
  0xc3   :  { %1474 = vmatpush1.bf16.msra.mxu1 %v7988_v6  ;;  %v8134_v6 = vld [vmem:[#allocation5 + $0x74] ss:$8 sps:$4 sm:$0xff]  }
  0xc4   :  { %1433 = vmatpush1.bf16.msra.mxu0 %v7985_v5  ;;  %1475 = vmatprep.subr.bf16.mxu1 %v7996_v8  ;;  %v8056_v5 = vld [vmem:[#allocation2 + $0x3ac] ss:$16 sps:$4 sm:$0xff]   ;;  %v8132_v8 = vld [vmem:[#allocation5 + $0x70] ss:$8 sps:$4 sm:$0xff]  }
  0xc5   :  { %1434 = vmatprep.subr.bf16.mxu0 %v7993_v7  ;;  %v8054_v7 = vld [vmem:[#allocation2 + $0x3a8] ss:$16 sps:$4 sm:$0xff]  }
  0xc7   :  { %1476 = vmatpush1.bf16.msra.mxu1 %v7994_v10  ;;  %v8137_v10 = vld [vmem:[#allocation5 + $0x84] ss:$8 sps:$4 sm:$0xff]  }
  0xc8   :  { %1435 = vmatpush1.bf16.msra.mxu0 %v7991_v9  ;;  %1477 = vmatprep.subr.bf16.mxu1 %v8002_v12  ;;  %v8059_v9 = vld [vmem:[#allocation2 + $0x3cc] ss:$16 sps:$4 sm:$0xff]   ;;  %v8135_v12 = vld [vmem:[#allocation5 + $0x80] ss:$8 sps:$4 sm:$0xff]  }
  0xc9   :  { %1436 = vmatprep.subr.bf16.mxu0 %v7999_v11  ;;  %v8057_v11 = vld [vmem:[#allocation2 + $0x3c8] ss:$16 sps:$4 sm:$0xff]  }
  0xcb   :  { %1478 = vmatpush1.bf16.msra.mxu1 %v8000_v14  ;;  %v8140_v14 = vld [vmem:[#allocation5 + $0x94] ss:$8 sps:$4 sm:$0xff]  }
  0xcc   :  { %1437 = vmatpush1.bf16.msra.mxu0 %v7997_v13  ;;  %1479 = vmatprep.subr.bf16.mxu1 %v8008_v17  ;;  %v8062_v13 = vld [vmem:[#allocation2 + $0x3ec] ss:$16 sps:$4 sm:$0xff]   ;;  %v8138_v17 = vld [vmem:[#allocation5 + $0x90] ss:$8 sps:$4 sm:$0xff]  }
  0xcd   :  { %1438 = vmatprep.subr.bf16.mxu0 %v8005_v15  ;;  %v8060_v15 = vld [vmem:[#allocation2 + $0x3e8] ss:$16 sps:$4 sm:$0xff]  }
  0xcf   :  { %1480 = vmatpush1.bf16.msra.mxu1 %v8006_v20  ;;  %v8143_v20 = vld [vmem:[#allocation5 + $0xa4] ss:$8 sps:$4 sm:$0xff]  }
  0xd0   :  { %1439 = vmatpush1.bf16.msra.mxu0 %v8003_v19  ;;  %1481 = vmatprep.subr.bf16.mxu1 %v8014_v22  ;;  %v8065_v19 = vld [vmem:[#allocation2 + $0x40c] ss:$16 sps:$4 sm:$0xff]  }
  0xd1   :  { %1440 = vmatprep.subr.bf16.mxu0 %v8011_v21  ;;  %v8063_v21 = vld [vmem:[#allocation2 + $0x408] ss:$16 sps:$4 sm:$0xff]   ;;  %v8068_v22 = vld [vmem:[#allocation2 + $0x42c] ss:$16 sps:$4 sm:$0xff]  }
  0xd3   :  { %1482 = vmatpush1.bf16.msra.mxu1 %v8012_v24  ;;  %v8146_v24 = vld [vmem:[#allocation5 + $0xb4] ss:$8 sps:$4 sm:$0xff]  }
  0xd4   :  { %1441 = vmatpush1.bf16.msra.mxu0 %v8009_v23  ;;  %1492 = vmatprep.subr.bf16.mxu1 %v8017_v25  ;;  %v8141_v23 = vld [vmem:[#allocation5 + $0xa0] ss:$8 sps:$4 sm:$0xff]  }
  0xd5   :  { %1974 = vmatprep.subr.bf16.mxu0 %v8113_v41  ;;  %v8066_v25 = vld [vmem:[#allocation2 + $0x428] ss:$16 sps:$4 sm:$0xff]  }
  0xd6   :  { %1484 = vmatmul.mubr.bf16.vlgmr.msra.gmra.mrb[4].mxu1 %v8946_v16  ;;  %v8033_v16 = vld [vmem:[#allocation2 + $0x2c8] ss:$16 sps:$4 sm:$0xff]  }
  0xd7   :  { %1443 = vmatmul.mubr.bf16.vlgmr.msra.gmra.mrb[0].mxu0 %v8964_v26  ;;  %1493 = vmatpush1.bf16.msra.mxu1 %v8015_v27  ;;  %v8071_v27 = vld [vmem:[#allocation2 + $0x44c] ss:$16 sps:$4 sm:$0xff]   ;;  %v8153_v41 = vld [vmem:[#allocation5 + $0xe0] ss:$8 sps:$4 sm:$0xff]  }
  0xd8   :  { %1524 = vmatprep.mubr.bf16.mxu1 %v8943_v3  ;;  %1494 = vmatprep.subr.bf16.mxu1 %v8020_v28  ;;  %v8038_v3 = vld [vmem:[#allocation2 + $0x2ec] ss:$16 sps:$4 sm:$0xff]   ;;  %v8144_v28 = vld [vmem:[#allocation5 + $0xb0] ss:$8 sps:$4 sm:$0xff]  }
  0xd9   :  { %1975 = vmatpush1.bf16.msra.mxu0 %v8111_v40  ;;  %v8086_v40 = vld [vmem:[#allocation2 + $0x4ec] ss:$16 sps:$4 sm:$0xff]  }
  0xda   :  { %1976 = vmatprep.subr.bf16.mxu0 %v8116_v42  ;;  %v8084_v42 = vld [vmem:[#allocation2 + $0x4e8] ss:$16 sps:$4 sm:$0xff]  }
  0xdb   :  { %1495 = vmatpush1.bf16.msra.mxu1 %v8018_v29  ;;  %v8149_v29 = vld [vmem:[#allocation5 + $0xc4] ss:$8 sps:$4 sm:$0xff]  }
  0xdc   :  { %1496 = vmatprep.subr.bf16.mxu1 %v8023_v30  ;;  %v8069_v30 = vld [vmem:[#allocation2 + $0x448] ss:$16 sps:$4 sm:$0xff]  }
  0xdd   :  { %1977 = vmatpush1.bf16.msra.mxu0 %v8114_v45  ;;  %v8089_v45 = vld [vmem:[#allocation2 + $0x50c] ss:$16 sps:$4 sm:$0xff]  }
  0xde   :  { %1978 = vmatprep.subr.bf16.mxu0 %v8119_v47  ;;  %v8087_v47 = vld [vmem:[#allocation2 + $0x508] ss:$16 sps:$4 sm:$0xff]  }
  0xdf   :  { %1497 = vmatpush1.bf16.msra.mxu1 %v8021_v31  ;;  %v8074_v31 = vld [vmem:[#allocation2 + $0x46c] ss:$16 sps:$4 sm:$0xff]  }
  0xe0   :  { %1498 = vmatprep.subr.bf16.mxu1 %v8026_v32  ;;  %v8147_v32 = vld [vmem:[#allocation5 + $0xc0] ss:$8 sps:$4 sm:$0xff]  }
  0xe1   :  { %1979 = vmatpush1.bf16.msra.mxu0 %v8117_v50  ;;  %v8092_v50 = vld [vmem:[#allocation2 + $0x52c] ss:$16 sps:$4 sm:$0xff]  }
  0xe2   :  { %1980 = vmatprep.subr.bf16.mxu0 %v8122_v53  ;;  %v8095_v53 = vld [vmem:[#allocation2 + $0x54c] ss:$16 sps:$4 sm:$0xff]  }
  0xe3   :  { %1499 = vmatpush1.bf16.msra.mxu1 %v8024_v33  ;;  %v8152_v33 = vld [vmem:[#allocation5 + $0xd4] ss:$8 sps:$4 sm:$0xff]  }
  0xe4   :  { %1500 = vmatprep.subr.bf16.mxu1 %v8029_v34  ;;  %v8072_v34 = vld [vmem:[#allocation2 + $0x468] ss:$16 sps:$4 sm:$0xff]  }
  0xe5   :  { %1981 = vmatpush1.bf16.msra.mxu0 %v8120_v55  ;;  %v8098_v55 = vld [vmem:[#allocation2 + $0x56c] ss:$16 sps:$4 sm:$0xff]  }
  0xe6   :  { %1982 = vmatprep.subr.bf16.mxu0 %v8125_v57  ;;  %v8101_v57 = vld [vmem:[#allocation2 + $0x58c] ss:$16 sps:$4 sm:$0xff]  }
  0xe7   :  { %1501 = vmatpush1.bf16.msra.mxu1 %v8027_v35  ;;  %v8077_v35 = vld [vmem:[#allocation2 + $0x48c] ss:$16 sps:$4 sm:$0xff]  }
  0xe8   :  { %1502 = vmatprep.subr.bf16.mxu1 %v8032_v36  ;;  %v8075_v36 = vld [vmem:[#allocation2 + $0x488] ss:$16 sps:$4 sm:$0xff]  }
  0xe9   :  { %1983 = vmatpush1.bf16.msra.mxu0 %v8123_v59  ;;  %v8104_v59 = vld [vmem:[#allocation2 + $0x5ac] ss:$16 sps:$4 sm:$0xff]  }
  0xea   :  { %1984 = vmatprep.subr.bf16.mxu0 %v8128_v61  ;;  %v8107_v61 = vld [vmem:[#allocation2 + $0x5cc] ss:$16 sps:$4 sm:$0xff]  }
  0xeb   :  { %1503 = vmatpush1.bf16.msra.mxu1 %v8030_v37  ;;  %v8078_v37 = vld [vmem:[#allocation2 + $0x4a8] ss:$16 sps:$4 sm:$0xff]  }
  0xec   :  { %1504 = vmatprep.subr.bf16.mxu1 %v8035_v39  ;;  %v8083_v39 = vld [vmem:[#allocation2 + $0x4cc] ss:$16 sps:$4 sm:$0xff]  }
  0xed   :  { %1985 = vmatpush1.bf16.msra.mxu0 %v8126_v63  ;;  %v8110_v63 = vld [vmem:[#allocation2 + $0x5ec] ss:$16 sps:$4 sm:$0xff]  }
  0xee   :  { %1986 = vmatprep.subr.bf16.mxu0 %v8131_v1 }
  0xef   :  { %1505 = vmatpush1.bf16.msra.mxu1 %v8033_v16  ;;  %v8081_v16 = vld [vmem:[#allocation2 + $0x4c8] ss:$16 sps:$4 sm:$0xff]  }
  0xf0   :  { %1506 = vmatprep.subr.bf16.mxu1 %v8038_v3  ;;  %v8155_v3 = vld [vmem:[#allocation5 + $0xe4] ss:$8 sps:$4 sm:$0xff]  }
  0xf1   :  { %1987 = vmatpush1.bf16.msra.mxu0 %v8129_v4 }
  0xf2   :  { %1988 = vmatprep.subr.bf16.mxu0 %v8134_v6  ;;  %v8973_v6 = vsub.s32 0, %v8933_v43 }
  0xf3   :  { %1507 = vmatpush1.bf16.msra.mxu1 %v8036_v44  ;;  %v8158_v44 = vld [vmem:[#allocation5 + $0xf4] ss:$8 sps:$4 sm:$0xff]  }
  0xf4   :  { %1508 = vmatprep.subr.bf16.mxu1 %v8041_v46  ;;  %v8156_v46 = vld [vmem:[#allocation5 + $0xf0] ss:$8 sps:$4 sm:$0xff]   ;;  %11046 = vst [vmem:[#allocation20_spill] sm:$0xff] %v8973_v6 }
  0xf5   :  { %1989 = vmatpush1.bf16.msra.mxu0 %v8132_v8  ;;  %v10869_v8 = vsub.s32 1, %v8933_v43 }
  0xf6   :  { %1990 = vmatprep.subr.bf16.mxu0 %v8137_v10 }
  0xf7   :  { %1509 = vmatpush1.bf16.msra.mxu1 %v8039_v48  ;;  %v8161_v48 = vld [vmem:[#allocation5 + $0x104] ss:$8 sps:$4 sm:$0xff]  }
  0xf8   :  { %1510 = vmatprep.subr.bf16.mxu1 %v8044_v52  ;;  %v8090_v52 = vld [vmem:[#allocation2 + $0x528] ss:$16 sps:$4 sm:$0xff]  }
  0xf9   :  { %1991 = vmatpush1.bf16.msra.mxu0 %v8135_v12 }
  0xfa   :  { %1992 = vmatprep.subr.bf16.mxu0 %v8140_v14 }
  0xfb   :  { %1511 = vmatpush1.bf16.msra.mxu1 %v8042_v54  ;;  %v8093_v54 = vld [vmem:[#allocation2 + $0x548] ss:$16 sps:$4 sm:$0xff]  }
  0xfc   :  { %1512 = vmatprep.subr.bf16.mxu1 %v8047_v56  ;;  %v8096_v56 = vld [vmem:[#allocation2 + $0x568] ss:$16 sps:$4 sm:$0xff]  }
  0xfd   :  { %1993 = vmatpush1.bf16.msra.mxu0 %v8138_v17 }
  0xfe   :  { %1994 = vmatprep.subr.bf16.mxu0 %v8143_v20 }
  0xff   :  { %1513 = vmatpush1.bf16.msra.mxu1 %v8045_v58  ;;  %v8099_v58 = vld [vmem:[#allocation2 + $0x588] ss:$16 sps:$4 sm:$0xff]  }
 0x100   :  { %1514 = vmatprep.subr.bf16.mxu1 %v8050_v60  ;;  %v8102_v60 = vld [vmem:[#allocation2 + $0x5a8] ss:$16 sps:$4 sm:$0xff]  }
 0x101   :  { %1995 = vmatpush1.bf16.msra.mxu0 %v8141_v23 }
 0x102   :  { %1996 = vmatprep.subr.bf16.mxu0 %v8146_v24 }
 0x103   :  { %1515 = vmatpush1.bf16.msra.mxu1 %v8048_v62  ;;  %v8105_v62 = vld [vmem:[#allocation2 + $0x5c8] ss:$16 sps:$4 sm:$0xff]  }
 0x104   :  { %1516 = vmatprep.subr.bf16.mxu1 %v8053_v0  ;;  %v8108_v0 = vld [vmem:[#allocation2 + $0x5e8] ss:$16 sps:$4 sm:$0xff]  }
 0x105   :  { %1997 = vmatpush1.bf16.msra.mxu0 %v8144_v28  ;;  %v8164_v28 = vld [vmem:[#allocation5 + $0x114] ss:$8 sps:$4 sm:$0xff]  }
 0x106   :  { %1998 = vmatprep.subr.bf16.mxu0 %v8149_v29  ;;  %v8987_v29 = vadd.s32 128, %v8933_v43 }
 0x107   :  { %1517 = vmatpush1.bf16.msra.mxu1 %v8051_v2 }
 0x108   :  { %1518 = vmatprep.subr.bf16.mxu1 %v8056_v5 }
 0x109   :  { %1999 = vmatpush1.bf16.msra.mxu0 %v8147_v32  ;;  %v8993_v32 = vadd.s32 136, %v8933_v43 }
 0x10a   :  { %2000 = vmatprep.subr.bf16.mxu0 %v8152_v33  ;;  %v8167_v33 = vld [vmem:[#allocation5 + $0x124] ss:$8 sps:$4 sm:$0xff]  }
 0x10b   :  { %1519 = vmatpush1.bf16.msra.mxu1 %v8054_v7  ;;  %v8978_v7 = vld [vmem:[%s10831_s2] sm:$0xf] }
 0x10c   :  { %1520 = vmatprep.subr.bf16.mxu1 %v8059_v9  ;;  %v351_v9 = vrot.slane %v8978_v7, %v8973_v6 }
 0x10f   :  { %1521 = vmatpush1.bf16.msra.mxu1 %v8057_v11 }
 0x110   :  { %1522 = vmatprep.subr.bf16.mxu1 %v8062_v13 }
 0x113   :  { %1523 = vmatpush1.bf16.msra.mxu1 %v8060_v15 }
 0x114   :  { %1533 = vmatprep.subr.bf16.mxu1 %v8065_v19 }
 0x116   :  { %1525 = vmatmul.mubr.bf16.vlgmr.msra.gmra.mrb[4].mxu1 %v8948_v18  ;;  %v8150_v18 = vld [vmem:[#allocation5 + $0xd0] ss:$8 sps:$4 sm:$0xff]  }
 0x117   :  { %1534 = vmatpush1.bf16.msra.mxu1 %v8063_v21  ;;  %1565 = vmatprep.mubr.bf16.mxu1 %v8959_v51  ;;  %v8080_v51 = vld [vmem:[#allocation2 + $0x4ac] ss:$16 sps:$4 sm:$0xff]  }
 0x118   :  { %1535 = vmatprep.subr.bf16.mxu1 %v8068_v22  ;;  %2001 = vmatpush1.bf16.msra.mxu0 %v8150_v18 }
 0x119   :  { %2002 = vmatprep.subr.bf16.mxu0 %v8155_v3 }
 0x11b   :  { %1536 = vmatpush1.bf16.msra.mxu1 %v8066_v25  ;;  %v8159_v25 = vld [vmem:[#allocation5 + $0x100] ss:$8 sps:$4 sm:$0xff]  }
 0x11c   :  { %1537 = vmatprep.subr.bf16.mxu1 %v8071_v27  ;;  %2003 = vmatpush1.bf16.msra.mxu0 %v8153_v41  ;;  %v8173_v41 = vld [vmem:[#allocation5 + $0x144] ss:$8 sps:$4 sm:$0xff]  }
 0x11d   :  { %2004 = vmatprep.subr.bf16.mxu0 %v8158_v44  ;;  %v9044_v44 = vadd.s32 24, %v8933_v43 }
 0x11f   :  { %1538 = vmatpush1.bf16.msra.mxu1 %v8069_v30  ;;  %v8990_v30 = vand.u32 127, %v121_v38  ;;  %v9007_v38 = vadd.s32 8, %v8933_v43 }
 0x120   :  { %1539 = vmatprep.subr.bf16.mxu1 %v8074_v31  ;;  %2005 = vmatpush1.bf16.msra.mxu0 %v8156_v46  ;;  %v8162_v31 = vld [vmem:[#allocation5 + $0x110] ss:$8 sps:$4 sm:$0xff]   ;;  %v9055_v46 = vadd.s32 160, %v8933_v43 }
 0x121   :  { %2015 = vmatprep.subr.bf16.mxu0 %v8161_v48  ;;  %11047 = vst [vmem:[#allocation21_spill] sm:$0xff] %v8990_v30  ;;  %v9065_v48 = vadd.s32 168, %v8933_v43 }
 0x123   :  { %1540 = vmatpush1.bf16.msra.mxu1 %v8072_v34  ;;  %v8996_v34 = vmul.u32 16, %v8990_v30 }
 0x124   :  { %1541 = vmatprep.subr.bf16.mxu1 %v8077_v35  ;;  %v8999_v35 = vadd.s32 1, %v8990_v30 }
 0x125   :  { %vm2139_vm2 = vcmp.ge.s32.totalorder %v8987_v29, %v8996_v34  ;;  %vm2140_vm3 = vcmp.ge.s32.totalorder %v8993_v32, %v8996_v34  ;;  %vm2123_vm7 = vcmp.ge.s32.totalorder %v8933_v43, %v8996_v34  ;;  %vm2124_vm10 = vcmp.ge.s32.totalorder %v9007_v38, %v8996_v34 }
 0x126   :  { %v9004_v18 = vmul.u32 16, %v8999_v35 }
 0x127   :  { %1542 = vmatpush1.bf16.msra.mxu1 %v8075_v36  ;;  %v8165_v36 = vld [vmem:[#allocation5 + $0x120] ss:$8 sps:$4 sm:$0xff]  }
 0x128   :  { %1543 = vmatprep.subr.bf16.mxu1 %v8080_v51  ;;  %v8170_v51 = vld [vmem:[#allocation5 + $0x134] ss:$8 sps:$4 sm:$0xff]   ;;  %vm2173_vm4 = vcmp.lt.s32.totalorder %v8987_v29, %v9004_v18  ;;  %vm2174_vm5 = vcmp.lt.s32.totalorder %v8993_v32, %v9004_v18  ;;  %vm2157_vm8 = vcmp.lt.s32.totalorder %v8933_v43, %v9004_v18  ;;  %vm2158_vm11 = vcmp.lt.s32.totalorder %v9007_v38, %v9004_v18 }
 0x129   :  { %vm2205_vm6 = vmand %vm2139_vm2, %vm2173_vm4 }
 0x12a   :  { %vm2206_vm9 = vmand %vm2140_vm3, %vm2174_vm5 }
 0x12b   :  { %1544 = vmatpush1.bf16.msra.mxu1 %v8078_v37  ;;  %v9016_v37 = vadd.s32 144, %v8933_v43  ;;  %vm9029_vm12 = vmpackc.low %vm2206_vm9, %vm2205_vm6  ;;  %vm2160_vm9 = vcmp.lt.s32.totalorder %v9044_v44, %v9004_v18 }
 0x12c   :  { %1545 = vmatprep.subr.bf16.mxu1 %v8083_v39  ;;  %v9023_v39 = vadd.s32 152, %v8933_v43  ;;  %vm2189_vm13 = vmand %vm2123_vm7, %vm2157_vm8  ;;  %vm2126_vm8 = vcmp.ge.s32.totalorder %v9044_v44, %v8996_v34 }
 0x12d   :  { %vm2141_vm14 = vcmp.ge.s32.totalorder %v9016_v37, %v8996_v34  ;;  %vm2175_vm15 = vcmp.lt.s32.totalorder %v9016_v37, %v9004_v18 }
 0x12e   :  { %vm2176_vm2 = vcmp.lt.s32.totalorder %v9023_v39, %v9004_v18  ;;  %vm2207_vm4 = vmand %vm2141_vm14, %vm2175_vm15  ;;  %vm2177_vm14 = vcmp.lt.s32.totalorder %v9055_v46, %v9004_v18 }
 0x12f   :  { %1546 = vmatpush1.bf16.msra.mxu1 %v8081_v16  ;;  %v8168_v16 = vld [vmem:[#allocation5 + $0x130] ss:$8 sps:$4 sm:$0xff]   ;;  %vm2192_vm15 = vmand %vm2126_vm8, %vm2160_vm9 }
 0x130   :  { %1547 = vmatprep.subr.bf16.mxu1 %v8086_v40  ;;  %v9034_v40 = vadd.s32 16, %v8933_v43 }
 0x132   :  { %vm2125_vm5 = vcmp.ge.s32.totalorder %v9034_v40, %v8996_v34  ;;  %vm2159_vm6 = vcmp.lt.s32.totalorder %v9034_v40, %v9004_v18 }
 0x133   :  { %1548 = vmatpush1.bf16.msra.mxu1 %v8084_v42  ;;  %v10871_v42 = vmov 1.0|1.0  }
 0x134   :  { %1549 = vmatprep.subr.bf16.mxu1 %v8089_v45 }
 0x137   :  { %1550 = vmatpush1.bf16.msra.mxu1 %v8087_v47  ;;  %v8171_v47 = vld [vmem:[#allocation5 + $0x140] ss:$8 sps:$4 sm:$0xff]  }
 0x138   :  { %1551 = vmatprep.subr.bf16.mxu1 %v8092_v50  ;;  %v8176_v50 = vld [vmem:[#allocation5 + $0x154] ss:$8 sps:$4 sm:$0xff]  }
 0x13b   :  { %1552 = vmatpush1.bf16.msra.mxu1 %v8090_v52 }
 0x13c   :  { %1553 = vmatprep.subr.bf16.mxu1 %v8095_v53  ;;  %v9076_v53 = vadd.s32 32, %v8933_v43 }
 0x13f   :  { %1554 = vmatpush1.bf16.msra.mxu1 %v8093_v54  ;;  %v9086_v54 = vadd.s32 40, %v8933_v43 }
 0x140   :  { %1555 = vmatprep.subr.bf16.mxu1 %v8098_v55  ;;  %v8174_v55 = vld [vmem:[#allocation5 + $0x150] ss:$8 sps:$4 sm:$0xff]  }
 0x141   :  { %vm2128_vm8 = vcmp.ge.s32.totalorder %v9086_v54, %v8996_v34  ;;  %vm2162_vm9 = vcmp.lt.s32.totalorder %v9086_v54, %v9004_v18 }
 0x143   :  { %1556 = vmatpush1.bf16.msra.mxu1 %v8096_v56  ;;  %v8179_v56 = vld [vmem:[#allocation5 + $0x164] ss:$8 sps:$4 sm:$0xff]  }
 0x144   :  { %1557 = vmatprep.subr.bf16.mxu1 %v8101_v57  ;;  %v11054_v57 = vmov 0 }
 0x147   :  { %1558 = vmatpush1.bf16.msra.mxu1 %v8099_v58  ;;  %v9097_v58 = vadd.s32 176, %v8933_v43 }
 0x148   :  { %1559 = vmatprep.subr.bf16.mxu1 %v8104_v59  ;;  %v9107_v59 = vadd.s32 184, %v8933_v43 }
 0x14b   :  { %1560 = vmatpush1.bf16.msra.mxu1 %v8102_v60  ;;  %v8177_v60 = vld [vmem:[#allocation5 + $0x160] ss:$8 sps:$4 sm:$0xff]  }
 0x14c   :  { %1561 = vmatprep.subr.bf16.mxu1 %v8107_v61  ;;  %v11056_v61 = vmov 0 }
 0x14f   :  { %1562 = vmatpush1.bf16.msra.mxu1 %v8105_v62  ;;  %v9118_v62 = vadd.s32 48, %v8933_v43 }
 0x150   :  { %1563 = vmatprep.subr.bf16.mxu1 %v8110_v63  ;;  %v8182_v63 = vld [vmem:[#allocation5 + $0x174] ss:$8 sps:$4 sm:$0xff]  }
 0x153   :  { %1564 = vmatpush1.bf16.msra.mxu1 %v8108_v0  ;;  %v9128_v0 = vadd.s32 56, %v8933_v43 }
 0x154   :  { %7494 = vmatprep.subr.msk.bf16.mxu1 %vm9029_vm12, %v10871_v42 }
 0x156   :  { %1566 = vmatmul.mubr.bf16.vlgmr.msra.gmra.mrb[4].mxu1 %v8964_v26  ;;  %v355_v26 = vrot.slane %v8978_v7, %v10869_v8 }
 0x169   :  { %v1362_v1 = vpop.f32.mrb[0].mxu1 }
 0x16a   :  { %v1364_v2 = vpop.f32.mrb[1].mxu1  ;;  %v1363_v10 = vadd.f32 %v1362_v1, %v351_v9  ;;  %v11058_v1 = vmov 0  ;;  %v8185_v9 = vld [vmem:[#allocation5 + $0x184] ss:$8 sps:$4 sm:$0xff]  }
 0x16b   :  { %v1366_v4 = vpop.f32.mrb[2].mxu1  ;;  %v1365_v11 = vadd.f32 %v1364_v2, %v355_v26  ;;  %v9139_v2 = vadd.s32 192, %v8933_v43  ;;  %v11060_v26 = vmov 0 }
 0x16c   :  { %v1367_v5 = vpop.f32.mrb[3].mxu1  ;;  %v8180_v4 = vld [vmem:[#allocation5 + $0x170] ss:$8 sps:$4 sm:$0xff]  }
 0x16d   :  { %v9149_v5 = vadd.s32 200, %v8933_v43 }
 0x1aa   :  { %v1444_v12 = vpop.f32.mrb[0].mxu0 }
 0x1ab   :  { %v7766_v13 = vadd.f32 %v1444_v12, %v1363_v10  ;;  %v1446_v14 = vpop.f32.mrb[1].mxu0  ;;  %v8183_v10 = vld [vmem:[#allocation5 + $0x180] ss:$8 sps:$4 sm:$0xff]   ;;  %v11062_v12 = vmov 0 }
 0x1ac   :  { %v7768_v15 = vadd.f32 %v1446_v14, %v1365_v11  ;;  %v1448_v17 = vpop.f32.mrb[2].mxu0  ;;  %v8188_v11 = vld [vmem:[#allocation5 + $0x194] ss:$8 sps:$4 sm:$0xff]   ;;  %v11064_v14 = vmov 0 }
 0x1ad   :  { %vm1574_vm0 = vcmp.gt.f32.partialorder %v7766_v13, 0.0  ;;  %v1578_v19 = vmul.f32 0.2, %v7766_v13  ;;  %v1449_v20 = vpop.f32.mrb[3].mxu0  ;;  %v8189_v17 = vld [vmem:[#allocation5 + $0x1a0] ss:$8 sps:$4 sm:$0xff]  }
 0x1ae   :  { %vm1575_vm1 = vcmp.gt.f32.partialorder %v7768_v15, 0.0  ;;  %v1579_v21 = vmul.f32 0.2, %v7768_v15  ;;  %v8192_v20 = vld [vmem:[#allocation5 + $0x1b0] ss:$8 sps:$4 sm:$0xff]  }
 0x1af   :  { %v1582_v22 = vsel %vm1574_vm0, %v7766_v13, %v1578_v19  ;;  %vm2190_vm0 = vmand %vm2124_vm10, %vm2158_vm11  ;;  %v8186_v13 = vld [vmem:[#allocation5 + $0x190] ss:$8 sps:$4 sm:$0xff]   ;;  %v8194_v19 = vld [vmem:[#allocation5 + $0x1b4] ss:$8 sps:$4 sm:$0xff]  }
 0x1b0   :  { %v1583_v23 = vsel %vm1575_vm1, %v7768_v15, %v1579_v21  ;;  %v1586_v27 = vpack.c.bf16 %v1582_v22, %v1582_v22  ;;  %vm2142_vm1 = vcmp.ge.s32.totalorder %v9023_v39, %v8996_v34  ;;  %vm9050_vm3 = vmpackc.low %vm2190_vm0, %vm2189_vm13  ;;  %vm2143_vm13 = vcmp.ge.s32.totalorder %v9055_v46, %v8996_v34  ;;  %v8191_v15 = vld [vmem:[#allocation5 + $0x1a4] ss:$8 sps:$4 sm:$0xff]   ;;  %v8195_v22 = vld [vmem:[#allocation5 + $0x1c0] ss:$8 sps:$4 sm:$0xff]  }
 0x1b1   :  { %v1587_v24 = vpack.c.bf16 %v1583_v23, %v1583_v23  ;;  %7496 = vmatpush3.bf16.msk.msra.mxu1 %vm9050_vm3, %v10871_v42  ;;  %vm2208_vm7 = vmand %vm2142_vm1, %vm2176_vm2  ;;  %vm2144_vm0 = vcmp.ge.s32.totalorder %v9065_v48, %v8996_v34  ;;  %vm2178_vm1 = vcmp.lt.s32.totalorder %v9065_v48, %v9004_v18  ;;  %v8197_v21 = vld [vmem:[#allocation5 + $0x1c4] ss:$8 sps:$4 sm:$0xff]   ;;  %v8200_v23 = vld [vmem:[#allocation5 + $0x1d4] ss:$8 sps:$4 sm:$0xff]  }
 0x1b2   :  { %vm9071_vm10 = vmpackc.low %vm2208_vm7, %vm2207_vm4 }
 0x1b3   :  { %2006 = vmatprep.mubr.bf16.mxu0 %v1587_v24  ;;  %7498 = vmatprep.subr.msk.bf16.mxu1 %vm9071_vm10, %v10871_v42  ;;  %vm2191_vm11 = vmand %vm2125_vm5, %vm2159_vm6  ;;  %vm2127_vm5 = vcmp.ge.s32.totalorder %v9076_v53, %v8996_v34  ;;  %vm2161_vm6 = vcmp.lt.s32.totalorder %v9076_v53, %v9004_v18  ;;  %v8198_v24 = vld [vmem:[#allocation5 + $0x1d0] ss:$8 sps:$4 sm:$0xff]  }
 0x1b4   :  { %2007 = vmatmul.mubr.bf16.vlgmr.msra.gmra.mrb[4].mxu0 %v1586_v27  ;;  %vm9092_vm2 = vmpackc.low %vm2192_vm15, %vm2191_vm11  ;;  %vm2179_vm15 = vcmp.lt.s32.totalorder %v9097_v58, %v9004_v18  ;;  %v8201_v27 = vld [vmem:[#allocation5 + $0x1e0] ss:$8 sps:$4 sm:$0xff]  }
 0x1b5   :  { %2016 = vmatpush1.bf16.msra.mxu0 %v8159_v25  ;;  %v11055_v57 = vsel %vm9092_vm2, 4294967295, %v11054_v57  ;;  %7500 = vmatpush3.bf16.msk.msra.mxu1 %vm9092_vm2, %v10871_v42  ;;  %vm2209_vm4 = vmand %vm2143_vm13, %vm2177_vm14  ;;  %vm2145_vm14 = vcmp.ge.s32.totalorder %v9097_v58, %v8996_v34  ;;  %v8203_v25 = vld [vmem:[#allocation5 + $0x1e4] ss:$8 sps:$4 sm:$0xff]  }
 0x1b6   :  { %2017 = vmatprep.subr.bf16.mxu0 %v8164_v28  ;;  %vm2210_vm7 = vmand %vm2144_vm0, %vm2178_vm1  ;;  %vm2146_vm1 = vcmp.ge.s32.totalorder %v9107_v59, %v8996_v34  ;;  %v8206_v28 = vld [vmem:[#allocation5 + $0x1f4] ss:$8 sps:$4 sm:$0xff]  }
 0x1b7   :  { %vm9113_vm11 = vmpackc.low %vm2210_vm7, %vm2209_vm4  ;;  %vm2180_vm4 = vcmp.lt.s32.totalorder %v9107_v59, %v9004_v18 }
 0x1b8   :  { %v11057_v61 = vsel %vm9113_vm11, 4294967295, %v11056_v61  ;;  %7502 = vmatprep.subr.msk.bf16.mxu1 %vm9113_vm11, %v10871_v42  ;;  %vm2193_vm13 = vmand %vm2127_vm5, %vm2161_vm6  ;;  %vm2129_vm6 = vcmp.ge.s32.totalorder %v9118_v62, %v8996_v34 }
 0x1b9   :  { %2018 = vmatpush1.bf16.msra.mxu0 %v8162_v31  ;;  %vm2194_vm0 = vmand %vm2128_vm8, %vm2162_vm9  ;;  %vm2163_vm8 = vcmp.lt.s32.totalorder %v9118_v62, %v9004_v18  ;;  %v8204_v31 = vld [vmem:[#allocation5 + $0x1f0] ss:$8 sps:$4 sm:$0xff]  }
 0x1ba   :  { %2019 = vmatprep.subr.bf16.mxu0 %v8167_v33  ;;  %vm9134_vm7 = vmpackc.low %vm2194_vm0, %vm2193_vm13  ;;  %vm2130_vm13 = vcmp.ge.s32.totalorder %v9128_v0, %v8996_v34  ;;  %vm2164_vm0 = vcmp.lt.s32.totalorder %v9128_v0, %v9004_v18  ;;  %v10870_v33 = vsub.s32 2, %v8933_v43 }
 0x1bb   :  { %v11059_v1 = vsel %vm9134_vm7, 4294967295, %v11058_v1  ;;  %7504 = vmatpush3.bf16.msk.msra.mxu1 %vm9134_vm7, %v10871_v42  ;;  %vm2211_vm5 = vmand %vm2145_vm14, %vm2179_vm15  ;;  %vm2147_vm15 = vcmp.ge.s32.totalorder %v9139_v2, %v8996_v34 }
 0x1bc   :  { %vm2212_vm9 = vmand %vm2146_vm1, %vm2180_vm4  ;;  %vm2181_vm1 = vcmp.lt.s32.totalorder %v9139_v2, %v9004_v18 }
 0x1bd   :  { %2020 = vmatpush1.bf16.msra.mxu0 %v8165_v36  ;;  %vm9155_vm7 = vmpackc.low %vm2212_vm9, %vm2211_vm5  ;;  %vm2148_vm5 = vcmp.ge.s32.totalorder %v9149_v5, %v8996_v34  ;;  %vm2182_vm9 = vcmp.lt.s32.totalorder %v9149_v5, %v9004_v18  ;;  %v10868_v36 = vsub.s32 3, %v8933_v43 }
 0x1be   :  { %2021 = vmatprep.subr.bf16.mxu0 %v8170_v51  ;;  %v11061_v26 = vsel %vm9155_vm7, 4294967295, %v11060_v26  ;;  %7506 = vmatprep.subr.msk.bf16.mxu1 %vm9155_vm7, %v10871_v42  ;;  %vm2195_vm14 = vmand %vm2129_vm6, %vm2163_vm8  ;;  %v359_v51 = vrot.slane %v8978_v7, %v10870_v33 }
 0x1bf   :  { %vm2196_vm4 = vmand %vm2130_vm13, %vm2164_vm0 }
 0x1c0   :  { %vm9170_vm11 = vmpackc.low %vm2196_vm4, %vm2195_vm14 }
 0x1c1   :  { %2022 = vmatpush1.bf16.msra.mxu0 %v8168_v16  ;;  %v11063_v12 = vsel %vm9170_vm11, 4294967295, %v11062_v12  ;;  %7508 = vmatpush3.bf16.msk.msra.mxu1 %vm9170_vm11, %v10871_v42  ;;  %vm2213_vm6 = vmand %vm2147_vm15, %vm2181_vm1  ;;  %v363_v16 = vrot.slane %v8978_v7, %v10868_v36  ;;  %vm11066_vm15 = vnez %v11057_v61  ;;  %vm11067_vm1 = vnez %v11059_v1 }
 0x1c2   :  { %2023 = vmatprep.subr.bf16.mxu0 %v8173_v41  ;;  %vm2214_vm8 = vmand %vm2148_vm5, %vm2182_vm9  ;;  %v9220_v7 = vadd.s32 64, %v8933_v43 }
 0x1c3   :  { %vm9177_vm13 = vmpackc.low %vm2214_vm8, %vm2213_vm6 }
 0x1c4   :  { %v11065_v14 = vsel %vm9177_vm13, 4294967295, %v11064_v14  ;;  %7510 = vmatprep.subr.msk.bf16.mxu1 %vm9177_vm13, %v10871_v42  ;;  %vm2131_vm4 = vcmp.ge.s32.totalorder %v9220_v7, %v8996_v34  ;;  %vm2165_vm9 = vcmp.lt.s32.totalorder %v9220_v7, %v9004_v18 }
 0x1c5   :  { %2024 = vmatpush1.bf16.msra.mxu0 %v8171_v47  ;;  %vm2197_vm8 = vmand %vm2131_vm4, %vm2165_vm9 }
 0x1c6   :  { %2025 = vmatprep.subr.bf16.mxu0 %v8176_v50 }
 0x1c9   :  { %2026 = vmatpush1.bf16.msra.mxu0 %v8174_v55 }
 0x1ca   :  { %2027 = vmatprep.subr.bf16.mxu0 %v8179_v56 }
 0x1cd   :  { %2028 = vmatpush1.bf16.msra.mxu0 %v8177_v60 }
 0x1ce   :  { %2029 = vmatprep.subr.bf16.mxu0 %v8182_v63 }
 0x1d1   :  { %2030 = vmatpush1.bf16.msra.mxu0 %v8180_v4 }
 0x1d2   :  { %2031 = vmatprep.subr.bf16.mxu0 %v8185_v9 }
 0x1d5   :  { %2032 = vmatpush1.bf16.msra.mxu0 %v8183_v10 }
 0x1d6   :  { %2033 = vmatprep.subr.bf16.mxu0 %v8188_v11 }
 0x1d9   :  { %2034 = vmatpush1.bf16.msra.mxu0 %v8186_v13 }
 0x1da   :  { %2035 = vmatprep.subr.bf16.mxu0 %v8191_v15  ;;  %v9223_v15 = vadd.s32 72, %v8933_v43 }
 0x1dc   :  { %vm2132_vm5 = vcmp.ge.s32.totalorder %v9223_v15, %v8996_v34  ;;  %vm2166_vm6 = vcmp.lt.s32.totalorder %v9223_v15, %v9004_v18 }
 0x1dd   :  { %2036 = vmatpush1.bf16.msra.mxu0 %v8189_v17  ;;  %v9234_v17 = vadd.s32 208, %v8933_v43 }
 0x1de   :  { %2037 = vmatprep.subr.bf16.mxu0 %v8194_v19  ;;  %v9237_v19 = vadd.s32 216, %v8933_v43 }
 0x1df   :  { %11068 = vst [vmem:[#allocation22_spill] sm:$0xff] %v9234_v17  ;;  %vm2149_vm4 = vcmp.ge.s32.totalorder %v9234_v17, %v8996_v34 }
 0x1e0   :  { %11069 = vst [vmem:[#allocation23_spill] sm:$0xff] %v9237_v19  ;;  %vm2150_vm9 = vcmp.ge.s32.totalorder %v9237_v19, %v8996_v34 }
 0x1e1   :  { %2038 = vmatpush1.bf16.msra.mxu0 %v8192_v20  ;;  %v9240_v20 = vadd.s32 80, %v8933_v43 }
 0x1e2   :  { %2039 = vmatprep.subr.bf16.mxu0 %v8197_v21  ;;  %v9243_v21 = vadd.s32 88, %v8933_v43 }
 0x1e3   :  { %11070 = vst [vmem:[#allocation24_spill] sm:$0xff] %v9240_v20 }
 0x1e4   :  { %11071 = vst [vmem:[#allocation25_spill] sm:$0xff] %v9243_v21 }
 0x1e5   :  { %2040 = vmatpush1.bf16.msra.mxu0 %v8195_v22  ;;  %v11072_v22 = vmov 0 }
 0x1e6   :  { %2041 = vmatprep.subr.bf16.mxu0 %v8200_v23  ;;  %v9269_v23 = vadd.s32 224, %v8933_v43 }
 0x1e8   :  { %11074 = vst [vmem:[#allocation26_spill] sm:$0xff] %v9269_v23 }
 0x1e9   :  { %2042 = vmatpush1.bf16.msra.mxu0 %v8198_v24  ;;  %v9272_v24 = vadd.s32 232, %v8933_v43 }
 0x1ea   :  { %2043 = vmatprep.subr.bf16.mxu0 %v8203_v25  ;;  %v11076_v25 = vmov 0 }
 0x1eb   :  { %11075 = vst [vmem:[#allocation27_spill] sm:$0xff] %v9272_v24 }
 0x1ed   :  { %2044 = vmatpush1.bf16.msra.mxu0 %v8201_v27  ;;  %v9282_v27 = vadd.s32 96, %v8933_v43 }
 0x1ee   :  { %2045 = vmatprep.subr.bf16.mxu0 %v8206_v28  ;;  %v9292_v28 = vadd.s32 104, %v8933_v43 }
 0x1ef   :  { %11078 = vst [vmem:[#allocation28_spill] sm:$0xff] %v9282_v27 }
 0x1f0   :  { %11079 = vst [vmem:[#allocation29_spill] sm:$0xff] %v9292_v28 }
 0x1f1   :  { %2046 = vmatpush1.bf16.msra.mxu0 %v8204_v31  ;;  %v11080_v31 = vmov 0 }
 0x1f2   :  { %7598 = vmatprep.subr.msk.bf16.mxu0 %vm9029_vm12, %v10871_v42 }
 0x229   :  { %v1567_v41 = vpop.f32.mrb[4].mxu1 }
 0x22a   :  { %v7769_v47 = vadd.f32 %v1567_v41, %v359_v51  ;;  %v1569_v50 = vpop.f32.mrb[5].mxu1  ;;  %v9306_v51 = vadd.s32 240, %v8933_v43  ;;  %v11084_v41 = vmov 0 }
 0x22b   :  { %v7770_v55 = vadd.f32 %v1569_v50, %v363_v16  ;;  %v1571_v56 = vpop.f32.mrb[6].mxu1  ;;  %v9316_v16 = vadd.s32 248, %v8933_v43  ;;  %v9340_v50 = vadd.s32 120, %v8933_v43 }
 0x22c   :  { %vm1576_vm0 = vcmp.gt.f32.partialorder %v7769_v47, 0.0  ;;  %v1580_v60 = vmul.f32 0.2, %v7769_v47  ;;  %v1572_v63 = vpop.f32.mrb[7].mxu1  ;;  %11082 = vst [vmem:[#allocation30_spill] sm:$0xff] %v9306_v51  ;;  %v11090_v56 = vmov 0 }
 0x22d   :  { %vm1577_vm14 = vcmp.gt.f32.partialorder %v7770_v55, 0.0  ;;  %v1581_v4 = vmul.f32 0.2, %v7770_v55  ;;  %11083 = vst [vmem:[#allocation31_spill] sm:$0xff] %v9316_v16  ;;  %11087 = vst [vmem:[#allocation33_spill] sm:$0xff] %v9340_v50 }
 0x22e   :  { %v1584_v9 = vsel %vm1576_vm0, %v7769_v47, %v1580_v60  ;;  %vm2198_vm0 = vmand %vm2132_vm5, %vm2166_vm6  ;;  %vm2184_vm5 = vcmp.lt.s32.totalorder %v9237_v19, %v9004_v18  ;;  %v9330_v47 = vadd.s32 112, %v8933_v43  ;;  %v11092_v60 = vmov 0 }
 0x22f   :  { %v1585_v10 = vsel %vm1577_vm14, %v7770_v55, %v1581_v4  ;;  %v1588_v13 = vpack.c.bf16 %v1584_v9, %v1584_v9  ;;  %vm9245_vm14 = vmpackc.low %vm2198_vm0, %vm2197_vm8  ;;  %vm2133_vm8 = vcmp.ge.s32.totalorder %v9240_v20, %v8996_v34  ;;  %vm2167_vm0 = vcmp.lt.s32.totalorder %v9240_v20, %v9004_v18 }
 0x230   :  { %v1589_v11 = vpack.c.bf16 %v1585_v10, %v1585_v10  ;;  %v11073_v22 = vsel %vm9245_vm14, 4294967295, %v11072_v22  ;;  %7512 = vmatpush3.bf16.msk.msra.mxu1 %vm9245_vm14, %v10871_v42  ;;  %11086 = vst [vmem:[#allocation32_spill] sm:$0xff] %v9330_v47  ;;  %v11088_v55 = vmov 0 }
 0x232   :  { %2047 = vmatprep.mubr.bf16.mxu0 %v1589_v11 }
 0x233   :  { %2048 = vmatmul.mubr.bf16.vlgmr.msra.gmra.mrb[4].mxu0 %v1588_v13 }
 0x234   :  { %7600 = vmatpush3.bf16.msk.msra.mxu0 %vm9050_vm3, %v10871_v42 }
 0x235   :  { %7602 = vmatprep.subr.msk.bf16.mxu0 %vm9071_vm10, %v10871_v42 }
 0x238   :  { %7604 = vmatpush3.bf16.msk.msra.mxu0 %vm9092_vm2, %v10871_v42 }
 0x239   :  { %7606 = vmatprep.subr.msk.bf16.mxu0 %vm11066_vm15, %v10871_v42  ;;  %vm2137_vm15 = vcmp.ge.s32.totalorder %v9330_v47, %v8996_v34 }
 0x23c   :  { %7608 = vmatpush3.bf16.msk.msra.mxu0 %vm11067_vm1, %v10871_v42  ;;  %vm2168_vm1 = vcmp.lt.s32.totalorder %v9243_v21, %v9004_v18 }
 0x23d   :  { %7610 = vmatprep.subr.msk.bf16.mxu0 %vm9155_vm7, %v10871_v42  ;;  %vm2134_vm7 = vcmp.ge.s32.totalorder %v9243_v21, %v8996_v34 }
 0x240   :  { %7612 = vmatpush3.bf16.msk.msra.mxu0 %vm9170_vm11, %v10871_v42  ;;  %vm2216_vm11 = vmand %vm2150_vm9, %vm2184_vm5  ;;  %vm2151_vm9 = vcmp.ge.s32.totalorder %v9269_v23, %v8996_v34  ;;  %vm2185_vm5 = vcmp.lt.s32.totalorder %v9269_v23, %v9004_v18 }
 0x241   :  { %7614 = vmatprep.subr.msk.bf16.mxu0 %vm9177_vm13, %v10871_v42  ;;  %vm2183_vm13 = vcmp.lt.s32.totalorder %v9234_v17, %v9004_v18 }
 0x242   :  { %vm2215_vm6 = vmand %vm2149_vm4, %vm2183_vm13 }
 0x243   :  { %vm9277_vm13 = vmpackc.low %vm2216_vm11, %vm2215_vm6  ;;  %vm2152_vm6 = vcmp.ge.s32.totalorder %v9272_v24, %v8996_v34 }
 0x244   :  { %7616 = vmatpush3.bf16.msk.msra.mxu0 %vm9245_vm14, %v10871_v42  ;;  %v11077_v25 = vsel %vm9277_vm13, 4294967295, %v11076_v25  ;;  %7514 = vmatprep.subr.msk.bf16.mxu1 %vm9277_vm13, %v10871_v42  ;;  %vm2199_vm4 = vmand %vm2133_vm8, %vm2167_vm0  ;;  %vm2186_vm14 = vcmp.lt.s32.totalorder %v9272_v24, %v9004_v18  ;;  %vm2169_vm0 = vcmp.lt.s32.totalorder %v9282_v27, %v9004_v18 }
 0x245   :  { %vm2200_vm11 = vmand %vm2134_vm7, %vm2168_vm1  ;;  %7618 = vmatprep.subr.msk.bf16.mxu0 %vm9277_vm13, %v10871_v42  ;;  %vm2135_vm1 = vcmp.ge.s32.totalorder %v9282_v27, %v8996_v34 }
 0x246   :  { %vm9301_vm8 = vmpackc.low %vm2200_vm11, %vm2199_vm4  ;;  %vm2136_vm11 = vcmp.ge.s32.totalorder %v9292_v28, %v8996_v34 }
 0x247   :  { %v11081_v31 = vsel %vm9301_vm8, 4294967295, %v11080_v31  ;;  %7516 = vmatpush3.bf16.msk.msra.mxu1 %vm9301_vm8, %v10871_v42  ;;  %vm2217_vm7 = vmand %vm2151_vm9, %vm2185_vm5  ;;  %vm2170_vm9 = vcmp.lt.s32.totalorder %v9292_v28, %v9004_v18 }
 0x248   :  { %7620 = vmatpush3.bf16.msk.msra.mxu0 %vm9301_vm8, %v10871_v42  ;;  %vm2218_vm4 = vmand %vm2152_vm6, %vm2186_vm14  ;;  %vm2153_vm14 = vcmp.ge.s32.totalorder %v9306_v51, %v8996_v34  ;;  %vm2187_vm6 = vcmp.lt.s32.totalorder %v9306_v51, %v9004_v18 }
 0x249   :  { %vm9325_vm5 = vmpackc.low %vm2218_vm4, %vm2217_vm7  ;;  %vm2154_vm4 = vcmp.ge.s32.totalorder %v9316_v16, %v8996_v34 }
 0x24a   :  { %v11085_v41 = vsel %vm9325_vm5, 4294967295, %v11084_v41  ;;  %7518 = vmatprep.subr.msk.bf16.mxu1 %vm9325_vm5, %v10871_v42  ;;  %vm2201_vm13 = vmand %vm2135_vm1, %vm2169_vm0  ;;  %7622 = vmatprep.subr.msk.bf16.mxu0 %vm9325_vm5, %v10871_v42  ;;  %vm2188_vm1 = vcmp.lt.s32.totalorder %v9316_v16, %v9004_v18 }
 0x24b   :  { %vm2202_vm7 = vmand %vm2136_vm11, %vm2170_vm9  ;;  %vm2171_vm11 = vcmp.lt.s32.totalorder %v9330_v47, %v9004_v18 }
 0x24c   :  { %vm9349_vm0 = vmpackc.low %vm2202_vm7, %vm2201_vm13  ;;  %vm2138_vm13 = vcmp.ge.s32.totalorder %v9340_v50, %v8996_v34  ;;  %vm2172_vm7 = vcmp.lt.s32.totalorder %v9340_v50, %v9004_v18 }
 0x24d   :  { %v11089_v55 = vsel %vm9349_vm0, 4294967295, %v11088_v55  ;;  %7520 = vmatpush3.bf16.msk.msra.mxu1 %vm9349_vm0, %v10871_v42  ;;  %vm2219_vm8 = vmand %vm2153_vm14, %vm2187_vm6  ;;  %7624 = vmatpush3.bf16.msk.msra.mxu0 %vm9349_vm0, %v10871_v42 }
 0x24e   :  { %vm2220_vm9 = vmand %vm2154_vm4, %vm2188_vm1  ;;  %vm11096_vm1 = vnez %v11059_v1 }
 0x24f   :  { %vm9367_vm5 = vmpackc.low %vm2220_vm9, %vm2219_vm8  ;;  %vm11095_vm8 = vnez %v11057_v61  ;;  %vm11098_vm9 = vnez %v11063_v12 }
 0x250   :  { %v11091_v56 = vsel %vm9367_vm5, 4294967295, %v11090_v56  ;;  %7522 = vmatprep.subr.msk.bf16.mxu1 %vm9367_vm5, %v10871_v42  ;;  %vm2203_vm14 = vmand %vm2137_vm15, %vm2171_vm11  ;;  %7626 = vmatprep.subr.msk.bf16.mxu0 %vm9367_vm5, %v10871_v42  ;;  %vm10899_vm15 = vcmask 1041408   ;;  %vm11097_vm11 = vnez %v11061_v26 }
 0x251   :  { %vm2204_vm6 = vmand %vm2138_vm13, %vm2172_vm7  ;;  %vm11099_vm13 = vnez %v11065_v14  ;;  %vm11100_vm7 = vnez %v11073_v22 }
 0x252   :  { %vm9377_vm4 = vmpackc.low %vm2204_vm6, %vm2203_vm14  ;;  %vm11101_vm14 = vnez %v11077_v25  ;;  %vm11102_vm6 = vnez %v11081_v31 }
 0x253   :  { %v11093_v60 = vsel %vm9377_vm4, 4294967295, %v11092_v60  ;;  %7524 = vmatpush3.bf16.msk.msra.mxu1 %vm9377_vm4, %v10871_v42  ;;  %7628 = vmatpush3.bf16.msk.msra.mxu0 %vm9377_vm4, %v10871_v42 }
 0x254   :  { %7526 = vmatprep.subr.msk.bf16.mxu1 %vm9029_vm12, %v10871_v42 }
 0x306   :  { %v9390_v34 = vpop.f32.mrb[4].mxu0 }
 0x307   :  { %v2057_v18 = vsel %vm10899_vm15, %v9390_v34, 0.0  ;;  %v9394_v63 = vpop.f32.mrb[5].mxu0 }
 0x308   :  { %v2058_v4 = vrot.slane %v2057_v18, 4  ;;  %v2064_v9 = vsel %vm10899_vm15, %v9394_v63, 0.0  ;;  %v2072_v10 = vmul.f32 %v9394_v63, %v9394_v63  ;;  %v2053_v11 = vpop.f32.mrb[6].mxu0 }
 0x309   :  { %v2065_v13 = vrot.slane %v2064_v9, 4  ;;  %v2054_v36 = vpop.f32.mrb[7].mxu0 }
 0x30a   :  { %v2059_v8 = vadd.f32 %v2058_v4, %v2057_v18  ;;  %v2080_v33 = vsel %vm10899_vm15, %v2072_v10, 0.0  ;;  %v11094_v36 = vmov 1.0|1.0   ;;  %v8261_v4 = vld [vmem:[#allocation7 + $0xac] ss:$16 sps:$4 sm:$0xff]  }
 0x30b   :  { %v2066_v42 = vadd.f32 %v2065_v13, %v2064_v9  ;;  %v2081_v49 = vrot.slane %v2080_v33, 4  ;;  %v8252_v9 = vld [vmem:[#allocation7 + $0x84] ss:$16 sps:$4 sm:$0xff]  }
 0x30c   :  { %v2060_v50 = vrot.slane %v2059_v8, 2 }
 0x30d   :  { %v2067_v47 = vrot.slane %v2066_v42, 2  ;;  %v2082_v16 = vadd.f32 %v2081_v49, %v2080_v33  ;;  %v2071_v49 = vmul.f32 %v9390_v34, %v9390_v34 }
 0x30e   :  { %v2061_v51 = vadd.f32 %v2060_v50, %v2059_v8  ;;  %v10973_v50 = vmov 0.0  }
 0x30f   :  { %v2068_v28 = vadd.f32 %v2067_v47, %v2066_v42  ;;  %v2083_v27 = vrot.slane %v2082_v16, 2  ;;  %v2073_v8 = vsel %vm10899_vm15, %v2071_v49, 0.0  ;;  %vm11103_vm15 = vnez %v11085_v41 }
 0x310   :  { %v2062_v24 = vrot.slane %v2061_v51, 1  ;;  %v2074_v42 = vrot.slane %v2073_v8, 4 }
 0x311   :  { %v2069_v23 = vrot.slane %v2068_v28, 1  ;;  %v2084_v21 = vadd.f32 %v2083_v27, %v2082_v16  ;;  %v2287_v27 = vmul.u32 16, %v9007_v38  ;;  %v8207_v16 = vld [vmem:[%s10835_s6 + $0x40] sm:$0xff]  }
 0x312   :  { %v2063_v17 = vadd.f32 %v2062_v24, %v2061_v51  ;;  %v2075_v33 = vadd.f32 %v2074_v42, %v2073_v8  ;;  %v2286_v24 = vmul.u32 16, %v8933_v43  ;;  %v2293_v51 = vadd.s32 1, %v9007_v38 }
 0x313   :  { %v2070_v20 = vadd.f32 %v2069_v23, %v2068_v28  ;;  %v2085_v19 = vrot.slane %v2084_v21, 1  ;;  %v9450_v23 = vadd.s32 128, %v8990_v30  ;;  %v9455_v28 = vadd.s32 1, %v8933_v43 }
 0x314   :  { %v2295_v18 = vmul.u32 16, %v2293_v51 }
 0x315   :  { %2376 = vmatprep.mubr.f32.mxu1 %v2070_v20  ;;  %v2086_v11 = vadd.f32 %v2085_v19, %v2084_v21  ;;  %11104 = vst [vmem:[#allocation34_spill] sm:$0xff] %v9450_v23  ;;  %11105 = vst [vmem:[#allocation35_spill] sm:$0xff] %v9455_v28  ;;  %v2294_v47 = vmul.u32 16, %v9455_v28  ;;  %v11338_v28 = vld [vmem:[#allocation31_spill] sm:$0xff] }
 0x316   :  { %2377 = vmatmul.mubr.f32.vlgmr.msra.gmra.mrb[8].mxu1 %v2063_v17  ;;  %v2076_v17 = vrot.slane %v2075_v33, 2 }
 0x317   :  { %7528 = vmatpush3.bf16.msk.msra.mxu1 %vm9050_vm3, %v11094_v36  ;;  %2448 = vmatprep.mubr.f32.mxu1 %v2086_v11 }
 0x318   :  { %7530 = vmatprep.subr.msk.bf16.mxu1 %vm9071_vm10, %v11094_v36  ;;  %v2077_v19 = vadd.f32 %v2076_v17, %v2075_v33 }
 0x31a   :  { %v2078_v20 = vrot.slane %v2077_v19, 1 }
 0x31b   :  { %7532 = vmatpush3.bf16.msk.msra.mxu1 %vm9092_vm2, %v11094_v36 }
 0x31c   :  { %7534 = vmatprep.subr.msk.bf16.mxu1 %vm11095_vm8, %v11094_v36  ;;  %v2079_v21 = vadd.f32 %v2078_v20, %v2077_v19 }
 0x31f   :  { %7536 = vmatpush3.bf16.msk.msra.mxu1 %vm11096_vm1, %v11094_v36 }
 0x320   :  { %7538 = vmatprep.subr.msk.bf16.mxu1 %vm11097_vm11, %v11094_v36  ;;  %vm2298_vm11 = vcmp.lt.s32.totalorder %v8990_v30, %v2295_v18 }
 0x323   :  { %7540 = vmatpush3.bf16.msk.msra.mxu1 %vm11098_vm9, %v11094_v36  ;;  %vm2290_vm9 = vcmp.ge.s32.totalorder %v8990_v30, %v2287_v27 }
 0x324   :  { %7542 = vmatprep.subr.msk.bf16.mxu1 %vm11099_vm13, %v11094_v36  ;;  %vm2302_vm2 = vmand %vm2290_vm9, %vm2298_vm11  ;;  %vm11114_vm11 = vnez %v11059_v1  ;;  %vm11115_vm9 = vnez %v11061_v26 }
 0x327   :  { %7544 = vmatpush3.bf16.msk.msra.mxu1 %vm11100_vm7, %v11094_v36  ;;  %vm2296_vm7 = vcmp.lt.s32.totalorder %v8990_v30, %v2294_v47 }
 0x328   :  { %7546 = vmatprep.subr.msk.bf16.mxu1 %vm11101_vm14, %v11094_v36  ;;  %vm2288_vm14 = vcmp.ge.s32.totalorder %v8990_v30, %v2286_v24 }
 0x329   :  { %vm2300_vm8 = vmand %vm2288_vm14, %vm2296_vm7  ;;  %vm11119_vm7 = vnez %v11077_v25  ;;  %vm11120_vm14 = vnez %v11081_v31 }
 0x32b   :  { %7548 = vmatpush3.bf16.msk.msra.mxu1 %vm11102_vm6, %v11094_v36 }
 0x32c   :  { %7550 = vmatprep.subr.msk.bf16.mxu1 %vm11103_vm15, %v11094_v36  ;;  %vm2299_vm15 = vcmp.lt.s32.totalorder %v9450_v23, %v2295_v18 }
 0x32f   :  { %7552 = vmatpush3.bf16.msk.msra.mxu1 %vm9349_vm0, %v11094_v36  ;;  %vm2297_vm0 = vcmp.lt.s32.totalorder %v9450_v23, %v2294_v47  ;;  %v2461_v47 = vld [vmem:[%s10834_s5] sm:$0x1] }
 0x330   :  { %7554 = vmatprep.subr.msk.bf16.mxu1 %vm9367_vm5, %v11094_v36  ;;  %vm9459_vm5 = vcmp.ge.s32.totalorder %v9450_v23, %v2286_v24  ;;  %v2457_v24 = vld [vmem:[%s10833_s4] sm:$0x1] }
 0x331   :  { %vm2301_vm6 = vmand %vm9459_vm5, %vm2297_vm0 }
 0x332   :  { %vm9481_vm5 = vmpackc.low %vm2302_vm2, %vm2300_vm8  ;;  %vm2464_vm2 = vcmask 130048   ;;  %vm11113_vm8 = vnez %v11057_v61 }
 0x333   :  { %7556 = vmatpush3.bf16.msk.msra.mxu1 %vm9377_vm4, %v11094_v36  ;;  %vm2291_vm4 = vcmp.ge.s32.totalorder %v9450_v23, %v2287_v27  ;;  %v11335_v23 = vmov 0 }
 0x334   :  { %vm2303_vm13 = vmand %vm2291_vm4, %vm2299_vm15  ;;  %vm2816_vm15 = vcmask 123904  }
 0x335   :  { %vm9474_vm1 = vmpackc.low %vm2303_vm13, %vm2301_vm6  ;;  %vm11118_vm13 = vnez %v11073_v22  ;;  %vm11121_vm6 = vnez %v11085_v41 }
 0x336   :  { %2449 = vmatmul.mubr.f32.vlgmr.msra.gmra.mrb[10].mxu1 %v2079_v21  ;;  %7558 = vmatprep.subr.msk.bf16.mxu1 %vm9474_vm1, %v11094_v36 }
 0x337   :  { %2532 = vmatprep.mubr.f32.mxu1 %v10973_v50  ;;  %7560 = vmatpush1.bf16.msk.msra.mxu1 %vm9481_vm5, %v11094_v36 }
 0x338   :  { %7562 = vmatprep.subr.msk.bf16.mxu1 %vm9474_vm1, %v11094_v36 }
 0x3e9   :  { %v7223_v10 = vpop.f32.mrb[8].mxu1 }
 0x3ea   :  { %v7224_v13 = vpop.f32.mrb[9].mxu1 }
 0x3eb   :  { %v7225_v11 = vadd.f32 %v7224_v13, %v7223_v10  ;;  %v8208_v10 = vld [vmem:[%s10835_s6] sm:$0xff]  }
 0x3ed   :  { %v2383_v49 = vmul.f32 0.03125, %v7225_v11  ;;  %v8209_v11 = vld [vmem:[%s10835_s6 + $0x48] sm:$0xff]  }
 0x3ef   :  { %v2455_v17 = vmul.f32 %v2383_v49, %v2383_v49 }
 0x409   :  { %v7258_v8 = vpop.f32.mrb[10].mxu1 }
 0x40a   :  { %v7259_v42 = vpop.f32.mrb[11].mxu1 }
 0x40b   :  { %v7260_v33 = vadd.f32 %v7259_v42, %v7258_v8  ;;  %v8211_v8 = vld [vmem:[%s10835_s6 + $0x50] sm:$0xff]  }
 0x40c   :  { %v8212_v42 = vld [vmem:[%s10835_s6 + $0x10] sm:$0xff]  }
 0x40d   :  { %v2454_v19 = vmul.f32 0.03125, %v7260_v33  ;;  %v8213_v33 = vld [vmem:[%s10835_s6 + $0x58] sm:$0xff]  }
 0x40f   :  { %v2456_v20 = vsub.f32 %v2454_v19, %v2455_v17  ;;  %v8214_v17 = vld [vmem:[%s10835_s6 + $0x18] sm:$0xff]   ;;  %v8215_v19 = vld [vmem:[%s10835_s6 + $0x60] sm:$0xff]  }
 0x411   :  { %v2458_v21 = vadd.f32 1e-05, %v2456_v20  ;;  %v8216_v20 = vld [vmem:[%s10835_s6 + $0x20] sm:$0xff]  }
 0x413   :  { %8610 = vrsqrt.f32 %v2458_v21  ;;  %v8217_v21 = vld [vmem:[%s10835_s6 + $0x68] sm:$0xff]  }
 0x41d   :  { %v8611_v27 = vpop.eup %8610 }
 0x41e   :  { %v2460_v51 = vmul.f32 %v8611_v27, %v2457_v24  ;;  %v8218_v24 = vld [vmem:[%s10835_s6 + $0x28] sm:$0xff]   ;;  %v8219_v27 = vld [vmem:[%s10835_s6 + $0x70] sm:$0xff]  }
 0x420   :  { %6626 = vmatmul.mubr.msk.f32.vlgmr.msra.gmra.mrb[12].mxu1 %vm2464_vm2, %v2460_v51  ;;  %v2462_v18 = vmul.f32 %v2460_v51, %v2383_v49  ;;  %v8210_v49 = vld [vmem:[%s10835_s6 + $0x8] sm:$0xff]   ;;  %v8220_v51 = vld [vmem:[%s10835_s6 + $0x30] sm:$0xff]  }
 0x421   :  { %7564 = vmatpush1.bf16.msk.msra.mxu1 %vm9481_vm5, %v11094_v36  ;;  %2616 = vmatprep.mubr.f32.mxu1 %v10973_v50 }
 0x422   :  { %v2463_v13 = vsub.f32 %v2461_v47, %v2462_v18  ;;  %7261 = vmatprep.subr.bf16.mxu1 %v8207_v16  ;;  %v8221_v16 = vld [vmem:[%s10835_s6 + $0x78] sm:$0xff]   ;;  %v8225_v18 = vld [vmem:[%s10837_s8 + $0x4] ss:$8 sps:$4 sm:$0xff]  }
 0x423   :  { %v8222_v47 = vld [vmem:[%s10835_s6 + $0x38] sm:$0xff]  }
 0x424   :  { %6631 = vmatmul.mubr.msk.f32.vlgmr.msra.gmra.mrb[14].mxu1 %vm2464_vm2, %v2463_v13 }
 0x425   :  { %7262 = vmatpush3.bf16.msra.mxu1 %v8208_v10 }
 0x426   :  { %7263 = vmatprep.subr.bf16.mxu1 %v8209_v11 }
 0x429   :  { %7264 = vmatpush3.bf16.msra.mxu1 %v8210_v49 }
 0x42a   :  { %7265 = vmatprep.subr.bf16.mxu1 %v8211_v8 }
 0x42d   :  { %7266 = vmatpush3.bf16.msra.mxu1 %v8212_v42 }
 0x42e   :  { %7267 = vmatprep.subr.bf16.mxu1 %v8213_v33 }
 0x431   :  { %7268 = vmatpush3.bf16.msra.mxu1 %v8214_v17 }
 0x432   :  { %7269 = vmatprep.subr.bf16.mxu1 %v8215_v19 }
 0x435   :  { %7270 = vmatpush3.bf16.msra.mxu1 %v8216_v20 }
 0x436   :  { %7271 = vmatprep.subr.bf16.mxu1 %v8217_v21 }
 0x439   :  { %7272 = vmatpush3.bf16.msra.mxu1 %v8218_v24 }
 0x43a   :  { %7273 = vmatprep.subr.bf16.mxu1 %v8219_v27 }
 0x43d   :  { %7274 = vmatpush3.bf16.msra.mxu1 %v8220_v51 }
 0x43e   :  { %7275 = vmatprep.subr.bf16.mxu1 %v8221_v16 }
 0x441   :  { %7276 = vmatpush3.bf16.msra.mxu1 %v8222_v47 }
 0x442   :  { %2834 = vmatprep.subr.bf16.mxu1 %v8225_v18 }
 0x4f3   :  { %v2534_v10 = vpop.f32.mrb[12].mxu1 }
 0x4f4   :  { %v2542_v13 = vrot.slane %v2534_v10, %v8973_v6  ;;  %v2536_v11 = vpop.f32.mrb[13].mxu1  ;;  %v8783_v10 = vmov 0  }
 0x4f5   :  { %v2546_v49 = vrot.slane %v2536_v11, %v8973_v6  ;;  %v6632_v11 = vld [vmem:[%s10836_s7] ss:$0 sm:$0xff] }
 0x4f6   :  { %v2547_v8 = vmul.f32 %v2542_v13, %v9390_v34  ;;  %v8223_v34 = vld [vmem:[%s10837_s8] ss:$8 sps:$4 sm:$0xff]  }
 0x4f7   :  { %v2548_v42 = vmul.f32 %v2546_v49, %v9394_v63  ;;  %v2618_v33 = vpop.f32.mrb[14].mxu1 }
 0x4f8   :  { %v2626_v17 = vrot.slane %v2618_v33, %v8973_v6  ;;  %v2620_v19 = vpop.f32.mrb[15].mxu1 }
 0x4f9   :  { %v2630_v20 = vrot.slane %v2620_v19, %v8973_v6 }
 0x4fa   :  { %v2631_v21 = vadd.f32 %v2626_v17, %v2547_v8 }
 0x4fb   :  { %v2632_v24 = vadd.f32 %v2630_v20, %v2548_v42 }
 0x4fc   :  { %vm2633_vm0 = vcmp.gt.f32.partialorder %v2631_v21, 0.0  ;;  %v2635_v27 = vmul.f32 0.2, %v2631_v21 }
 0x4fd   :  { %v2636_v51 = vmul.f32 0.2, %v2632_v24  ;;  %vm2634_vm4 = vcmp.gt.f32.partialorder %v2632_v24, 0.0 }
 0x4fe   :  { %v2637_v16 = vsel %vm2633_vm0, %v2631_v21, %v2635_v27  ;;  %vm11122_vm0 = vnez %v11089_v55 }
 0x4ff   :  { %v2638_v47 = vsel %vm2634_vm4, %v2632_v24, %v2636_v51  ;;  %v2639_v63 = vpack.c.bf16 %v2637_v16, %v2637_v16  ;;  %vm11123_vm4 = vnez %v11091_v56 }
 0x500   :  { %v2640_v18 = vpack.c.bf16 %v2638_v47, %v2638_v47 }
 0x502   :  { %2808 = vmatprep.mubr.bf16.mxu1 %v2640_v18 }
 0x503   :  { %2809 = vmatmul.mubr.bf16.vlgmr.msra.gmra.mrb[16].mxu1 %v2639_v63 }
 0x504   :  { %2835 = vmatpush1.bf16.msra.mxu1 %v8223_v34  ;;  %2866 = vmatprep.mubr.bf16.mxu1 %v8783_v10 }
 0x505   :  { %7566 = vmatprep.subr.msk.bf16.mxu1 %vm9029_vm12, %v11094_v36  ;;  %vm11112_vm12 = vnez %v11055_v57 }
 0x5d6   :  { %v7277_v13 = vpop.f32.mrb[16].mxu1 }
 0x5d7   :  { %v7278_v49 = vpop.f32.mrb[17].mxu1 }
 0x5d8   :  { %v7279_v8 = vadd.f32 %v7278_v49, %v7277_v13  ;;  %v7280_v42 = vpop.f32.mrb[18].mxu1 }
 0x5d9   :  { %v7281_v33 = vpop.f32.mrb[19].mxu1 }
 0x5da   :  { %v2811_v17 = vadd.f32 %v7279_v8, %v6632_v11 }
 0x5dc   :  { %v2818_v19 = vpack.c.bf16 %v2811_v17, %v2811_v17  ;;  %2817 = vst.msk [vmem:[#allocation10] sm:$0x3] %vm2816_vm15, %v2811_v17  ;;  %vm11124_vm15 = vnez %v11093_v60 }
 0x5de   :  { %6651 = vmatmul.mubr.msk.bf16.vlgmr.msra.gmra.mrb[20].mxu1 %vm2464_vm2, %v2818_v19  ;;  %v8229_v19 = vld [vmem:[#allocation7 + $0x8] ss:$16 sps:$4 sm:$0xff]  }
 0x5df   :  { %7568 = vmatpush3.bf16.msk.msra.mxu1 %vm9050_vm3, %v11094_v36  ;;  %vm11116_vm3 = vnez %v11063_v12 }
 0x5e0   :  { %7570 = vmatprep.subr.msk.bf16.mxu1 %vm9071_vm10, %v11094_v36  ;;  %vm11117_vm10 = vnez %v11065_v14 }
 0x5e3   :  { %7572 = vmatpush3.bf16.msk.msra.mxu1 %vm11112_vm12, %v11094_v36  ;;  %vm11125_vm12 = vcmask 1041408  }
 0x5e4   :  { %7574 = vmatprep.subr.msk.bf16.mxu1 %vm11113_vm8, %v11094_v36  ;;  %vm11126_vm8 = vmmov %vm11125_vm12 }
 0x5e7   :  { %7576 = vmatpush3.bf16.msk.msra.mxu1 %vm11114_vm11, %v11094_v36  ;;  %vm11127_vm11 = vmmov %vm11126_vm8 }
 0x5e8   :  { %7578 = vmatprep.subr.msk.bf16.mxu1 %vm11115_vm9, %v11094_v36  ;;  %vm11128_vm9 = vmmov %vm11126_vm8 }
 0x5eb   :  { %7580 = vmatpush3.bf16.msk.msra.mxu1 %vm11116_vm3, %v11094_v36 }
 0x5ec   :  { %7582 = vmatprep.subr.msk.bf16.mxu1 %vm11117_vm10, %v11094_v36 }
 0x5ef   :  { %7584 = vmatpush3.bf16.msk.msra.mxu1 %vm11118_vm13, %v11094_v36 }
 0x5f0   :  { %7586 = vmatprep.subr.msk.bf16.mxu1 %vm11119_vm7, %v11094_v36 }
 0x5f3   :  { %7588 = vmatpush3.bf16.msk.msra.mxu1 %vm11120_vm14, %v11094_v36 }
 0x5f4   :  { %7590 = vmatprep.subr.msk.bf16.mxu1 %vm11121_vm6, %v11094_v36 }
 0x5f7   :  { %7592 = vmatpush3.bf16.msk.msra.mxu1 %vm11122_vm0, %v11094_v36 }
 0x5f8   :  { %7594 = vmatprep.subr.msk.bf16.mxu1 %vm11123_vm4, %v11094_v36 }
 0x5fb   :  { %7596 = vmatpush3.bf16.msk.msra.mxu1 %vm11124_vm15, %v11094_v36 }
 0x5fc   :  { %7630 = vmatprep.subr.msk.bf16.mxu1 %vm9474_vm1, %v11094_v36 }
 0x6b1   :  { %v9618_v3 = vpop.f32.mrb[20].mxu1 }
 0x6b2   :  { %v2875_v45 = vsel %vm11125_vm12, %v9618_v3, 0.0  ;;  %v2889_v52 = vmul.f32 %v9618_v3, %v9618_v3  ;;  %v9624_v57 = vpop.f32.mrb[21].mxu1 }
 0x6b3   :  { %v2876_v61 = vrot.slane %v2875_v45, 4  ;;  %v2882_v1 = vsel %vm11126_vm8, %v9624_v57, 0.0  ;;  %v2890_v26 = vmul.f32 %v9624_v57, %v9624_v57  ;;  %v2872_v12 = vpop.f32.mrb[22].mxu1 }
 0x6b4   :  { %v2891_v14 = vsel %vm11127_vm11, %v2889_v52, 0.0  ;;  %v2883_v22 = vrot.slane %v2882_v1, 4  ;;  %v2873_v25 = vpop.f32.mrb[23].mxu1  ;;  %v8237_v52 = vld [vmem:[#allocation7 + $0x2c] ss:$16 sps:$4 sm:$0xff]  }
 0x6b5   :  { %v2877_v31 = vadd.f32 %v2876_v61, %v2875_v45  ;;  %v2892_v41 = vrot.slane %v2891_v14, 4  ;;  %v2898_v55 = vsel %vm11128_vm9, %v2890_v26, 0.0  ;;  %v8231_v45 = vld [vmem:[#allocation7 + $0xc] ss:$16 sps:$4 sm:$0xff]   ;;  %v8235_v61 = vld [vmem:[#allocation7 + $0x28] ss:$16 sps:$4 sm:$0xff]  }
 0x6b6   :  { %v2884_v56 = vadd.f32 %v2883_v22, %v2882_v1  ;;  %v2899_v60 = vrot.slane %v2898_v55, 4  ;;  %3653 = vmatprep.subr.bf16.mxu0 %v8231_v45  ;;  %v8243_v1 = vld [vmem:[#allocation7 + $0x4c] ss:$16 sps:$4 sm:$0xff]   ;;  %v8241_v26 = vld [vmem:[#allocation7 + $0x48] ss:$16 sps:$4 sm:$0xff]  }
 0x6b7   :  { %v2878_v20 = vrot.slane %v2877_v31, 2  ;;  %v2893_v21 = vadd.f32 %v2892_v41, %v2891_v14  ;;  %v8249_v12 = vld [vmem:[#allocation7 + $0x6c] ss:$16 sps:$4 sm:$0xff]   ;;  %v8247_v14 = vld [vmem:[#allocation7 + $0x68] ss:$16 sps:$4 sm:$0xff]  }
 0x6b8   :  { %v2885_v24 = vrot.slane %v2884_v56, 2  ;;  %v2900_v27 = vadd.f32 %v2899_v60, %v2898_v55  ;;  %v8255_v22 = vld [vmem:[#allocation7 + $0x8c] ss:$16 sps:$4 sm:$0xff]   ;;  %v8253_v25 = vld [vmem:[#allocation7 + $0x88] ss:$16 sps:$4 sm:$0xff]  }
 0x6b9   :  { %v2879_v51 = vadd.f32 %v2878_v20, %v2877_v31  ;;  %v2894_v16 = vrot.slane %v2893_v21, 2  ;;  %v8259_v31 = vld [vmem:[#allocation7 + $0xa8] ss:$16 sps:$4 sm:$0xff]   ;;  %v8267_v41 = vld [vmem:[#allocation7 + $0xcc] ss:$16 sps:$4 sm:$0xff]  }
 0x6ba   :  { %v2886_v47 = vadd.f32 %v2885_v24, %v2884_v56  ;;  %v2901_v18 = vrot.slane %v2900_v27, 2  ;;  %v8265_v55 = vld [vmem:[#allocation7 + $0xc8] ss:$16 sps:$4 sm:$0xff]   ;;  %v8273_v56 = vld [vmem:[#allocation7 + $0xec] ss:$16 sps:$4 sm:$0xff]  }
 0x6bb   :  { %v2880_v34 = vrot.slane %v2879_v51, 1  ;;  %v2895_v63 = vadd.f32 %v2894_v16, %v2893_v21  ;;  %v8271_v60 = vld [vmem:[#allocation7 + $0xe8] ss:$16 sps:$4 sm:$0xff]   ;;  %v8279_v20 = vld [vmem:[#allocation7 + $0x10c] ss:$16 sps:$4 sm:$0xff]  }
 0x6bc   :  { %v2887_v10 = vrot.slane %v2886_v47, 1  ;;  %v2902_v13 = vadd.f32 %v2901_v18, %v2900_v27  ;;  %v8277_v21 = vld [vmem:[#allocation7 + $0x108] ss:$16 sps:$4 sm:$0xff]   ;;  %v8285_v24 = vld [vmem:[#allocation7 + $0x12c] ss:$16 sps:$4 sm:$0xff]  }
 0x6bd   :  { %v2896_v11 = vrot.slane %v2895_v63, 1  ;;  %v2881_v42 = vadd.f32 %v2880_v34, %v2879_v51  ;;  %v8283_v27 = vld [vmem:[#allocation7 + $0x128] ss:$16 sps:$4 sm:$0xff]   ;;  %v8291_v51 = vld [vmem:[#allocation7 + $0x14c] ss:$16 sps:$4 sm:$0xff]  }
 0x6be   :  { %v2888_v49 = vadd.f32 %v2887_v10, %v2886_v47  ;;  %v2903_v8 = vrot.slane %v2902_v13, 1  ;;  %v8289_v16 = vld [vmem:[#allocation7 + $0x148] ss:$16 sps:$4 sm:$0xff]   ;;  %v8297_v47 = vld [vmem:[#allocation7 + $0x16c] ss:$16 sps:$4 sm:$0xff]  }
 0x6bf   :  { %v2897_v17 = vadd.f32 %v2896_v11, %v2895_v63  ;;  %v8295_v18 = vld [vmem:[#allocation7 + $0x168] ss:$16 sps:$4 sm:$0xff]   ;;  %v8303_v34 = vld [vmem:[#allocation7 + $0x18c] ss:$16 sps:$4 sm:$0xff]  }
 0x6c0   :  { %2969 = vmatprep.mubr.f32.mxu1 %v2888_v49  ;;  %v2904_v33 = vadd.f32 %v2903_v8, %v2902_v13  ;;  %v8301_v63 = vld [vmem:[#allocation7 + $0x188] ss:$16 sps:$4 sm:$0xff]  }
 0x6c1   :  { %2970 = vmatmul.mubr.f32.vlgmr.msra.gmra.mrb[24].mxu1 %v2881_v42 }
 0x6c2   :  { %3040 = vmatprep.mubr.f32.mxu0 %v2904_v33  ;;  %7632 = vmatpush1.bf16.msk.msra.mxu1 %vm9481_vm5, %v11094_v36 }
 0x6c3   :  { %3041 = vmatmul.mubr.f32.vlgmr.msra.gmra.mrb[8].mxu0 %v2897_v17  ;;  %3123 = vmatprep.mubr.f32.mxu1 %v10973_v50 }
 0x6c4   :  { %7634 = vmatprep.subr.msk.bf16.mxu1 %vm9474_vm1, %v11094_v36  ;;  %3654 = vmatpush1.bf16.msra.mxu0 %v8229_v19 }
 0x6c5   :  { %3655 = vmatprep.subr.bf16.mxu0 %v8237_v52 }
 0x6c8   :  { %3656 = vmatpush1.bf16.msra.mxu0 %v8235_v61  ;;  %v3049_v61 = vld [vmem:[%s10838_s9] sm:$0x1] }
 0x6c9   :  { %3657 = vmatprep.subr.bf16.mxu0 %v8243_v1 }
 0x6cc   :  { %3658 = vmatpush1.bf16.msra.mxu0 %v8241_v26 }
 0x6cd   :  { %3659 = vmatprep.subr.bf16.mxu0 %v8249_v12  ;;  %v8228_v12 = vld [vmem:[#allocation7 + $0x4] ss:$16 sps:$4 sm:$0xff]  }
 0x6d0   :  { %3660 = vmatpush1.bf16.msra.mxu0 %v8247_v14  ;;  %v3053_v14 = vld [vmem:[%s10839_s10] sm:$0x1] }
 0x6d1   :  { %3661 = vmatprep.subr.bf16.mxu0 %v8255_v22 }
 0x6d4   :  { %3662 = vmatpush1.bf16.msra.mxu0 %v8253_v25  ;;  %v8226_v25 = vld [vmem:[#allocation7] ss:$16 sps:$4 sm:$0xff]  }
 0x6d5   :  { %3663 = vmatprep.subr.bf16.mxu0 %v8261_v4 }
 0x6d8   :  { %3664 = vmatpush1.bf16.msra.mxu0 %v8259_v31  ;;  %v8234_v31 = vld [vmem:[#allocation7 + $0x24] ss:$16 sps:$4 sm:$0xff]  }
 0x6d9   :  { %3665 = vmatprep.subr.bf16.mxu0 %v8267_v41  ;;  %v8232_v41 = vld [vmem:[#allocation7 + $0x20] ss:$16 sps:$4 sm:$0xff]  }
 0x6dc   :  { %3666 = vmatpush1.bf16.msra.mxu0 %v8265_v55  ;;  %v8240_v55 = vld [vmem:[#allocation7 + $0x44] ss:$16 sps:$4 sm:$0xff]  }
 0x6dd   :  { %3667 = vmatprep.subr.bf16.mxu0 %v8273_v56  ;;  %v8238_v56 = vld [vmem:[#allocation7 + $0x40] ss:$16 sps:$4 sm:$0xff]  }
 0x6e0   :  { %3668 = vmatpush1.bf16.msra.mxu0 %v8271_v60  ;;  %v8246_v60 = vld [vmem:[#allocation7 + $0x64] ss:$16 sps:$4 sm:$0xff]  }
 0x6e1   :  { %3669 = vmatprep.subr.bf16.mxu0 %v8279_v20  ;;  %v8244_v20 = vld [vmem:[#allocation7 + $0x60] ss:$16 sps:$4 sm:$0xff]  }
 0x6e4   :  { %3670 = vmatpush1.bf16.msra.mxu0 %v8277_v21  ;;  %v8250_v21 = vld [vmem:[#allocation7 + $0x80] ss:$16 sps:$4 sm:$0xff]  }
 0x6e5   :  { %3671 = vmatprep.subr.bf16.mxu0 %v8285_v24  ;;  %v8258_v24 = vld [vmem:[#allocation7 + $0xa4] ss:$16 sps:$4 sm:$0xff]  }
 0x6e8   :  { %3672 = vmatpush1.bf16.msra.mxu0 %v8283_v27  ;;  %v8256_v27 = vld [vmem:[#allocation7 + $0xa0] ss:$16 sps:$4 sm:$0xff]  }
 0x6e9   :  { %3673 = vmatprep.subr.bf16.mxu0 %v8291_v51  ;;  %v8264_v51 = vld [vmem:[#allocation7 + $0xc4] ss:$16 sps:$4 sm:$0xff]  }
 0x6ec   :  { %3674 = vmatpush1.bf16.msra.mxu0 %v8289_v16  ;;  %v8262_v16 = vld [vmem:[#allocation7 + $0xc0] ss:$16 sps:$4 sm:$0xff]  }
 0x6ed   :  { %3675 = vmatprep.subr.bf16.mxu0 %v8297_v47  ;;  %v8270_v47 = vld [vmem:[#allocation7 + $0xe4] ss:$16 sps:$4 sm:$0xff]  }
 0x6f0   :  { %3676 = vmatpush1.bf16.msra.mxu0 %v8295_v18  ;;  %v8268_v18 = vld [vmem:[#allocation7 + $0xe0] ss:$16 sps:$4 sm:$0xff]  }
 0x6f1   :  { %3677 = vmatprep.subr.bf16.mxu0 %v8303_v34  ;;  %v8276_v34 = vld [vmem:[#allocation7 + $0x104] ss:$16 sps:$4 sm:$0xff]  }
 0x6f4   :  { %3678 = vmatpush1.bf16.msra.mxu0 %v8301_v63  ;;  %v8274_v63 = vld [vmem:[#allocation7 + $0x100] ss:$16 sps:$4 sm:$0xff]  }
 0x794   :  { %v7315_v10 = vpop.f32.mrb[24].mxu1 }
 0x795   :  { %v7316_v13 = vpop.f32.mrb[25].mxu1 }
 0x796   :  { %v7317_v11 = vadd.f32 %v7316_v13, %v7315_v10  ;;  %v7350_v49 = vpop.f32.mrb[8].mxu0  ;;  %v8282_v10 = vld [vmem:[#allocation7 + $0x124] ss:$16 sps:$4 sm:$0xff]   ;;  %v8280_v13 = vld [vmem:[#allocation7 + $0x120] ss:$16 sps:$4 sm:$0xff]  }
 0x797   :  { %v7351_v8 = vpop.f32.mrb[9].mxu0 }
 0x798   :  { %v2975_v42 = vmul.f32 0.03125, %v7317_v11  ;;  %v7352_v33 = vadd.f32 %v7351_v8, %v7350_v49  ;;  %v8288_v11 = vld [vmem:[#allocation7 + $0x144] ss:$16 sps:$4 sm:$0xff]   ;;  %v8286_v49 = vld [vmem:[#allocation7 + $0x140] ss:$16 sps:$4 sm:$0xff]  }
 0x799   :  { %v8294_v8 = vld [vmem:[#allocation7 + $0x164] ss:$16 sps:$4 sm:$0xff]  }
 0x79a   :  { %v3047_v17 = vmul.f32 %v2975_v42, %v2975_v42  ;;  %v3046_v19 = vmul.f32 0.03125, %v7352_v33  ;;  %v8300_v33 = vld [vmem:[#allocation7 + $0x184] ss:$16 sps:$4 sm:$0xff]  }
 0x79c   :  { %v3048_v45 = vsub.f32 %v3046_v19, %v3047_v17  ;;  %v8298_v17 = vld [vmem:[#allocation7 + $0x180] ss:$16 sps:$4 sm:$0xff]   ;;  %v8306_v19 = vld [vmem:[#allocation7 + $0x1a4] ss:$16 sps:$4 sm:$0xff]  }
 0x79e   :  { %v3050_v52 = vadd.f32 1e-05, %v3048_v45  ;;  %v8309_v45 = vld [vmem:[#allocation7 + $0x1ac] ss:$16 sps:$4 sm:$0xff]  }
 0x79f   :  { %3679 = vmatprep.subr.bf16.mxu0 %v8309_v45 }
 0x7a0   :  { %8612 = vrsqrt.f32 %v3050_v52  ;;  %v8304_v52 = vld [vmem:[#allocation7 + $0x1a0] ss:$16 sps:$4 sm:$0xff]  }
 0x7aa   :  { %v8613_v1 = vpop.eup %8612 }
 0x7ab   :  { %v3052_v26 = vmul.f32 %v8613_v1, %v3049_v61  ;;  %v8307_v61 = vld [vmem:[#allocation7 + $0x1a8] ss:$16 sps:$4 sm:$0xff]   ;;  %v8312_v1 = vld [vmem:[#allocation7 + $0x1c4] ss:$16 sps:$4 sm:$0xff]  }
 0x7ac   :  { %3680 = vmatpush1.bf16.msra.mxu0 %v8307_v61 }
 0x7ad   :  { %6720 = vmatmul.mubr.msk.f32.vlgmr.msra.gmra.mrb[26].mxu1 %vm2464_vm2, %v3052_v26  ;;  %v3054_v22 = vmul.f32 %v3052_v26, %v2975_v42  ;;  %v8292_v42 = vld [vmem:[#allocation7 + $0x160] ss:$16 sps:$4 sm:$0xff]   ;;  %v8315_v26 = vld [vmem:[#allocation7 + $0x1cc] ss:$16 sps:$4 sm:$0xff]  }
 0x7ae   :  { %7636 = vmatpush1.bf16.msk.msra.mxu1 %vm9481_vm5, %v11094_v36  ;;  %3207 = vmatprep.mubr.f32.mxu1 %v10973_v50  ;;  %v11324_v50 = vld [vmem:[#allocation29_spill] sm:$0xff] }
 0x7af   :  { %v3055_v4 = vsub.f32 %v3053_v14, %v3054_v22  ;;  %3612 = vmatprep.subr.bf16.mxu1 %v8228_v12  ;;  %v8310_v12 = vld [vmem:[#allocation7 + $0x1c0] ss:$16 sps:$4 sm:$0xff]   ;;  %v8313_v14 = vld [vmem:[#allocation7 + $0x1c8] ss:$16 sps:$4 sm:$0xff]   ;;  %3681 = vmatprep.subr.bf16.mxu0 %v8315_v26  ;;  %v8318_v22 = vld [vmem:[#allocation7 + $0x1e4] ss:$16 sps:$4 sm:$0xff]  }
 0x7b0   :  { %3682 = vmatpush1.bf16.msra.mxu0 %v8313_v14  ;;  %v11171_v14 = vmov 0 }
 0x7b1   :  { %6725 = vmatmul.mubr.msk.f32.vlgmr.msra.gmra.mrb[28].mxu1 %vm2464_vm2, %v3055_v4  ;;  %v8316_v4 = vld [vmem:[#allocation7 + $0x1e0] ss:$16 sps:$4 sm:$0xff]  }
 0x7b2   :  { %3613 = vmatpush1.bf16.msra.mxu1 %v8226_v25  ;;  %v8321_v25 = vld [vmem:[#allocation7 + $0x1ec] ss:$16 sps:$4 sm:$0xff]  }
 0x7b3   :  { %3614 = vmatprep.subr.bf16.mxu1 %v8234_v31  ;;  %v8319_v31 = vld [vmem:[#allocation7 + $0x1e8] ss:$16 sps:$4 sm:$0xff]   ;;  %3683 = vmatprep.subr.bf16.mxu0 %v8321_v25 }
 0x7b4   :  { %3684 = vmatpush1.bf16.msra.mxu0 %v8319_v31 }
 0x7b6   :  { %3615 = vmatpush1.bf16.msra.mxu1 %v8232_v41  ;;  %v9652_v41 = vmul.u32 64, %v8990_v30  ;;  %v3785_v30 = vadd.s32 504, %v8933_v43 }
 0x7b7   :  { %3616 = vmatprep.subr.bf16.mxu1 %v8240_v55  ;;  %v9655_v55 = vmul.u32 64, %v8999_v35  ;;  %v3770_v35 = vadd.s32 384, %v8933_v43 }
 0x7b8   :  { %vm3803_vm1 = vcmp.ge.s32.totalorder %v8987_v29, %v9652_v41  ;;  %vm3804_vm5 = vcmp.ge.s32.totalorder %v8993_v32, %v9652_v41  ;;  %vm3787_vm11 = vcmp.ge.s32.totalorder %v8933_v43, %v9652_v41 }
 0x7b9   :  { %vm3868_vm2 = vcmp.lt.s32.totalorder %v8987_v29, %v9655_v55  ;;  %vm3869_vm3 = vcmp.lt.s32.totalorder %v8993_v32, %v9655_v55  ;;  %vm3835_vm14 = vcmp.ge.s32.totalorder %v3770_v35, %v9652_v41  ;;  %vm3900_vm0 = vcmp.lt.s32.totalorder %v3770_v35, %v9655_v55 }
 0x7ba   :  { %3617 = vmatpush1.bf16.msra.mxu1 %v8238_v56  ;;  %vm9665_vm10 = vmand %vm3803_vm1, %vm3868_vm2  ;;  %v11129_v56 = vmov 0  ;;  %v11133_v29 = vmov 0  ;;  %v11135_v32 = vmov 0  ;;  %vm3852_vm1 = vcmp.lt.s32.totalorder %v8933_v43, %v9655_v55 }
 0x7bb   :  { %3618 = vmatprep.subr.bf16.mxu1 %v8246_v60  ;;  %v11130_v56 = vsel %vm9665_vm10, 4294967295, %v11129_v56  ;;  %v3771_v60 = vadd.s32 392, %v8933_v43  ;;  %vm9671_vm13 = vmand %vm3804_vm5, %vm3869_vm3  ;;  %vm11140_vm2 = vcmp.ge.s32.totalorder %v9007_v38, %v9652_v41 }
 0x7bc   :  { %vm10905_vm7 = vmpackc.low %vm9671_vm13, %vm9665_vm10 }
 0x7bd   :  { %vm3836_vm6 = vcmp.ge.s32.totalorder %v3771_v60, %v9652_v41  ;;  %vm3901_vm4 = vcmp.lt.s32.totalorder %v3771_v60, %v9655_v55  ;;  %vm9689_vm15 = vmand %vm3835_vm14, %vm3900_vm0  ;;  %vm3805_vm0 = vcmp.ge.s32.totalorder %v9016_v37, %v9652_v41  ;;  %v11187_v60 = vmov 0 }
 0x7be   :  { %3619 = vmatpush1.bf16.msra.mxu1 %v8244_v20  ;;  %v11131_v20 = vmov 0  ;;  %v11134_v29 = vsel %vm9689_vm15, 4294967295, %v11133_v29  ;;  %vm9693_vm12 = vmand %vm3836_vm6, %vm3901_vm4  ;;  %vm3806_vm4 = vcmp.ge.s32.totalorder %v9023_v39, %v9652_v41 }
 0x7bf   :  { %3620 = vmatprep.subr.bf16.mxu1 %v8252_v9  ;;  %v11132_v20 = vsel %vm9671_vm13, 4294967295, %v11131_v20  ;;  %v11136_v32 = vsel %vm9693_vm12, 4294967295, %v11135_v32  ;;  %vm10904_vm8 = vmpackc.low %vm9693_vm12, %vm9689_vm15  ;;  %v3754_v9 = vadd.s32 256, %v8933_v43  ;;  %vm11139_vm15 = vcmp.lt.s32.totalorder %v9007_v38, %v9655_v55 }
 0x7c0   :  { %7670 = vmatprep.subr.msk.bf16.mxu0 %vm10904_vm8, %v11094_v36  ;;  %vm3870_vm8 = vcmp.lt.s32.totalorder %v9016_v37, %v9655_v55  ;;  %vm9741_vm5 = vmand %vm3787_vm11, %vm3852_vm1  ;;  %v11141_v37 = vmov 0  ;;  %v11148_v38 = vmov 0 }
 0x7c1   :  { %vm3884_vm14 = vcmp.lt.s32.totalorder %v3754_v9, %v9655_v55  ;;  %vm9751_vm12 = vmand %vm11140_vm2, %vm11139_vm15  ;;  %vm11143_vm10 = vcmp.ge.s32.totalorder %v3754_v9, %v9652_v41  ;;  %v11189_v9 = vmov 0 }
 0x7c2   :  { %3621 = vmatpush1.bf16.msra.mxu1 %v8250_v21  ;;  %v3755_v21 = vadd.s32 264, %v8933_v43  ;;  %v11142_v37 = vsel %vm9751_vm12, 4294967295, %v11141_v37  ;;  %vm9757_vm13 = vmand %vm11143_vm10, %vm3884_vm14  ;;  %vm3789_vm10 = vcmp.ge.s32.totalorder %v9034_v40, %v9652_v41  ;;  %vm3854_vm14 = vcmp.lt.s32.totalorder %v9034_v40, %v9655_v55 }
 0x7c3   :  { %3622 = vmatprep.subr.bf16.mxu1 %v8258_v24  ;;  %v3772_v24 = vadd.s32 400, %v8933_v43  ;;  %vm9767_vm2 = vmand %vm3805_vm0, %vm3870_vm8  ;;  %v3775_v40 = vadd.s32 424, %v8933_v43 }
 0x7c4   :  { %vm3820_vm3 = vcmp.ge.s32.totalorder %v3755_v21, %v9652_v41  ;;  %vm3885_vm6 = vcmp.lt.s32.totalorder %v3755_v21, %v9655_v55  ;;  %v11149_v38 = vsel %vm9767_vm2, 4294967295, %v11148_v38  ;;  %v11193_v21 = vmov 0 }
 0x7c5   :  { %vm3902_vm9 = vcmp.lt.s32.totalorder %v3772_v24, %v9655_v55  ;;  %vm9761_vm11 = vmand %vm3820_vm3, %vm3885_vm6  ;;  %vm3790_vm3 = vcmp.ge.s32.totalorder %v9044_v44, %v9652_v41  ;;  %vm3855_vm6 = vcmp.lt.s32.totalorder %v9044_v44, %v9655_v55  ;;  %vm11152_vm8 = vcmp.ge.s32.totalorder %v3772_v24, %v9652_v41 }
 0x7c6   :  { %3623 = vmatpush1.bf16.msra.mxu1 %v8256_v27  ;;  %v3773_v27 = vadd.s32 408, %v8933_v43  ;;  %vm9785_vm0 = vmand %vm11152_vm8, %vm3902_vm9  ;;  %v11157_v44 = vmov 0 }
 0x7c7   :  { %3624 = vmatprep.subr.bf16.mxu1 %v8264_v51  ;;  %v3756_v51 = vadd.s32 272, %v8933_v43  ;;  %vm9799_vm9 = vmand %vm3789_vm10, %vm3854_vm14  ;;  %vm3808_vm10 = vcmp.ge.s32.totalorder %v9065_v48, %v9652_v41  ;;  %vm3873_vm14 = vcmp.lt.s32.totalorder %v9065_v48, %v9655_v55  ;;  %v3759_v48 = vadd.s32 296, %v8933_v43 }
 0x7c8   :  { %vm3838_vm1 = vcmp.ge.s32.totalorder %v3773_v27, %v9652_v41  ;;  %v11158_v44 = vsel %vm9799_vm9, 4294967295, %v11157_v44  ;;  %vm9803_vm8 = vmand %vm3790_vm3, %vm3855_vm6 }
 0x7ca   :  { %3625 = vmatpush1.bf16.msra.mxu1 %v8262_v16  ;;  %v3757_v16 = vadd.s32 280, %v8933_v43 }
 0x7cb   :  { %3626 = vmatprep.subr.bf16.mxu1 %v8270_v47  ;;  %v11137_v47 = vmov 0 }
 0x7cc   :  { %v11138_v47 = vsel %vm9741_vm5, 4294967295, %v11137_v47  ;;  %vm3903_vm5 = vcmp.lt.s32.totalorder %v3773_v27, %v9655_v55  ;;  %vm3822_vm2 = vcmp.ge.s32.totalorder %v3757_v16, %v9652_v41  ;;  %v11199_v27 = vmov 0 }
 0x7ce   :  { %3627 = vmatpush1.bf16.msra.mxu1 %v8268_v18  ;;  %v11146_v18 = vmov 0 }
 0x7cf   :  { %3628 = vmatprep.subr.bf16.mxu1 %v8276_v34  ;;  %v11147_v18 = vsel %vm9761_vm11, 4294967295, %v11146_v18  ;;  %v11150_v34 = vmov 0  ;;  %vm3887_vm11 = vcmp.lt.s32.totalorder %v3757_v16, %v9655_v55 }
 0x7d0   :  { %vm9819_vm3 = vmand %vm3822_vm2, %vm3887_vm11  ;;  %vm3905_vm11 = vcmp.lt.s32.totalorder %v3775_v40, %v9655_v55 }
 0x7d1   :  { %vm9835_vm2 = vmand %vm3808_vm10, %vm3873_vm14  ;;  %vm3824_vm10 = vcmp.ge.s32.totalorder %v3759_v48, %v9652_v41 }
 0x7d2   :  { %3629 = vmatpush1.bf16.msra.mxu1 %v8274_v63  ;;  %v11153_v63 = vmov 0 }
 0x7d3   :  { %3630 = vmatprep.subr.bf16.mxu1 %v8282_v10  ;;  %v11154_v63 = vsel %vm9785_vm0, 4294967295, %v11153_v63  ;;  %v3774_v10 = vadd.s32 416, %v8933_v43 }
 0x7d5   :  { %vm3839_vm6 = vcmp.ge.s32.totalorder %v3774_v10, %v9652_v41 }
 0x7d6   :  { %3631 = vmatpush1.bf16.msra.mxu1 %v8280_v13  ;;  %v11155_v13 = vmov 0 }
 0x7d7   :  { %3632 = vmatprep.subr.bf16.mxu1 %v8288_v11  ;;  %v11159_v11 = vmov 0 }
 0x7d8   :  { %v11160_v11 = vsel %vm9803_vm8, 4294967295, %v11159_v11  ;;  %vm3904_vm8 = vcmp.lt.s32.totalorder %v3774_v10, %v9655_v55  ;;  %v11203_v10 = vmov 0 }
 0x7da   :  { %3633 = vmatpush1.bf16.msra.mxu1 %v8286_v49  ;;  %v11161_v49 = vmov 0 }
 0x7db   :  { %3634 = vmatprep.subr.bf16.mxu1 %v8294_v8 }
 0x7de   :  { %3635 = vmatpush1.bf16.msra.mxu1 %v8292_v42  ;;  %v11163_v42 = vmov 0 }
 0x7df   :  { %3636 = vmatprep.subr.bf16.mxu1 %v8300_v33  ;;  %v11164_v42 = vsel %vm9819_vm3, 4294967295, %v11163_v42  ;;  %vm11175_vm3 = vcmp.ge.s32.totalorder %v9076_v53, %v9652_v41 }
 0x7e2   :  { %3637 = vmatpush1.bf16.msra.mxu1 %v8298_v17 }
 0x7e3   :  { %3638 = vmatprep.subr.bf16.mxu1 %v8306_v19  ;;  %v11165_v19 = vmov 0 }
 0x7e6   :  { %3639 = vmatpush1.bf16.msra.mxu1 %v8304_v52  ;;  %v11167_v52 = vmov 0 }
 0x7e7   :  { %3640 = vmatprep.subr.bf16.mxu1 %v8312_v1  ;;  %v11168_v52 = vsel %vm9835_vm2, 4294967295, %v11167_v52  ;;  %v11169_v1 = vmov 0 }
 0x7ea   :  { %3641 = vmatpush1.bf16.msra.mxu1 %v8310_v12 }
 0x7eb   :  { %3642 = vmatprep.subr.bf16.mxu1 %v8318_v22 }
 0x7ee   :  { %3643 = vmatpush1.bf16.msra.mxu1 %v8316_v4  ;;  %v3777_v4 = vadd.s32 440, %v8933_v43 }
 0x7ef   :  { %7638 = vmatprep.subr.msk.bf16.mxu1 %vm10905_vm7, %v11094_v36  ;;  %vm3871_vm7 = vcmp.lt.s32.totalorder %v9023_v39, %v9655_v55  ;;  %v11144_v39 = vmov 0 }
 0x7f0   :  { %v11145_v39 = vsel %vm9757_vm13, 4294967295, %v11144_v39  ;;  %vm9771_vm15 = vmand %vm3806_vm4, %vm3871_vm7  ;;  %vm3821_vm7 = vcmp.ge.s32.totalorder %v3756_v51, %v9652_v41  ;;  %vm3886_vm4 = vcmp.lt.s32.totalorder %v3756_v51, %v9655_v55  ;;  %vm3874_vm13 = vcmp.lt.s32.totalorder %v9097_v58, %v9655_v55 }
 0x7f1   :  { %v11151_v34 = vsel %vm9771_vm15, 4294967295, %v11150_v34  ;;  %vm9792_vm15 = vmand %vm3838_vm1, %vm3903_vm5  ;;  %vm3807_vm5 = vcmp.ge.s32.totalorder %v9055_v46, %v9652_v41  ;;  %vm3872_vm1 = vcmp.lt.s32.totalorder %v9055_v46, %v9655_v55  ;;  %v3758_v46 = vadd.s32 288, %v8933_v43 }
 0x7f2   :  { %v11156_v13 = vsel %vm9792_vm15, 4294967295, %v11155_v13  ;;  %vm9811_vm15 = vmand %vm3821_vm7, %vm3886_vm4  ;;  %vm3840_vm4 = vcmp.ge.s32.totalorder %v3775_v40, %v9652_v41  ;;  %v11201_v51 = vmov 0  ;;  %v3761_v40 = vadd.s32 312, %v8933_v43 }
 0x7f3   :  { %v11162_v49 = vsel %vm9811_vm15, 4294967295, %v11161_v49  ;;  %vm9827_vm7 = vmand %vm3807_vm5, %vm3872_vm1  ;;  %vm3856_vm5 = vcmp.lt.s32.totalorder %v9076_v53, %v9655_v55  ;;  %v11183_v53 = vmov 0  ;;  %vm3793_vm15 = vcmp.ge.s32.totalorder %v9118_v62, %v9652_v41 }
 0x7f4   :  { %v11166_v19 = vsel %vm9827_vm7, 4294967295, %v11165_v19  ;;  %vm9844_vm1 = vmand %vm3839_vm6, %vm3904_vm8  ;;  %vm11182_vm6 = vcmp.ge.s32.totalorder %v9086_v54, %v9652_v41  ;;  %vm11218_vm9 = vnez %v11145_v39 }
 0x7f5   :  { %v11170_v1 = vsel %vm9844_vm1, 4294967295, %v11169_v1  ;;  %vm9853_vm14 = vmand %vm3840_vm4, %vm3905_vm11  ;;  %vm11181_vm4 = vcmp.lt.s32.totalorder %v9086_v54, %v9655_v55  ;;  %vm11185_vm11 = vcmp.lt.s32.totalorder %v3758_v46, %v9655_v55 }
 0x7f6   :  { %v11172_v14 = vsel %vm9853_vm14, 4294967295, %v11171_v14  ;;  %vm9875_vm8 = vmand %vm11175_vm3, %vm3856_vm5  ;;  %vm3889_vm14 = vcmp.lt.s32.totalorder %v3759_v48, %v9655_v55  ;;  %vm11186_vm5 = vcmp.ge.s32.totalorder %v3758_v46, %v9652_v41  ;;  %v3778_v46 = vadd.s32 448, %v8933_v43 }
 0x7f7   :  { %vm9897_vm12 = vmand %vm11182_vm6, %vm11181_vm4  ;;  %vm3875_vm4 = vcmp.lt.s32.totalorder %v9107_v59, %v9655_v55  ;;  %vm3858_vm6 = vcmp.lt.s32.totalorder %v9118_v62, %v9655_v55  ;;  %v11228_v48 = vmov 0 }
 0x7f8   :  { %v11184_v53 = vsel %vm9897_vm12, 4294967295, %v11183_v53  ;;  %vm9909_vm0 = vmand %vm11186_vm5, %vm11185_vm11  ;;  %vm3859_vm5 = vcmp.lt.s32.totalorder %v9128_v0, %v9655_v55 }
 0x7f9   :  { %v11188_v60 = vsel %vm9909_vm0, 4294967295, %v11187_v60  ;;  %vm9917_vm3 = vmand %vm3824_vm10, %vm3889_vm14  ;;  %vm3842_vm10 = vcmp.ge.s32.totalorder %v3777_v4, %v9652_v41  ;;  %vm3907_vm14 = vcmp.lt.s32.totalorder %v3777_v4, %v9655_v55  ;;  %vm3794_vm0 = vcmp.ge.s32.totalorder %v9128_v0, %v9652_v41 }
 0x7fa   :  { %v11190_v9 = vsel %vm9917_vm3, 4294967295, %v11189_v9  ;;  %vm9978_vm2 = vmand %vm3793_vm15, %vm3858_vm6  ;;  %v11209_v0 = vmov 0  ;;  %vm11214_vm6 = vnez %v11142_v37  ;;  %vm11217_vm3 = vnez %v11147_v18 }
 0x7fb   :  { %v11210_v0 = vsel %vm9978_vm2, 4294967295, %v11209_v0  ;;  %vm11219_vm11 = vmpackc.low %vm11217_vm3, %vm11218_vm9  ;;  %vm11224_vm9 = vnez %v11154_v63  ;;  %vm11233_vm2 = vnez %v11164_v42  ;;  %v3781_v4 = vadd.s32 472, %v8933_v43 }
 0x880   :  { %v3125_v8 = vpop.f32.mrb[26].mxu1 }
 0x881   :  { %v3133_v33 = vrot.slane %v3125_v8, %v8973_v6  ;;  %v3127_v17 = vpop.f32.mrb[27].mxu1  ;;  %v11211_v8 = vmov 0 }
 0x882   :  { %v3137_v45 = vrot.slane %v3127_v17, %v8973_v6  ;;  %v11226_v17 = vmov 0 }
 0x883   :  { %v3138_v61 = vmul.f32 %v3133_v33, %v9618_v3  ;;  %v3776_v3 = vadd.s32 432, %v8933_v43  ;;  %v3779_v33 = vadd.s32 456, %v8933_v43 }
 0x884   :  { %v3139_v26 = vmul.f32 %v3137_v45, %v9624_v57  ;;  %v3209_v12 = vpop.f32.mrb[28].mxu1  ;;  %v11176_v57 = vmov 0  ;;  %v11246_v45 = vmov 0 }
 0x885   :  { %v3217_v22 = vrot.slane %v3209_v12, %v8973_v6  ;;  %v3211_v25 = vpop.f32.mrb[29].mxu1  ;;  %v11177_v57 = vsel %vm9875_vm8, 4294967295, %v11176_v57  ;;  %vm3809_vm8 = vcmp.ge.s32.totalorder %v9097_v58, %v9652_v41  ;;  %vm3841_vm7 = vcmp.ge.s32.totalorder %v3776_v3, %v9652_v41 }
 0x886   :  { %v3221_v31 = vrot.slane %v3211_v25, %v8973_v6  ;;  %vm3906_vm12 = vcmp.lt.s32.totalorder %v3776_v3, %v9655_v55  ;;  %vm9931_vm1 = vmand %vm3809_vm8, %vm3874_vm13  ;;  %vm11198_vm13 = vcmp.ge.s32.totalorder %v9107_v59, %v9652_v41  ;;  %v3760_v59 = vadd.s32 304, %v8933_v43 }
 0x887   :  { %v3222_v35 = vadd.f32 %v3217_v22, %v3138_v61  ;;  %v11194_v21 = vsel %vm9931_vm1, 4294967295, %v11193_v21  ;;  %vm9948_vm8 = vmand %vm11198_vm13, %vm3875_vm4  ;;  %vm3843_vm13 = vcmp.ge.s32.totalorder %v3778_v46, %v9652_v41  ;;  %v11249_v61 = vmov 0 }
 0x888   :  { %v3223_v54 = vadd.f32 %v3221_v31, %v3139_v26  ;;  %v11200_v27 = vsel %vm9948_vm8, 4294967295, %v11199_v27  ;;  %vm9956_vm1 = vmand %vm3841_vm7, %vm3906_vm12  ;;  %vm3825_vm12 = vcmp.ge.s32.totalorder %v3760_v59, %v9652_v41  ;;  %vm3890_vm15 = vcmp.lt.s32.totalorder %v3760_v59, %v9655_v55  ;;  %v11281_v31 = vld [vmem:[#allocation22_spill] sm:$0xff] }
 0x889   :  { %v3224_v58 = vmax.f32 %v3222_v35, 0.0  ;;  %v11202_v51 = vsel %vm9956_vm1, 4294967295, %v11201_v51  ;;  %vm9965_vm4 = vmand %vm3842_vm10, %vm3907_vm14  ;;  %vm3826_vm14 = vcmp.ge.s32.totalorder %v3761_v40, %v9652_v41  ;;  %vm3891_vm8 = vcmp.lt.s32.totalorder %v3761_v40, %v9655_v55  ;;  %v11282_v35 = vld [vmem:[#allocation23_spill] sm:$0xff] }
 0x88a   :  { %v3225_v24 = vmax.f32 %v3223_v54, 0.0  ;;  %v11204_v10 = vsel %vm9965_vm4, 4294967295, %v11203_v10  ;;  %vm9982_vm10 = vmand %vm3794_vm0, %vm3859_vm5  ;;  %vm11215_vm0 = vnez %v11138_v47  ;;  %vm3811_vm1 = vcmp.ge.s32.totalorder %v9139_v2, %v9652_v41 }
 0x88b   :  { %v3226_v62 = vpack.c.bf16 %v3224_v58, %v3224_v58  ;;  %v11212_v8 = vsel %vm9982_vm10, 4294967295, %v11211_v8  ;;  %vm11216_vm5 = vmpackc.low %vm11214_vm6, %vm11215_vm0  ;;  %vm11221_vm0 = vnez %v11149_v38  ;;  %vm3876_vm4 = vcmp.lt.s32.totalorder %v9139_v2, %v9655_v55 }
 0x88c   :  { %v3227_v16 = vpack.c.bf16 %v3225_v24, %v3225_v24  ;;  %vm11234_vm10 = vnez %v11162_v49  ;;  %v11236_v2 = vmov 0  ;;  %vm11238_vm7 = vnez %v11168_v52 }
 0x88d   :  { %v3762_v26 = vadd.s32 320, %v8933_v43  ;;  %v3763_v12 = vadd.s32 328, %v8933_v43  ;;  %v11269_v3 = vmov 0  ;;  %v11272_v22 = vmov 0 }
 0x88e   :  { %3644 = vmatprep.mubr.bf16.mxu1 %v3227_v16  ;;  %3685 = vmatprep.mubr.bf16.mxu0 %v3227_v16  ;;  %v3780_v25 = vadd.s32 464, %v8933_v43  ;;  %v11283_v54 = vmov 0  ;;  %v11286_v58 = vmov 0  ;;  %v3764_v24 = vadd.s32 336, %v8933_v43  ;;  %v11292_v16 = vld [vmem:[#allocation24_spill] sm:$0xff] }
 0x88f   :  { %3645 = vmatmul.mubr.bf16.vlgmr.msra.gmra.mrb[32].mxu1 %v3226_v62  ;;  %3686 = vmatmul.mubr.bf16.vlgmr.msra.gmra.mrb[12].mxu0 %v3226_v62  ;;  %v11289_v59 = vmov 0  ;;  %v3765_v40 = vadd.s32 344, %v8933_v43  ;;  %v11293_v62 = vmov 0  ;;  %v3784_v6 = vadd.s32 496, %v8933_v43 }
 0x890   :  { %7640 = vmatpush3.bf16.msk.msra.mxu1 %vm11216_vm5, %v11094_v36  ;;  %7672 = vmatpush3.bf16.msk.msra.mxu0 %vm11219_vm11, %v11094_v36  ;;  %vm11220_vm5 = vnez %v11151_v34  ;;  %vm11223_vm11 = vnez %v11156_v13 }
 0x891   :  { %vm11222_vm6 = vmpackc.low %vm11220_vm5, %vm11221_vm0 }
 0x892   :  { %7642 = vmatprep.subr.msk.bf16.mxu1 %vm11222_vm6, %v11094_v36  ;;  %vm11225_vm3 = vmpackc.low %vm11223_vm11, %vm11224_vm9  ;;  %vm3812_vm6 = vcmp.ge.s32.totalorder %v9149_v5, %v9652_v41  ;;  %vm3908_vm11 = vcmp.lt.s32.totalorder %v3778_v46, %v9655_v55  ;;  %v11296_v46 = vld [vmem:[#allocation25_spill] sm:$0xff] }
 0x893   :  { %7674 = vmatprep.subr.msk.bf16.mxu0 %vm11225_vm3, %v11094_v36  ;;  %vm10032_vm0 = vmand %vm3825_vm12, %vm3890_vm15  ;;  %vm3877_vm3 = vcmp.lt.s32.totalorder %v9149_v5, %v9655_v55  ;;  %vm11230_vm12 = vnez %v11160_v11  ;;  %vm11231_vm15 = vnez %v11158_v44  ;;  %v11244_v5 = vmov 0 }
 0x894   :  { %v11227_v17 = vsel %vm10032_vm0, 4294967295, %v11226_v17  ;;  %vm10040_vm9 = vmand %vm3826_vm14, %vm3891_vm8  ;;  %vm3909_vm0 = vcmp.lt.s32.totalorder %v3779_v33, %v9655_v55 }
 0x895   :  { %v11229_v48 = vsel %vm10040_vm9, 4294967295, %v11228_v48  ;;  %vm11232_vm5 = vmpackc.low %vm11230_vm12, %vm11231_vm15  ;;  %vm3844_vm9 = vcmp.ge.s32.totalorder %v3779_v33, %v9652_v41  ;;  %vm11241_vm12 = vnez %v11172_v14  ;;  %v11297_v33 = vmov 0 }
 0x896   :  { %7644 = vmatpush3.bf16.msk.msra.mxu1 %vm11232_vm5, %v11094_v36  ;;  %vm11235_vm8 = vmpackc.low %vm11233_vm2, %vm11234_vm10  ;;  %vm11239_vm5 = vnez %v11166_v19 }
 0x897   :  { %7676 = vmatpush3.bf16.msk.msra.mxu0 %vm11235_vm8, %v11094_v36  ;;  %vm10058_vm14 = vmand %vm3811_vm1, %vm3876_vm4  ;;  %vm11242_vm8 = vnez %v11170_v1 }
 0x898   :  { %v11237_v2 = vsel %vm10058_vm14, 4294967295, %v11236_v2  ;;  %vm11240_vm15 = vmpackc.low %vm11238_vm7, %vm11239_vm5  ;;  %vm11252_vm5 = vnez %v11177_v57 }
 0x899   :  { %7646 = vmatprep.subr.msk.bf16.mxu1 %vm11240_vm15, %v11094_v36  ;;  %vm11243_vm1 = vmpackc.low %vm11241_vm12, %vm11242_vm8  ;;  %vm11251_vm15 = vnez %v11184_v53  ;;  %vm11260_vm8 = vnez %v11194_v21 }
 0x89a   :  { %7678 = vmatprep.subr.msk.bf16.mxu0 %vm11243_vm1, %v11094_v36  ;;  %vm10076_vm4 = vmand %vm3812_vm6, %vm3877_vm3  ;;  %vm11254_vm6 = vnez %v11190_v9  ;;  %vm11255_vm3 = vnez %v11188_v60  ;;  %vm11259_vm1 = vnez %v11200_v27 }
 0x89b   :  { %v11245_v5 = vsel %vm10076_vm4, 4294967295, %v11244_v5  ;;  %vm10080_vm10 = vmand %vm3843_vm13, %vm3908_vm11  ;;  %vm11257_vm11 = vnez %v11227_v17 }
 0x89c   :  { %v11247_v45 = vsel %vm10080_vm10, 4294967295, %v11246_v45  ;;  %vm10084_vm2 = vmand %vm3844_vm9, %vm3909_vm0  ;;  %vm11258_vm9 = vnez %v11229_v48 }
 0x89d   :  { %11248 = vst [vmem:[#allocation36_spill] sm:$0xff] %v11247_v45  ;;  %v11250_v61 = vsel %vm10084_vm2, 4294967295, %v11249_v61  ;;  %vm11253_vm7 = vmpackc.low %vm11251_vm15, %vm11252_vm5  ;;  %vm11263_vm5 = vnez %v11202_v51 }
 0x89e   :  { %7648 = vmatpush3.bf16.msk.msra.mxu1 %vm11253_vm7, %v11094_v36  ;;  %vm11256_vm13 = vmpackc.low %vm11254_vm6, %vm11255_vm3  ;;  %vm11262_vm7 = vnez %v11204_v10  ;;  %vm11266_vm3 = vnez %v11210_v0 }
 0x89f   :  { %7680 = vmatpush3.bf16.msk.msra.mxu0 %vm11256_vm13, %v11094_v36  ;;  %vm11261_vm12 = vmpackc.low %vm11259_vm1, %vm11260_vm8 }
 0x8a0   :  { %7650 = vmatprep.subr.msk.bf16.mxu1 %vm11261_vm12, %v11094_v36  ;;  %vm11264_vm15 = vmpackc.low %vm11262_vm7, %vm11263_vm5  ;;  %vm11265_vm12 = vnez %v11212_v8  ;;  %vm3895_vm5 = vcmp.lt.s32.totalorder %v3765_v40, %v9655_v55 }
 0x8a1   :  { %7682 = vmatprep.subr.msk.bf16.mxu0 %vm11264_vm15, %v11094_v36  ;;  %vm10949_vm13 = vmpackc.low %vm10076_vm4, %vm10058_vm14  ;;  %vm3828_vm14 = vcmp.ge.s32.totalorder %v3763_v12, %v9652_v41  ;;  %vm3893_vm4 = vcmp.lt.s32.totalorder %v3763_v12, %v9655_v55  ;;  %v3782_v12 = vadd.s32 480, %v8933_v43 }
 0x8a2   :  { %vm10952_vm0 = vmpackc.low %vm10084_vm2, %vm10080_vm10  ;;  %vm3892_vm10 = vcmp.lt.s32.totalorder %v3762_v26, %v9655_v55 }
 0x8a3   :  { %vm11267_vm6 = vmpackc.low %vm11265_vm12, %vm11266_vm3  ;;  %vm3830_vm12 = vcmp.ge.s32.totalorder %v3765_v40, %v9652_v41  ;;  %v11314_v40 = vmov 0 }
 0x8a4   :  { %7652 = vmatpush3.bf16.msk.msra.mxu1 %vm11267_vm6, %v11094_v36  ;;  %vm11268_vm15 = vmpackc.low %vm11258_vm9, %vm11257_vm11  ;;  %vm3795_vm6 = vcmp.ge.s32.totalorder %v9220_v7, %v9652_v41  ;;  %vm3861_vm11 = vcmp.lt.s32.totalorder %v9223_v15, %v9655_v55 }
 0x8a5   :  { %7684 = vmatpush3.bf16.msk.msra.mxu0 %vm11268_vm15, %v11094_v36  ;;  %7654 = vmatprep.subr.msk.bf16.mxu1 %vm10949_vm13, %v11094_v36  ;;  %vm3796_vm15 = vcmp.ge.s32.totalorder %v9223_v15, %v9652_v41  ;;  %vm3860_vm13 = vcmp.lt.s32.totalorder %v9220_v7, %v9655_v55  ;;  %v11275_v7 = vmov 0  ;;  %v11278_v15 = vmov 0 }
 0x8a6   :  { %7686 = vmatprep.subr.msk.bf16.mxu0 %vm10952_vm0, %v11094_v36  ;;  %vm10158_vm9 = vmand %vm3795_vm6, %vm3860_vm13  ;;  %vm3827_vm0 = vcmp.ge.s32.totalorder %v3762_v26, %v9652_v41  ;;  %v11300_v26 = vmov 0 }
 0x8a7   :  { %v11270_v3 = vsel %vm10158_vm9, 4294967295, %v11269_v3  ;;  %vm10164_vm2 = vmand %vm3796_vm15, %vm3861_vm11 }
 0x8a8   :  { %11271 = vst [vmem:[#allocation37_spill] sm:$0xff] %v11270_v3  ;;  %v11273_v22 = vsel %vm10164_vm2, 4294967295, %v11272_v22  ;;  %vm10957_vm13 = vmpackc.low %vm10164_vm2, %vm10158_vm9  ;;  %vm3845_vm9 = vcmp.ge.s32.totalorder %v3780_v25, %v9652_v41  ;;  %vm3911_vm2 = vcmp.lt.s32.totalorder %v3781_v4, %v9655_v55 }
 0x8a9   :  { %11274 = vst [vmem:[#allocation38_spill] sm:$0xff] %v11273_v22  ;;  %7656 = vmatpush3.bf16.msk.msra.mxu1 %vm10957_vm13, %v11094_v36  ;;  %vm10180_vm11 = vmand %vm3827_vm0, %vm3892_vm10  ;;  %vm3813_vm10 = vcmp.ge.s32.totalorder %v11281_v31, %v9652_v41  ;;  %vm3879_vm0 = vcmp.lt.s32.totalorder %v11282_v35, %v9655_v55 }
 0x8aa   :  { %v11276_v7 = vsel %vm10180_vm11, 4294967295, %v11275_v7  ;;  %vm10184_vm6 = vmand %vm3828_vm14, %vm3893_vm4  ;;  %vm3814_vm14 = vcmp.ge.s32.totalorder %v11282_v35, %v9652_v41  ;;  %vm3878_vm4 = vcmp.lt.s32.totalorder %v11281_v31, %v9655_v55  ;;  %v3783_v31 = vadd.s32 488, %v8933_v43 }
 0x8ab   :  { %11277 = vst [vmem:[#allocation39_spill] sm:$0xff] %v11276_v7  ;;  %v11279_v15 = vsel %vm10184_vm6, 4294967295, %v11278_v15  ;;  %vm10959_vm15 = vmpackc.low %vm10184_vm6, %vm10180_vm11  ;;  %vm3846_vm6 = vcmp.ge.s32.totalorder %v3781_v4, %v9652_v41  ;;  %v11306_v4 = vld [vmem:[#allocation26_spill] sm:$0xff]  ;;  %v11307_v35 = vmov 0 }
 0x8ac   :  { %11280 = vst [vmem:[#allocation40_spill] sm:$0xff] %v11279_v15  ;;  %7688 = vmatpush3.bf16.msk.msra.mxu0 %vm10959_vm15, %v11094_v36  ;;  %vm10208_vm13 = vmand %vm3813_vm10, %vm3878_vm4  ;;  %vm3910_vm15 = vcmp.lt.s32.totalorder %v3780_v25, %v9655_v55  ;;  %vm3797_vm4 = vcmp.ge.s32.totalorder %v11292_v16, %v9652_v41  ;;  %v11303_v25 = vmov 0 }
 0x8ad   :  { %v11284_v54 = vsel %vm10208_vm13, 4294967295, %v11283_v54  ;;  %vm10214_vm11 = vmand %vm3814_vm14, %vm3879_vm0  ;;  %vm3862_vm0 = vcmp.lt.s32.totalorder %v11292_v16, %v9655_v55  ;;  %v11311_v16 = vmov 0 }
 0x8ae   :  { %11285 = vst [vmem:[#allocation22_spill] sm:$0xff] %v11284_v54  ;;  %v11287_v58 = vsel %vm10214_vm11, 4294967295, %v11286_v58  ;;  %vm10964_vm10 = vmpackc.low %vm10214_vm11, %vm10208_vm13  ;;  %vm3798_vm13 = vcmp.ge.s32.totalorder %v11296_v46, %v9652_v41 }
 0x8af   :  { %11288 = vst [vmem:[#allocation23_spill] sm:$0xff] %v11287_v58  ;;  %7658 = vmatprep.subr.msk.bf16.mxu1 %vm10964_vm10, %v11094_v36  ;;  %vm10231_vm14 = vmand %vm3845_vm9, %vm3910_vm15  ;;  %vm3863_vm9 = vcmp.lt.s32.totalorder %v11296_v46, %v9655_v55  ;;  %vm3894_vm10 = vcmp.lt.s32.totalorder %v3764_v24, %v9655_v55  ;;  %v3766_v46 = vadd.s32 352, %v8933_v43 }
 0x8b0   :  { %v11290_v59 = vsel %vm10231_vm14, 4294967295, %v11289_v59  ;;  %vm10240_vm3 = vmand %vm3846_vm6, %vm3911_vm2  ;;  %vm3829_vm6 = vcmp.ge.s32.totalorder %v3764_v24, %v9652_v41  ;;  %v11310_v24 = vld [vmem:[#allocation27_spill] sm:$0xff] }
 0x8b1   :  { %11291 = vst [vmem:[#allocation41_spill] sm:$0xff] %v11290_v59  ;;  %v11294_v62 = vsel %vm10240_vm3, 4294967295, %v11293_v62  ;;  %vm10966_vm15 = vmpackc.low %vm10240_vm3, %vm10231_vm14  ;;  %vm3848_vm14 = vcmp.ge.s32.totalorder %v3783_v31, %v9652_v41  ;;  %vm3913_vm3 = vcmp.lt.s32.totalorder %v3783_v31, %v9655_v55  ;;  %v3767_v31 = vadd.s32 360, %v8933_v43 }
 0x8b2   :  { %11295 = vst [vmem:[#allocation24_spill] sm:$0xff] %v11294_v62  ;;  %7690 = vmatprep.subr.msk.bf16.mxu0 %vm10966_vm15, %v11094_v36  ;;  %vm10258_vm2 = vmand %vm3797_vm4, %vm3862_vm0  ;;  %vm3815_vm0 = vcmp.ge.s32.totalorder %v11306_v4, %v9652_v41 }
 0x8b3   :  { %v11298_v33 = vsel %vm10258_vm2, 4294967295, %v11297_v33  ;;  %vm10264_vm11 = vmand %vm3798_vm13, %vm3863_vm9  ;;  %vm3880_vm9 = vcmp.lt.s32.totalorder %v11306_v4, %v9655_v55  ;;  %v11320_v4 = vld [vmem:[#allocation28_spill] sm:$0xff] }
 0x8b4   :  { %11299 = vst [vmem:[#allocation25_spill] sm:$0xff] %v11298_v33  ;;  %v11301_v26 = vsel %vm10264_vm11, 4294967295, %v11300_v26  ;;  %vm10968_vm4 = vmpackc.low %vm10264_vm11, %vm10258_vm2  ;;  %vm3816_vm2 = vcmp.ge.s32.totalorder %v11310_v24, %v9652_v41 }
 0x8b5   :  { %11302 = vst [vmem:[#allocation42_spill] sm:$0xff] %v11301_v26  ;;  %7660 = vmatpush3.bf16.msk.msra.mxu1 %vm10968_vm4, %v11094_v36  ;;  %vm10281_vm13 = vmand %vm3829_vm6, %vm3894_vm10  ;;  %vm3881_vm10 = vcmp.lt.s32.totalorder %v11310_v24, %v9655_v55  ;;  %vm3912_vm4 = vcmp.lt.s32.totalorder %v3782_v12, %v9655_v55  ;;  %v11321_v24 = vmov 0 }
 0x8b6   :  { %v11304_v25 = vsel %vm10281_vm13, 4294967295, %v11303_v25  ;;  %vm10290_vm15 = vmand %vm3830_vm12, %vm3895_vm5  ;;  %vm3847_vm12 = vcmp.ge.s32.totalorder %v3782_v12, %v9652_v41  ;;  %v11317_v12 = vmov 0 }
 0x8b7   :  { %11305 = vst [vmem:[#allocation43_spill] sm:$0xff] %v11304_v25  ;;  %v11308_v35 = vsel %vm10290_vm15, 4294967295, %v11307_v35  ;;  %vm10972_vm6 = vmpackc.low %vm10290_vm15, %vm10281_vm13  ;;  %vm3800_vm13 = vcmp.ge.s32.totalorder %v11324_v50, %v9652_v41 }
 0x8b8   :  { %11309 = vst [vmem:[#allocation26_spill] sm:$0xff] %v11308_v35  ;;  %7692 = vmatpush3.bf16.msk.msra.mxu0 %vm10972_vm6, %v11094_v36  ;;  %vm10308_vm5 = vmand %vm3815_vm0, %vm3880_vm9  ;;  %vm3799_vm9 = vcmp.ge.s32.totalorder %v11320_v4, %v9652_v41 }
 0x8b9   :  { %v11312_v16 = vsel %vm10308_vm5, 4294967295, %v11311_v16  ;;  %vm10314_vm11 = vmand %vm3816_vm2, %vm3881_vm10  ;;  %vm3864_vm10 = vcmp.lt.s32.totalorder %v11320_v4, %v9655_v55  ;;  %v11325_v4 = vmov 0 }
 0x8ba   :  { %11313 = vst [vmem:[#allocation27_spill] sm:$0xff] %v11312_v16  ;;  %v11315_v40 = vsel %vm10314_vm11, 4294967295, %v11314_v40  ;;  %vm10976_vm0 = vmpackc.low %vm10314_vm11, %vm10308_vm5  ;;  %vm3832_vm5 = vcmp.ge.s32.totalorder %v3767_v31, %v9652_v41  ;;  %vm3897_vm11 = vcmp.lt.s32.totalorder %v3767_v31, %v9655_v55  ;;  %v11334_v31 = vld [vmem:[#allocation30_spill] sm:$0xff] }
 0x8bb   :  { %11316 = vst [vmem:[#allocation44_spill] sm:$0xff] %v11315_v40  ;;  %7662 = vmatprep.subr.msk.bf16.mxu1 %vm10976_vm0, %v11094_v36  ;;  %vm10331_vm2 = vmand %vm3847_vm12, %vm3912_vm4  ;;  %vm3865_vm4 = vcmp.lt.s32.totalorder %v11324_v50, %v9655_v55  ;;  %vm3896_vm0 = vcmp.lt.s32.totalorder %v3766_v46, %v9655_v55  ;;  %v11328_v50 = vmov 0  ;;  %v11449_v21 = vld [vmem:[#allocation25_spill] sm:$0xff] }
 0x8bc   :  { %v11318_v12 = vsel %vm10331_vm2, 4294967295, %v11317_v12  ;;  %vm10340_vm6 = vmand %vm3848_vm14, %vm3913_vm3  ;;  %vm3831_vm14 = vcmp.ge.s32.totalorder %v3766_v46, %v9652_v41  ;;  %v11331_v46 = vmov 0 }
 0x8bd   :  { %11319 = vst [vmem:[#allocation45_spill] sm:$0xff] %v11318_v12  ;;  %v11322_v24 = vsel %vm10340_vm6, 4294967295, %v11321_v24  ;;  %vm10984_vm12 = vmpackc.low %vm10340_vm6, %vm10331_vm2  ;;  %vm3850_vm2 = vcmp.ge.s32.totalorder %v3785_v30, %v9652_v41  ;;  %vm3915_vm6 = vcmp.lt.s32.totalorder %v3785_v30, %v9655_v55  ;;  %v11348_v30 = vld [vmem:[#allocation32_spill] sm:$0xff] }
 0x8be   :  { %11323 = vst [vmem:[#allocation28_spill] sm:$0xff] %v11322_v24  ;;  %7694 = vmatprep.subr.msk.bf16.mxu0 %vm10984_vm12, %v11094_v36  ;;  %vm10358_vm3 = vmand %vm3799_vm9, %vm3864_vm10  ;;  %vm3817_vm10 = vcmp.ge.s32.totalorder %v11334_v31, %v9652_v41 }
 0x8bf   :  { %v11326_v4 = vsel %vm10358_vm3, 4294967295, %v11325_v4  ;;  %vm10364_vm15 = vmand %vm3800_vm13, %vm3865_vm4  ;;  %vm3882_vm4 = vcmp.lt.s32.totalorder %v11334_v31, %v9655_v55  ;;  %v11339_v31 = vmov 0 }
 0x8c0   :  { %11327 = vst [vmem:[#allocation29_spill] sm:$0xff] %v11326_v4  ;;  %v11329_v50 = vsel %vm10364_vm15, 4294967295, %v11328_v50  ;;  %vm10989_vm9 = vmpackc.low %vm10364_vm15, %vm10358_vm3  ;;  %vm3818_vm3 = vcmp.ge.s32.totalorder %v11338_v28, %v9652_v41  ;;  %v11349_v4 = vmov 0 }
 0x8c1   :  { %11330 = vst [vmem:[#allocation46_spill] sm:$0xff] %v11329_v50  ;;  %7664 = vmatpush3.bf16.msk.msra.mxu1 %vm10989_vm9, %v11094_v36  ;;  %vm10381_vm13 = vmand %vm3831_vm14, %vm3896_vm0  ;;  %vm3883_vm0 = vcmp.lt.s32.totalorder %v11338_v28, %v9655_v55  ;;  %vm3914_vm9 = vcmp.lt.s32.totalorder %v3784_v6, %v9655_v55  ;;  %v11342_v28 = vmov 0  ;;  %v11454_v10 = vld [vmem:[#allocation27_spill] sm:$0xff] }
 0x8c2   :  { %v11332_v46 = vsel %vm10381_vm13, 4294967295, %v11331_v46  ;;  %vm10390_vm12 = vmand %vm3832_vm5, %vm3897_vm11  ;;  %vm3849_vm5 = vcmp.ge.s32.totalorder %v3784_v6, %v9652_v41  ;;  %v11345_v6 = vmov 0 }
 0x8c3   :  { %11333 = vst [vmem:[#allocation47_spill] sm:$0xff] %v11332_v46  ;;  %v11336_v23 = vsel %vm10390_vm12, 4294967295, %v11335_v23  ;;  %vm10995_vm14 = vmpackc.low %vm10390_vm12, %vm10381_vm13  ;;  %v3768_v46 = vadd.s32 368, %v8933_v43 }
 0x8c4   :  { %11337 = vst [vmem:[#allocation30_spill] sm:$0xff] %v11336_v23  ;;  %7696 = vmatpush3.bf16.msk.msra.mxu0 %vm10995_vm14, %v11094_v36  ;;  %vm10408_vm11 = vmand %vm3817_vm10, %vm3882_vm4  ;;  %vm3801_vm4 = vcmp.ge.s32.totalorder %v11348_v30, %v9652_v41  ;;  %v3769_v23 = vadd.s32 376, %v8933_v43 }
 0x8c5   :  { %v11340_v31 = vsel %vm10408_vm11, 4294967295, %v11339_v31  ;;  %vm10414_vm15 = vmand %vm3818_vm3, %vm3883_vm0  ;;  %vm3866_vm0 = vcmp.lt.s32.totalorder %v11348_v30, %v9655_v55  ;;  %v11353_v30 = vmov 0 }
 0x8c6   :  { %11341 = vst [vmem:[#allocation31_spill] sm:$0xff] %v11340_v31  ;;  %v11343_v28 = vsel %vm10414_vm15, 4294967295, %v11342_v28  ;;  %vm10999_vm10 = vmpackc.low %vm10414_vm15, %vm10408_vm11  ;;  %v11352_v31 = vld [vmem:[#allocation33_spill] sm:$0xff]  ;;  %vm3834_vm11 = vcmp.ge.s32.totalorder %v3769_v23, %v9652_v41  ;;  %vm3899_vm15 = vcmp.lt.s32.totalorder %v3769_v23, %v9655_v55 }
 0x8c7   :  { %11344 = vst [vmem:[#allocation48_spill] sm:$0xff] %v11343_v28  ;;  %7666 = vmatprep.subr.msk.bf16.mxu1 %vm10999_vm10, %v11094_v36  ;;  %vm10431_vm3 = vmand %vm3849_vm5, %vm3914_vm9  ;;  %vm3802_vm13 = vcmp.ge.s32.totalorder %v11352_v31, %v9652_v41  ;;  %vm3867_vm9 = vcmp.lt.s32.totalorder %v11352_v31, %v9655_v55  ;;  %vm3898_vm10 = vcmp.lt.s32.totalorder %v3768_v46, %v9655_v55  ;;  %v11356_v31 = vmov 0 }
 0x8c8   :  { %v11346_v6 = vsel %vm10431_vm3, 4294967295, %v11345_v6  ;;  %vm10440_vm14 = vmand %vm3850_vm2, %vm3915_vm6  ;;  %vm3833_vm2 = vcmp.ge.s32.totalorder %v3768_v46, %v9652_v41  ;;  %v11359_v46 = vmov 0  ;;  %v11362_v41 = vmov 0 }
 0x8c9   :  { %11347 = vst [vmem:[#allocation49_spill] sm:$0xff] %v11346_v6  ;;  %v11350_v4 = vsel %vm10440_vm14, 4294967295, %v11349_v4  ;;  %vm11003_vm5 = vmpackc.low %vm10440_vm14, %vm10431_vm3 }
 0x8ca   :  { %11351 = vst [vmem:[#allocation32_spill] sm:$0xff] %v11350_v4  ;;  %7698 = vmatprep.subr.msk.bf16.mxu0 %vm11003_vm5, %v11094_v36  ;;  %vm10458_vm6 = vmand %vm3801_vm4, %vm3866_vm0  ;;  %vm11366_vm5 = vnez %v11130_v56 }
 0x8cb   :  { %v11354_v30 = vsel %vm10458_vm6, 4294967295, %v11353_v30  ;;  %vm10464_vm12 = vmand %vm3802_vm13, %vm3867_vm9  ;;  %vm11365_vm9 = vnez %v11132_v20 }
 0x8cc   :  { %11355 = vst [vmem:[#allocation33_spill] sm:$0xff] %v11354_v30  ;;  %v11357_v31 = vsel %vm10464_vm12, 4294967295, %v11356_v31  ;;  %vm11005_vm4 = vmpackc.low %vm10464_vm12, %vm10458_vm6 }
 0x8cd   :  { %11358 = vst [vmem:[#allocation50_spill] sm:$0xff] %v11357_v31  ;;  %7668 = vmatpush3.bf16.msk.msra.mxu1 %vm11005_vm4, %v11094_v36  ;;  %vm10480_vm13 = vmand %vm3833_vm2, %vm3898_vm10 }
 0x8ce   :  { %v11360_v46 = vsel %vm10480_vm13, 4294967295, %v11359_v46  ;;  %vm10484_vm0 = vmand %vm3834_vm11, %vm3899_vm15  ;;  %vm11368_vm15 = vnez %v11136_v32  ;;  %vm11369_vm11 = vnez %v11134_v29 }
 0x8cf   :  { %11361 = vst [vmem:[#allocation51_spill] sm:$0xff] %v11360_v46  ;;  %v11363_v41 = vsel %vm10484_vm0, 4294967295, %v11362_v41  ;;  %vm11367_vm3 = vmpackc.low %vm11365_vm9, %vm11366_vm5 }
 0x8d0   :  { %11364 = vst [vmem:[#allocation52_spill] sm:$0xff] %v11363_v41  ;;  %7702 = vmatprep.subr.msk.bf16.mxu1 %vm11367_vm3, %v11094_v36  ;;  %vm11035_vm4 = vmpackc.low %vm10484_vm0, %vm10480_vm13  ;;  %vm11371_vm3 = vcmask 1041408  }
 0x8d1   :  { %7700 = vmatpush3.bf16.msk.msra.mxu0 %vm11035_vm4, %v11094_v36  ;;  %vm11370_vm10 = vmpackc.low %vm11368_vm15, %vm11369_vm11  ;;  %vm11386_vm4 = vnez %v11145_v39 }
 0x8d2   :  { %7734 = vmatprep.subr.msk.bf16.mxu0 %vm11370_vm10, %v11094_v36  ;;  %vm11372_vm5 = vmmov %vm11371_vm3  ;;  %vm11379_vm10 = vnez %v11142_v37 }
 0x8d3   :  { %vm11375_vm2 = vmmov %vm11371_vm3 }
 0x8d4   :  { %vm11376_vm9 = vmmov %vm11375_vm2 }
 0x8d5   :  { %vm11377_vm15 = vmmov %vm11375_vm2 }
 0x8d6   :  { %vm11378_vm11 = vmmov %vm11375_vm2 }
 0x962   :  { %v10510_v23 = vpop.f32.mrb[32].mxu1  ;;  %v10512_v55 = vpop.f32.mrb[12].mxu0 }
 0x963   :  { %v3694_v56 = vsel %vm11371_vm3, %v10510_v23, 0.0  ;;  %v3708_v20 = vsel %vm11372_vm5, %v10512_v55, 0.0  ;;  %v10518_v43 = vpop.f32.mrb[33].mxu1  ;;  %v10520_v46 = vpop.f32.mrb[13].mxu0  ;;  %vm11380_vm3 = vnez %v11138_v47  ;;  %v3724_v37 = vmul.f32 %v10512_v55, %v10512_v55 }
 0x964   :  { %11373 = vst [vmem:[#allocation53_spill] sm:$0xff] %v10518_v43  ;;  %11374 = vst [vmem:[#allocation54_spill] sm:$0xff] %v10520_v46  ;;  %v3695_v41 = vrot.slane %v3694_v56, 4  ;;  %v3709_v32 = vrot.slane %v3708_v20, 4  ;;  %v3701_v29 = vsel %vm11375_vm2, %v10518_v43, 0.0  ;;  %v3723_v30 = vmul.f32 %v10518_v43, %v10518_v43  ;;  %v3650_v31 = vpop.f32.mrb[34].mxu1 }
 0x965   :  { %v3691_v6 = vpop.f32.mrb[14].mxu0  ;;  %v3702_v4 = vrot.slane %v3701_v29, 4  ;;  %v3715_v28 = vsel %vm11376_vm9, %v10520_v46, 0.0  ;;  %v3651_v50 = vpop.f32.mrb[35].mxu1  ;;  %v3725_v33 = vmul.f32 %v10520_v46, %v10520_v46  ;;  %vm11381_vm5 = vmpackc.low %vm11379_vm10, %vm11380_vm3  ;;  %vm11382_vm2 = vnez %v11151_v34 }
 0x966   :  { %v3692_v12 = vpop.f32.mrb[15].mxu0  ;;  %v3696_v24 = vadd.f32 %v3695_v41, %v3694_v56  ;;  %v3710_v25 = vadd.f32 %v3709_v32, %v3708_v20  ;;  %v3733_v16 = vsel %vm11377_vm15, %v3723_v30, 0.0  ;;  %v3716_v40 = vrot.slane %v3715_v28, 4 }
 0x967   :  { %v3703_v35 = vadd.f32 %v3702_v4, %v3701_v29  ;;  %v3734_v31 = vrot.slane %v3733_v16, 4  ;;  %v3747_v62 = vsel %vm11378_vm11, %v3725_v33, 0.0  ;;  %vm11383_vm9 = vnez %v11149_v38 }
 0x968   :  { %v3697_v26 = vrot.slane %v3696_v24, 2  ;;  %v3711_v59 = vrot.slane %v3710_v25, 2  ;;  %v3717_v6 = vadd.f32 %v3716_v40, %v3715_v28  ;;  %v3748_v41 = vrot.slane %v3747_v62, 4  ;;  %vm11384_vm15 = vmpackc.low %vm11382_vm2, %vm11383_vm9 }
 0x969   :  { %v3704_v43 = vrot.slane %v3703_v35, 2  ;;  %v3735_v50 = vadd.f32 %v3734_v31, %v3733_v16  ;;  %vm11385_vm11 = vnez %v11147_v18  ;;  %vm11388_vm3 = vnez %v11156_v13  ;;  %v11492_v31 = vld [vmem:[#allocation51_spill] sm:$0xff] }
 0x96a   :  { %v3698_v7 = vadd.f32 %v3697_v26, %v3696_v24  ;;  %v3712_v15 = vadd.f32 %v3711_v59, %v3710_v25  ;;  %v3718_v12 = vrot.slane %v3717_v6, 2  ;;  %v3749_v20 = vadd.f32 %v3748_v41, %v3747_v62  ;;  %vm11387_vm10 = vmpackc.low %vm11385_vm11, %vm11386_vm4  ;;  %v11483_v25 = vld [vmem:[#allocation49_spill] sm:$0xff] }
 0x96b   :  { %v3705_v56 = vadd.f32 %v3704_v43, %v3703_v35  ;;  %v3736_v29 = vrot.slane %v3735_v50, 2  ;;  %vm11391_vm2 = vnez %v11160_v11  ;;  %vm11392_vm9 = vnez %v11158_v44  ;;  %v11424_v44 = vld [vmem:[#allocation36_spill] sm:$0xff]  ;;  %v11427_v11 = vld [vmem:[#allocation38_spill] sm:$0xff]  ;;  %v11487_v24 = vld [vmem:[#allocation33_spill] sm:$0xff] }
 0x96c   :  { %v3699_v4 = vrot.slane %v3698_v7, 1  ;;  %v3719_v32 = vadd.f32 %v3718_v12, %v3717_v6  ;;  %v3713_v54 = vrot.slane %v3712_v15, 1  ;;  %v3750_v22 = vrot.slane %v3749_v20, 2  ;;  %vm11393_vm4 = vmpackc.low %vm11391_vm2, %vm11392_vm9  ;;  %v11496_v12 = vld [vmem:[#allocation35_spill] sm:$0xff] }
 0x96d   :  { %v3706_v30 = vrot.slane %v3705_v56, 1  ;;  %v3737_v3 = vadd.f32 %v3736_v29, %v3735_v50  ;;  %vm11395_vm11 = vnez %v11166_v19  ;;  %vm11401_vm2 = vnez %v11172_v14  ;;  %v11432_v19 = vld [vmem:[#allocation23_spill] sm:$0xff] }
 0x96e   :  { %v3720_v58 = vrot.slane %v3719_v32, 1  ;;  %v3700_v45 = vadd.f32 %v3699_v4, %v3698_v7  ;;  %v3751_v26 = vadd.f32 %v3750_v22, %v3749_v20  ;;  %v3714_v59 = vadd.f32 %v3713_v54, %v3712_v15  ;;  %v11439_v14 = vld [vmem:[#allocation39_spill] sm:$0xff]  ;;  %v11477_v15 = vld [vmem:[#allocation30_spill] sm:$0xff] }
 0x96f   :  { %v3707_v46 = vadd.f32 %v3706_v30, %v3705_v56  ;;  %v3738_v33 = vrot.slane %v3737_v3, 1  ;;  %vm11402_vm9 = vnez %v11170_v1  ;;  %v11437_v1 = vld [vmem:[#allocation40_spill] sm:$0xff]  ;;  %v11474_v22 = vld [vmem:[#allocation31_spill] sm:$0xff]  ;;  %v11495_v50 = vmov 0.0   ;;  %v11497_v56 = vld [vmem:[#allocation18_spill] sm:$0xff] }
 0x970   :  { %v3721_v40 = vadd.f32 %v3720_v58, %v3719_v32  ;;  %v3752_v62 = vrot.slane %v3751_v26, 1  ;;  %v11479_v54 = vld [vmem:[#allocation47_spill] sm:$0xff]  ;;  %v4115_v41 = vmul.u32 64, %v11496_v12  ;;  %v4110_v4 = vmul.u32 64, %v11497_v56  ;;  %v11498_v20 = vld [vmem:[#allocation34_spill] sm:$0xff]  ;;  %v11499_v30 = vld [vmem:[#allocation21_spill] sm:$0xff] }
 0x971   :  { %4196 = vmatprep.mubr.f32.mxu1 %v3707_v46  ;;  %v3739_v43 = vadd.f32 %v3738_v33, %v3737_v3  ;;  %v11472_v3 = vld [vmem:[#allocation48_spill] sm:$0xff]  ;;  %v4109_v32 = vadd.s32 384, %v11499_v30  ;;  %v4108_v29 = vadd.s32 256, %v11499_v30  ;;  %v8343_v58 = vld [vmem:[#allocation8 + $0x98] ss:$24 sps:$4 sm:$0xff]  }
 0x972   :  { %4197 = vmatmul.mubr.f32.vlgmr.msra.gmra.mrb[30].mxu1 %v3700_v45  ;;  %4266 = vmatprep.mubr.f32.mxu0 %v3721_v40  ;;  %v3722_v45 = vmul.f32 %v10510_v23, %v10510_v23  ;;  %v3753_v47 = vadd.f32 %v3752_v62, %v3751_v26  ;;  %v11490_v46 = vld [vmem:[#allocation52_spill] sm:$0xff]  ;;  %v8354_v16 = vld [vmem:[#allocation8 + $0xf4] ss:$24 sps:$4 sm:$0xff]  }
 0x973   :  { %7704 = vmatpush3.bf16.msk.msra.mxu1 %vm11381_vm5, %v11094_v36  ;;  %4267 = vmatmul.mubr.f32.vlgmr.msra.gmra.mrb[10].mxu0 %v3714_v59  ;;  %vm11389_vm5 = vnez %v11154_v63  ;;  %v8324_v26 = vld [vmem:[#allocation8 + $0x4] ss:$24 sps:$4 sm:$0xff]   ;;  %v8378_v33 = vld [vmem:[#allocation8 + $0x1b4] ss:$24 sps:$4 sm:$0xff]  }
 0x974   :  { %7706 = vmatprep.subr.msk.bf16.mxu1 %vm11384_vm15, %v11094_v36  ;;  %7736 = vmatpush3.bf16.msk.msra.mxu0 %vm11387_vm10, %v11094_v36  ;;  %vm11390_vm13 = vmpackc.low %vm11388_vm3, %vm11389_vm5  ;;  %vm11394_vm15 = vnez %v11168_v52  ;;  %vm11397_vm3 = vcmask 1041408   ;;  %vm11399_vm5 = vnez %v11162_v49  ;;  %v11429_v49 = vld [vmem:[#allocation37_spill] sm:$0xff]  ;;  %v11434_v52 = vld [vmem:[#allocation22_spill] sm:$0xff] }
 0x975   :  { %4338 = vmatprep.mubr.f32.mxu1 %v3739_v43  ;;  %7738 = vmatprep.subr.msk.bf16.mxu0 %vm11390_vm13, %v11094_v36  ;;  %vm11396_vm10 = vmpackc.low %vm11394_vm15, %vm11395_vm11  ;;  %v3726_v39 = vsel %vm11397_vm3, %v3722_v45, 0.0  ;;  %vm11398_vm13 = vnez %v11164_v42  ;;  %vm11405_vm15 = vnez %v11184_v53  ;;  %vm11406_vm11 = vnez %v11177_v57  ;;  %v11442_v53 = vld [vmem:[#allocation24_spill] sm:$0xff] }
 0x976   :  { %4408 = vmatprep.mubr.f32.mxu0 %v3753_v47  ;;  %vm11400_vm0 = vmpackc.low %vm11398_vm13, %vm11399_vm5  ;;  %v3727_v38 = vrot.slane %v3726_v39, 4  ;;  %vm11412_vm5 = vnez %v11202_v51  ;;  %v11452_v51 = vld [vmem:[#allocation44_spill] sm:$0xff] }
 0x977   :  { %7708 = vmatpush3.bf16.msk.msra.mxu1 %vm11393_vm4, %v11094_v36  ;;  %vm11403_vm4 = vmpackc.low %vm11401_vm2, %vm11402_vm9  ;;  %vm11414_vm9 = vnez %v11212_v8  ;;  %v11459_v8 = vld [vmem:[#allocation43_spill] sm:$0xff]  ;;  %v8363_v12 = vld [vmem:[#allocation8 + $0x12c] ss:$24 sps:$4 sm:$0xff]  }
 0x978   :  { %7710 = vmatprep.subr.msk.bf16.mxu1 %vm11396_vm10, %v11094_v36  ;;  %7740 = vmatpush3.bf16.msk.msra.mxu0 %vm11400_vm0, %v11094_v36  ;;  %vm11404_vm6 = vmmov %vm11397_vm3  ;;  %vm11409_vm3 = vnez %v11190_v9  ;;  %v3728_v63 = vadd.f32 %v3727_v38, %v3726_v39  ;;  %v11447_v9 = vld [vmem:[#allocation42_spill] sm:$0xff] }
 0x979   :  { %7742 = vmatprep.subr.msk.bf16.mxu0 %vm11403_vm4, %v11094_v36  ;;  %v3740_v18 = vsel %vm11404_vm6, %v3724_v37, 0.0  ;;  %vm11407_vm10 = vmpackc.low %vm11405_vm15, %vm11406_vm11  ;;  %vm11410_vm6 = vnez %v11188_v60  ;;  %vm11417_vm4 = vnez %v11245_v5  ;;  %vm11418_vm15 = vnez %v11237_v2  ;;  %v11444_v60 = vld [vmem:[#allocation41_spill] sm:$0xff]  ;;  %v11467_v5 = vld [vmem:[#allocation46_spill] sm:$0xff] }
 0x97a   :  { %vm11408_vm0 = vmpackc.low %vm11259_vm1, %vm11260_vm8  ;;  %v3741_v34 = vrot.slane %v3740_v18, 4  ;;  %vm11415_vm8 = vnez %v11210_v0  ;;  %v3729_v42 = vrot.slane %v3728_v63, 2  ;;  %v11457_v0 = vld [vmem:[#allocation26_spill] sm:$0xff]  ;;  %v11464_v2 = vld [vmem:[#allocation45_spill] sm:$0xff] }
 0x97b   :  { %7712 = vmatpush3.bf16.msk.msra.mxu1 %vm11407_vm10, %v11094_v36  ;;  %vm11411_vm13 = vmpackc.low %vm11409_vm3, %vm11410_vm6  ;;  %vm11420_vm10 = vnez %v11229_v48  ;;  %vm11423_vm3 = vnez %v11250_v61  ;;  %vm11425_vm6 = vnez %v11424_v44  ;;  %v11462_v48 = vld [vmem:[#allocation28_spill] sm:$0xff]  ;;  %v11469_v61 = vld [vmem:[#allocation29_spill] sm:$0xff] }
 0x97c   :  { %7714 = vmatprep.subr.msk.bf16.mxu1 %vm11408_vm0, %v11094_v36  ;;  %7744 = vmatpush3.bf16.msk.msra.mxu0 %vm11411_vm13, %v11094_v36  ;;  %vm11413_vm2 = vmpackc.low %vm11262_vm7, %vm11412_vm5  ;;  %vm11421_vm7 = vnez %v11227_v17  ;;  %v3742_v13 = vadd.f32 %v3741_v34, %v3740_v18  ;;  %vm11428_vm5 = vnez %v11427_v11  ;;  %v3730_v27 = vadd.f32 %v3729_v42, %v3728_v63  ;;  %v8375_v40 = vld [vmem:[#allocation8 + $0x18c] ss:$24 sps:$4 sm:$0xff]  }
 0x97d   :  { %7746 = vmatprep.subr.msk.bf16.mxu0 %vm11413_vm2, %v11094_v36  ;;  %vm11416_vm1 = vmpackc.low %vm11414_vm9, %vm11415_vm8  ;;  %vm11430_vm2 = vnez %v11429_v49  ;;  %vm11433_vm8 = vnez %v11432_v19 }
 0x97e   :  { %vm11419_vm11 = vmpackc.low %vm11417_vm4, %vm11418_vm15  ;;  %vm11438_vm15 = vnez %v11437_v1  ;;  %v3743_v57 = vrot.slane %v3742_v13, 2  ;;  %v3731_v7 = vrot.slane %v3730_v27, 1 }
 0x97f   :  { %7716 = vmatpush3.bf16.msk.msra.mxu1 %vm11416_vm1, %v11094_v36  ;;  %vm11422_vm0 = vmpackc.low %vm11420_vm10, %vm11421_vm7  ;;  %vm11435_vm1 = vnez %v11434_v52  ;;  %vm11443_vm7 = vnez %v11442_v53 }
 0x980   :  { %7718 = vmatprep.subr.msk.bf16.mxu1 %vm11419_vm11, %v11094_v36  ;;  %7748 = vmatpush3.bf16.msk.msra.mxu0 %vm11422_vm0, %v11094_v36  ;;  %vm11426_vm13 = vmpackc.low %vm11423_vm3, %vm11425_vm6  ;;  %vm11440_vm11 = vnez %v11439_v14  ;;  %vm11445_vm0 = vnez %v11444_v60  ;;  %vm11448_vm6 = vnez %v11447_v9  ;;  %v3744_v17 = vadd.f32 %v3743_v57, %v3742_v13  ;;  %v4417_v14 = vld [vmem:[%s10841_s12] sm:$0x1] }
 0x981   :  { %7750 = vmatprep.subr.msk.bf16.mxu0 %vm11426_vm13, %v11094_v36  ;;  %vm11431_vm9 = vmpackc.low %vm11428_vm5, %vm11430_vm2  ;;  %vm11450_vm13 = vnez %v11449_v21  ;;  %vm11453_vm2 = vnez %v11452_v51  ;;  %v3732_v28 = vadd.f32 %v3731_v7, %v3730_v27  ;;  %v4421_v60 = vld [vmem:[%s10842_s13] sm:$0x1]  ;;  %v8327_v51 = vld [vmem:[#allocation8 + $0xc] ss:$24 sps:$4 sm:$0xff]  }
 0x982   :  { %vm11436_vm4 = vmpackc.low %vm11433_vm8, %vm11435_vm1  ;;  %vm11458_vm1 = vnez %v11457_v0  ;;  %v3745_v35 = vrot.slane %v3744_v17, 1  ;;  %v8322_v27 = vld [vmem:[#allocation8] ss:$24 sps:$4 sm:$0xff]   ;;  %v8340_v7 = vld [vmem:[#allocation8 + $0x90] ss:$24 sps:$4 sm:$0xff]  }
 0x983   :  { %7720 = vmatpush3.bf16.msk.msra.mxu1 %vm11431_vm9, %v11094_v36  ;;  %vm11441_vm10 = vmpackc.low %vm11438_vm15, %vm11440_vm11  ;;  %vm11455_vm9 = vnez %v11454_v10  ;;  %vm11463_vm11 = vnez %v11462_v48  ;;  %v8330_v10 = vld [vmem:[#allocation8 + $0x34] ss:$24 sps:$4 sm:$0xff]   ;;  %v8325_v0 = vld [vmem:[#allocation8 + $0x8] ss:$24 sps:$4 sm:$0xff]  }
 0x984   :  { %7722 = vmatprep.subr.msk.bf16.mxu1 %vm11436_vm4, %v11094_v36  ;;  %7752 = vmatpush3.bf16.msk.msra.mxu0 %vm11441_vm10, %v11094_v36  ;;  %vm11446_vm3 = vmpackc.low %vm11443_vm7, %vm11445_vm0  ;;  %vm11460_vm4 = vnez %v11459_v8  ;;  %vm11465_vm10 = vnez %v11464_v2  ;;  %vm11468_vm0 = vnez %v11467_v5  ;;  %v3746_v6 = vadd.f32 %v3745_v35, %v3744_v17  ;;  %v8328_v8 = vld [vmem:[#allocation8 + $0x30] ss:$24 sps:$4 sm:$0xff]   ;;  %v8333_v17 = vld [vmem:[#allocation8 + $0x3c] ss:$24 sps:$4 sm:$0xff]  }
 0x985   :  { %7754 = vmatprep.subr.msk.bf16.mxu0 %vm11446_vm3, %v11094_v36  ;;  %vm11451_vm5 = vmpackc.low %vm11448_vm6, %vm11450_vm13  ;;  %vm11470_vm3 = vnez %v11469_v61  ;;  %vm11473_vm13 = vnez %v11472_v3  ;;  %v8336_v48 = vld [vmem:[#allocation8 + $0x64] ss:$24 sps:$4 sm:$0xff]   ;;  %v8331_v2 = vld [vmem:[#allocation8 + $0x38] ss:$24 sps:$4 sm:$0xff]  }
 0x986   :  { %vm11456_vm8 = vmpackc.low %vm11453_vm2, %vm11455_vm9  ;;  %vm11478_vm9 = vnez %v11477_v15  ;;  %v8334_v5 = vld [vmem:[#allocation8 + $0x60] ss:$24 sps:$4 sm:$0xff]   ;;  %v8339_v61 = vld [vmem:[#allocation8 + $0x6c] ss:$24 sps:$4 sm:$0xff]  }
 0x987   :  { %7724 = vmatpush3.bf16.msk.msra.mxu1 %vm11451_vm5, %v11094_v36  ;;  %vm11461_vm15 = vmpackc.low %vm11458_vm1, %vm11460_vm4  ;;  %vm11475_vm5 = vnez %v11474_v22  ;;  %vm11484_vm4 = vnez %v11483_v25  ;;  %v8342_v3 = vld [vmem:[#allocation8 + $0x94] ss:$24 sps:$4 sm:$0xff]   ;;  %v8337_v22 = vld [vmem:[#allocation8 + $0x68] ss:$24 sps:$4 sm:$0xff]  }
 0x988   :  { %7726 = vmatprep.subr.msk.bf16.mxu1 %vm11456_vm8, %v11094_v36  ;;  %7756 = vmatpush3.bf16.msk.msra.mxu0 %vm11461_vm15, %v11094_v36  ;;  %vm11466_vm7 = vmpackc.low %vm11463_vm11, %vm11465_vm10  ;;  %vm11480_vm8 = vnez %v11479_v54  ;;  %vm11488_vm11 = vnez %v11487_v24  ;;  %v8345_v15 = vld [vmem:[#allocation8 + $0x9c] ss:$24 sps:$4 sm:$0xff]   ;;  %v8346_v25 = vld [vmem:[#allocation8 + $0xc0] ss:$24 sps:$4 sm:$0xff]  }
 0x989   :  { %7758 = vmatprep.subr.msk.bf16.mxu0 %vm11466_vm7, %v11094_v36  ;;  %vm11471_vm6 = vmpackc.low %vm11468_vm0, %vm11470_vm3  ;;  %vm11491_vm7 = vnez %v11490_v46  ;;  %vm11493_vm0 = vnez %v11492_v31  ;;  %v8348_v54 = vld [vmem:[#allocation8 + $0xc4] ss:$24 sps:$4 sm:$0xff]   ;;  %v8349_v24 = vld [vmem:[#allocation8 + $0xc8] ss:$24 sps:$4 sm:$0xff]  }
 0x98a   :  { %vm11476_vm2 = vmpackc.low %vm11473_vm13, %vm11475_vm5  ;;  %vm4111_vm13 = vcmp.ge.s32.totalorder %v11499_v30, %v4110_v4  ;;  %v8351_v35 = vld [vmem:[#allocation8 + $0xcc] ss:$24 sps:$4 sm:$0xff]   ;;  %v8357_v46 = vld [vmem:[#allocation8 + $0xfc] ss:$24 sps:$4 sm:$0xff]  }
 0x98b   :  { %7728 = vmatpush3.bf16.msk.msra.mxu1 %vm11471_vm6, %v11094_v36  ;;  %vm11481_vm1 = vmpackc.low %vm11478_vm9, %vm11480_vm8  ;;  %vm4112_vm6 = vcmp.ge.s32.totalorder %v11498_v20, %v4110_v4  ;;  %vm4114_vm9 = vcmp.ge.s32.totalorder %v4109_v32, %v4110_v4  ;;  %vm4119_vm8 = vcmp.lt.s32.totalorder %v4109_v32, %v4115_v41  ;;  %v8360_v31 = vld [vmem:[#allocation8 + $0x124] ss:$24 sps:$4 sm:$0xff]   ;;  %v8367_v32 = vld [vmem:[#allocation8 + $0x158] ss:$24 sps:$4 sm:$0xff]  }
 0x98c   :  { %7730 = vmatprep.subr.msk.bf16.mxu1 %vm11476_vm2, %v11094_v36  ;;  %7760 = vmatpush3.bf16.msk.msra.mxu0 %vm11481_vm1, %v11094_v36  ;;  %vm11485_vm15 = vmpackc.low %vm10440_vm14, %vm11484_vm4  ;;  %vm4116_vm14 = vcmp.lt.s32.totalorder %v11499_v30, %v4115_v41  ;;  %vm4113_vm4 = vcmp.ge.s32.totalorder %v4108_v29, %v4110_v4  ;;  %v8361_v4 = vld [vmem:[#allocation8 + $0x128] ss:$24 sps:$4 sm:$0xff]   ;;  %v8369_v30 = vld [vmem:[#allocation8 + $0x15c] ss:$24 sps:$4 sm:$0xff]  }
 0x98d   :  { %7762 = vmatprep.subr.msk.bf16.mxu0 %vm11485_vm15, %v11094_v36  ;;  %vm11489_vm10 = vmpackc.low %vm10464_vm12, %vm11488_vm11  ;;  %vm4117_vm12 = vcmp.lt.s32.totalorder %v11498_v20, %v4115_v41  ;;  %vm4118_vm15 = vcmp.lt.s32.totalorder %v4108_v29, %v4115_v41  ;;  %v8366_v41 = vld [vmem:[#allocation8 + $0x154] ss:$24 sps:$4 sm:$0xff]   ;;  %v8364_v20 = vld [vmem:[#allocation8 + $0x150] ss:$24 sps:$4 sm:$0xff]  }
 0x98e   :  { %vm11494_vm3 = vmpackc.low %vm11491_vm7, %vm11493_vm0  ;;  %v8370_v29 = vld [vmem:[#allocation8 + $0x180] ss:$24 sps:$4 sm:$0xff]  }
 0x98f   :  { %7732 = vmatpush3.bf16.msk.msra.mxu1 %vm11489_vm10, %v11094_v36  ;;  %vm4121_vm5 = vmand %vm4112_vm6, %vm4117_vm12  ;;  %vm4424_vm10 = vcmask 64512  }
 0x990   :  { %7764 = vmatpush3.bf16.msk.msra.mxu0 %vm11494_vm3, %v11094_v36  ;;  %v8784_v36 = vmov 1.0   ;;  %vm4120_vm2 = vmand %vm4111_vm13, %vm4116_vm14 }
 0x991   :  { %6986 = vmatprep.subr.msk.mxu1 %vm4121_vm5, %v8784_v36  ;;  %6992 = vmatprep.subr.msk.mxu0 %vm4121_vm5, %v8784_v36  ;;  %vm10728_vm1 = vmand %vm4114_vm9, %vm4119_vm8 }
 0x992   :  { %4339 = vmatmul.mubr.f32.vlgmr.msra.gmra.mrb[36].mxu1 %v3732_v28  ;;  %vm10734_vm11 = vmand %vm4113_vm4, %vm4118_vm15  ;;  %v8352_v28 = vld [vmem:[#allocation8 + $0xf0] ss:$24 sps:$4 sm:$0xff]  }
 0x993   :  { %4492 = vmatprep.mubr.f32.mxu1 %v11495_v50  ;;  %4409 = vmatmul.mubr.f32.vlgmr.msra.gmra.mrb[16].mxu0 %v3746_v6  ;;  %v8355_v6 = vld [vmem:[#allocation8 + $0xf8] ss:$24 sps:$4 sm:$0xff]  }
 0x994   :  { %4657 = vmatprep.mubr.f32.mxu0 %v11495_v50  ;;  %6987 = vmatpush1.msk.msra.mxu1 %vm4120_vm2, %v8784_v36 }
 0x995   :  { %6993 = vmatpush1.msk.msra.mxu0 %vm4120_vm2, %v8784_v36  ;;  %6989 = vmatprep.subr.msk.mxu1 %vm10728_vm1, %v8784_v36 }
 0x996   :  { %5947 = vmatprep.subr.bf16.mxu0 %v8324_v26  ;;  %v8373_v26 = vld [vmem:[#allocation8 + $0x188] ss:$24 sps:$4 sm:$0xff]  }
 0xa45   :  { %v7385_v59 = vpop.f32.mrb[30].mxu1 }
 0xa46   :  { %v7386_v43 = vpop.f32.mrb[31].mxu1  ;;  %v7420_v62 = vpop.f32.mrb[10].mxu0 }
 0xa47   :  { %v7387_v45 = vadd.f32 %v7386_v43, %v7385_v59  ;;  %v7421_v47 = vpop.f32.mrb[11].mxu0  ;;  %v8376_v59 = vld [vmem:[#allocation8 + $0x1b0] ss:$24 sps:$4 sm:$0xff]   ;;  %v8381_v43 = vld [vmem:[#allocation8 + $0x1bc] ss:$24 sps:$4 sm:$0xff]  }
 0xa48   :  { %v7422_v37 = vadd.f32 %v7421_v47, %v7420_v62  ;;  %v8384_v62 = vld [vmem:[#allocation8 + $0x1e4] ss:$24 sps:$4 sm:$0xff]   ;;  %v8382_v47 = vld [vmem:[#allocation8 + $0x1e0] ss:$24 sps:$4 sm:$0xff]  }
 0xa4a   :  { %v4269_v39 = vadd.f32 %v7422_v37, %v7387_v45  ;;  %v8379_v45 = vld [vmem:[#allocation8 + $0x1b8] ss:$24 sps:$4 sm:$0xff]   ;;  %v8387_v37 = vld [vmem:[#allocation8 + $0x1ec] ss:$24 sps:$4 sm:$0xff]  }
 0xa4c   :  { %v4273_v44 = vmul.f32 0.0078125, %v4269_v39  ;;  %v8390_v39 = vld [vmem:[#allocation8 + $0x214] ss:$24 sps:$4 sm:$0xff]  }
 0xa4e   :  { %v4415_v42 = vmul.f32 %v4273_v44, %v4273_v44 }
 0xa65   :  { %v7455_v18 = vpop.f32.mrb[36].mxu1 }
 0xa66   :  { %v7456_v38 = vpop.f32.mrb[37].mxu1  ;;  %v7490_v34 = vpop.f32.mrb[16].mxu0 }
 0xa67   :  { %v7457_v63 = vadd.f32 %v7456_v38, %v7455_v18  ;;  %v7491_v13 = vpop.f32.mrb[17].mxu0  ;;  %v8385_v18 = vld [vmem:[#allocation8 + $0x1e8] ss:$24 sps:$4 sm:$0xff]  }
 0xa68   :  { %v7492_v11 = vadd.f32 %v7491_v13, %v7490_v34  ;;  %v8388_v38 = vld [vmem:[#allocation8 + $0x210] ss:$24 sps:$4 sm:$0xff]   ;;  %v8393_v34 = vld [vmem:[#allocation8 + $0x21c] ss:$24 sps:$4 sm:$0xff]  }
 0xa69   :  { %v8391_v13 = vld [vmem:[#allocation8 + $0x218] ss:$24 sps:$4 sm:$0xff]  }
 0xa6a   :  { %v4411_v49 = vadd.f32 %v7492_v11, %v7457_v63  ;;  %v8396_v63 = vld [vmem:[#allocation8 + $0x244] ss:$24 sps:$4 sm:$0xff]  }
 0xa6b   :  { %v8399_v11 = vld [vmem:[#allocation8 + $0x24c] ss:$24 sps:$4 sm:$0xff]  }
 0xa6c   :  { %v4414_v19 = vmul.f32 0.0078125, %v4411_v49  ;;  %v8397_v49 = vld [vmem:[#allocation8 + $0x248] ss:$24 sps:$4 sm:$0xff]  }
 0xa6e   :  { %v4416_v52 = vsub.f32 %v4414_v19, %v4415_v42  ;;  %v8402_v42 = vld [vmem:[#allocation8 + $0x274] ss:$24 sps:$4 sm:$0xff]  }
 0xa6f   :  { %v8405_v19 = vld [vmem:[#allocation8 + $0x27c] ss:$24 sps:$4 sm:$0xff]  }
 0xa70   :  { %v4418_v1 = vadd.f32 1e-05, %v4416_v52  ;;  %v8400_v52 = vld [vmem:[#allocation8 + $0x270] ss:$24 sps:$4 sm:$0xff]  }
 0xa72   :  { %8614 = vrsqrt.f32 %v4418_v1  ;;  %v8403_v1 = vld [vmem:[#allocation8 + $0x278] ss:$24 sps:$4 sm:$0xff]  }
 0xa7c   :  { %v8615_v57 = vpop.eup %8614 }
 0xa7d   :  { %v4420_v53 = vmul.f32 %v8615_v57, %v4417_v14  ;;  %v8408_v14 = vld [vmem:[#allocation8 + $0x2a4] ss:$24 sps:$4 sm:$0xff]  }
 0xa7e   :  { %v8411_v57 = vld [vmem:[#allocation8 + $0x2ac] ss:$24 sps:$4 sm:$0xff]  }
 0xa7f   :  { %6988 = vmatmul.mubr.msk.f32.vlgmr.msra.gmra.mrb[38].mxu1 %vm4424_vm10, %v4420_v53  ;;  %v4422_v9 = vmul.f32 %v4420_v53, %v4273_v44  ;;  %v8394_v44 = vld [vmem:[#allocation8 + $0x240] ss:$24 sps:$4 sm:$0xff]  }
 0xa80   :  { %6990 = vmatpush1.msk.msra.mxu1 %vm10734_vm11, %v8784_v36  ;;  %4563 = vmatprep.mubr.f32.mxu1 %v11495_v50 }
 0xa81   :  { %v4423_v21 = vsub.f32 %v4421_v60, %v4422_v9  ;;  %6995 = vmatprep.subr.msk.mxu1 %vm10728_vm1, %v8784_v36  ;;  %v8409_v60 = vld [vmem:[#allocation8 + $0x2a8] ss:$24 sps:$4 sm:$0xff]   ;;  %v8414_v9 = vld [vmem:[#allocation8 + $0x2d4] ss:$24 sps:$4 sm:$0xff]  }
 0xa83   :  { %6991 = vmatmul.mubr.msk.f32.vlgmr.msra.gmra.mrb[40].mxu1 %vm4424_vm10, %v4420_v53  ;;  %6994 = vmatmul.mubr.msk.f32.vlgmr.msra.gmra.mrb[18].mxu0 %vm4424_vm10, %v4423_v21  ;;  %v8406_v53 = vld [vmem:[#allocation8 + $0x2a0] ss:$24 sps:$4 sm:$0xff]  }
 0xa84   :  { %6996 = vmatpush1.msk.msra.mxu1 %vm10734_vm11, %v8784_v36  ;;  %4728 = vmatprep.mubr.f32.mxu1 %v11495_v50  ;;  %v8358_v50 = vld [vmem:[#allocation8 + $0x120] ss:$24 sps:$4 sm:$0xff]   ;;  %v8372_v36 = vld [vmem:[#allocation8 + $0x184] ss:$24 sps:$4 sm:$0xff]  }
 0xa85   :  { %6029 = vmatprep.subr.bf16.mxu1 %v8327_v51  ;;  %5948 = vmatpush1.bf16.msra.mxu0 %v8322_v27  ;;  %v8412_v27 = vld [vmem:[#allocation8 + $0x2d0] ss:$24 sps:$4 sm:$0xff]  }
 0xa86   :  { %5949 = vmatprep.subr.bf16.mxu0 %v8330_v10  ;;  %v8415_v51 = vld [vmem:[#allocation8 + $0x2d8] ss:$24 sps:$4 sm:$0xff]   ;;  %v8420_v10 = vld [vmem:[#allocation8 + $0x304] ss:$24 sps:$4 sm:$0xff]  }
 0xa87   :  { %6997 = vmatmul.mubr.msk.f32.vlgmr.msra.gmra.mrb[42].mxu1 %vm4424_vm10, %v4423_v21  ;;  %v8417_v21 = vld [vmem:[#allocation8 + $0x2dc] ss:$24 sps:$4 sm:$0xff]  }
 0xa88   :  { %6030 = vmatpush1.bf16.msra.mxu1 %v8325_v0  ;;  %v8423_v0 = vld [vmem:[#allocation8 + $0x30c] ss:$24 sps:$4 sm:$0xff]  }
 0xa89   :  { %6031 = vmatprep.subr.bf16.mxu1 %v8333_v17  ;;  %5950 = vmatpush1.bf16.msra.mxu0 %v8328_v8  ;;  %v11504_v17 = vld [vmem:[#allocation20_spill] sm:$0xff] }
 0xa8a   :  { %5951 = vmatprep.subr.bf16.mxu0 %v8336_v48 }
 0xa8c   :  { %6032 = vmatpush1.bf16.msra.mxu1 %v8331_v2 }
 0xa8d   :  { %6033 = vmatprep.subr.bf16.mxu1 %v8339_v61  ;;  %5952 = vmatpush1.bf16.msra.mxu0 %v8334_v5 }
 0xa8e   :  { %5953 = vmatprep.subr.bf16.mxu0 %v8342_v3  ;;  %v11505_v3 = vld [vmem:[#allocation53_spill] sm:$0xff] }
 0xa90   :  { %6034 = vmatpush1.bf16.msra.mxu1 %v8337_v22 }
 0xa91   :  { %6035 = vmatprep.subr.bf16.mxu1 %v8345_v15  ;;  %5954 = vmatpush1.bf16.msra.mxu0 %v8340_v7 }
 0xa92   :  { %5955 = vmatprep.subr.bf16.mxu0 %v8348_v54 }
 0xa94   :  { %6036 = vmatpush1.bf16.msra.mxu1 %v8343_v58 }
 0xa95   :  { %6037 = vmatprep.subr.bf16.mxu1 %v8351_v35  ;;  %5956 = vmatpush1.bf16.msra.mxu0 %v8346_v25 }
 0xa96   :  { %5957 = vmatprep.subr.bf16.mxu0 %v8354_v16 }
 0xa98   :  { %6038 = vmatpush1.bf16.msra.mxu1 %v8349_v24 }
 0xa99   :  { %6039 = vmatprep.subr.bf16.mxu1 %v8357_v46  ;;  %5958 = vmatpush1.bf16.msra.mxu0 %v8352_v28 }
 0xa9a   :  { %5959 = vmatprep.subr.bf16.mxu0 %v8360_v31  ;;  %v11506_v31 = vld [vmem:[#allocation54_spill] sm:$0xff] }
 0xa9c   :  { %6040 = vmatpush1.bf16.msra.mxu1 %v8355_v6 }
 0xa9d   :  { %6041 = vmatprep.subr.bf16.mxu1 %v8363_v12  ;;  %5960 = vmatpush1.bf16.msra.mxu0 %v8358_v50 }
 0xa9e   :  { %5961 = vmatprep.subr.bf16.mxu0 %v8366_v41 }
 0xaa0   :  { %6042 = vmatpush1.bf16.msra.mxu1 %v8361_v4 }
 0xaa1   :  { %6043 = vmatprep.subr.bf16.mxu1 %v8369_v30  ;;  %5962 = vmatpush1.bf16.msra.mxu0 %v8364_v20 }
 0xaa2   :  { %5963 = vmatprep.subr.bf16.mxu0 %v8372_v36 }
 0xaa4   :  { %6044 = vmatpush1.bf16.msra.mxu1 %v8367_v32 }
 0xaa5   :  { %6045 = vmatprep.subr.bf16.mxu1 %v8375_v40  ;;  %5964 = vmatpush1.bf16.msra.mxu0 %v8370_v29  ;;  %v8418_v40 = vld [vmem:[#allocation8 + $0x300] ss:$24 sps:$4 sm:$0xff]  }
 0xaa6   :  { %5965 = vmatprep.subr.bf16.mxu0 %v8378_v33  ;;  %v8421_v33 = vld [vmem:[#allocation8 + $0x308] ss:$24 sps:$4 sm:$0xff]  }
 0xaa8   :  { %6046 = vmatpush1.bf16.msra.mxu1 %v8373_v26  ;;  %v8426_v26 = vld [vmem:[#allocation8 + $0x334] ss:$24 sps:$4 sm:$0xff]  }
 0xaa9   :  { %6047 = vmatprep.subr.bf16.mxu1 %v8381_v43  ;;  %5966 = vmatpush1.bf16.msra.mxu0 %v8376_v59  ;;  %v8429_v59 = vld [vmem:[#allocation8 + $0x33c] ss:$24 sps:$4 sm:$0xff]  }
 0xaaa   :  { %5967 = vmatprep.subr.bf16.mxu0 %v8384_v62 }
 0xaac   :  { %6048 = vmatpush1.bf16.msra.mxu1 %v8379_v45  ;;  %v8424_v45 = vld [vmem:[#allocation8 + $0x330] ss:$24 sps:$4 sm:$0xff]  }
 0xaad   :  { %6049 = vmatprep.subr.bf16.mxu1 %v8387_v37  ;;  %5968 = vmatpush1.bf16.msra.mxu0 %v8382_v47  ;;  %v8427_v47 = vld [vmem:[#allocation8 + $0x338] ss:$24 sps:$4 sm:$0xff]   ;;  %v8432_v37 = vld [vmem:[#allocation8 + $0x364] ss:$24 sps:$4 sm:$0xff]  }
 0xaae   :  { %5969 = vmatprep.subr.bf16.mxu0 %v8390_v39  ;;  %v8435_v39 = vld [vmem:[#allocation8 + $0x36c] ss:$24 sps:$4 sm:$0xff]  }
 0xab0   :  { %6050 = vmatpush1.bf16.msra.mxu1 %v8385_v18  ;;  %v8430_v18 = vld [vmem:[#allocation8 + $0x360] ss:$24 sps:$4 sm:$0xff]  }
 0xab1   :  { %6051 = vmatprep.subr.bf16.mxu1 %v8393_v34  ;;  %5970 = vmatpush1.bf16.msra.mxu0 %v8388_v38  ;;  %v8433_v38 = vld [vmem:[#allocation8 + $0x368] ss:$24 sps:$4 sm:$0xff]   ;;  %v8438_v34 = vld [vmem:[#allocation8 + $0x394] ss:$24 sps:$4 sm:$0xff]  }
 0xab2   :  { %5971 = vmatprep.subr.bf16.mxu0 %v8396_v63  ;;  %v8441_v63 = vld [vmem:[#allocation8 + $0x39c] ss:$24 sps:$4 sm:$0xff]  }
 0xab4   :  { %6052 = vmatpush1.bf16.msra.mxu1 %v8391_v13  ;;  %v8436_v13 = vld [vmem:[#allocation8 + $0x390] ss:$24 sps:$4 sm:$0xff]  }
 0xab5   :  { %6053 = vmatprep.subr.bf16.mxu1 %v8399_v11  ;;  %5972 = vmatpush1.bf16.msra.mxu0 %v8394_v44  ;;  %v8439_v44 = vld [vmem:[#allocation8 + $0x398] ss:$24 sps:$4 sm:$0xff]   ;;  %v8444_v11 = vld [vmem:[#allocation8 + $0x3c4] ss:$24 sps:$4 sm:$0xff]  }
 0xab6   :  { %5973 = vmatprep.subr.bf16.mxu0 %v8402_v42  ;;  %v8442_v42 = vld [vmem:[#allocation8 + $0x3c0] ss:$24 sps:$4 sm:$0xff]  }
 0xab8   :  { %6054 = vmatpush1.bf16.msra.mxu1 %v8397_v49  ;;  %v8447_v49 = vld [vmem:[#allocation8 + $0x3cc] ss:$24 sps:$4 sm:$0xff]  }
 0xab9   :  { %6055 = vmatprep.subr.bf16.mxu1 %v8405_v19  ;;  %5974 = vmatpush1.bf16.msra.mxu0 %v8400_v52  ;;  %v8445_v19 = vld [vmem:[#allocation8 + $0x3c8] ss:$24 sps:$4 sm:$0xff]   ;;  %v8450_v52 = vld [vmem:[#allocation8 + $0x3f4] ss:$24 sps:$4 sm:$0xff]  }
 0xaba   :  { %5975 = vmatprep.subr.bf16.mxu0 %v8408_v14  ;;  %v8448_v14 = vld [vmem:[#allocation8 + $0x3f0] ss:$24 sps:$4 sm:$0xff]  }
 0xabc   :  { %6056 = vmatpush1.bf16.msra.mxu1 %v8403_v1  ;;  %v8453_v1 = vld [vmem:[#allocation8 + $0x3fc] ss:$24 sps:$4 sm:$0xff]  }
 0xabd   :  { %6057 = vmatprep.subr.bf16.mxu1 %v8411_v57  ;;  %5976 = vmatpush1.bf16.msra.mxu0 %v8406_v53  ;;  %v8451_v57 = vld [vmem:[#allocation8 + $0x3f8] ss:$24 sps:$4 sm:$0xff]   ;;  %v8456_v53 = vld [vmem:[#allocation8 + $0x424] ss:$24 sps:$4 sm:$0xff]  }
 0xabe   :  { %5977 = vmatprep.subr.bf16.mxu0 %v8414_v9  ;;  %v8454_v9 = vld [vmem:[#allocation8 + $0x420] ss:$24 sps:$4 sm:$0xff]  }
 0xac0   :  { %6058 = vmatpush1.bf16.msra.mxu1 %v8409_v60  ;;  %v8459_v60 = vld [vmem:[#allocation8 + $0x42c] ss:$24 sps:$4 sm:$0xff]  }
 0xac1   :  { %6059 = vmatprep.subr.bf16.mxu1 %v8417_v21  ;;  %5978 = vmatpush1.bf16.msra.mxu0 %v8412_v27  ;;  %v8457_v21 = vld [vmem:[#allocation8 + $0x428] ss:$24 sps:$4 sm:$0xff]   ;;  %v8462_v27 = vld [vmem:[#allocation8 + $0x454] ss:$24 sps:$4 sm:$0xff]  }
 0xac2   :  { %5988 = vmatprep.subr.bf16.mxu0 %v8420_v10  ;;  %v8460_v10 = vld [vmem:[#allocation8 + $0x450] ss:$24 sps:$4 sm:$0xff]  }
 0xac4   :  { %6060 = vmatpush1.bf16.msra.mxu1 %v8415_v51  ;;  %v8465_v51 = vld [vmem:[#allocation8 + $0x45c] ss:$24 sps:$4 sm:$0xff]  }
 0xac5   :  { %6070 = vmatprep.subr.bf16.mxu1 %v8423_v0  ;;  %v8463_v0 = vld [vmem:[#allocation8 + $0x458] ss:$24 sps:$4 sm:$0xff]  }
 0xb52   :  { %v4494_v8 = vpop.f32.mrb[38].mxu1 }
 0xb53   :  { %v4573_v48 = vrot.slane %v4494_v8, %v11504_v17  ;;  %v4496_v2 = vpop.f32.mrb[39].mxu1  ;;  %v8468_v8 = vld [vmem:[#allocation8 + $0x484] ss:$24 sps:$4 sm:$0xff]  }
 0xb54   :  { %v4577_v5 = vrot.slane %v4496_v2, %v11504_v17  ;;  %v8466_v2 = vld [vmem:[#allocation8 + $0x480] ss:$24 sps:$4 sm:$0xff]  }
 0xb55   :  { %v4586_v61 = vmul.f32 %v4573_v48, %v10510_v23  ;;  %v8471_v48 = vld [vmem:[#allocation8 + $0x48c] ss:$24 sps:$4 sm:$0xff]  }
 0xb56   :  { %v4587_v22 = vmul.f32 %v4577_v5, %v11505_v3  ;;  %v4565_v7 = vpop.f32.mrb[40].mxu1  ;;  %v4659_v15 = vpop.f32.mrb[18].mxu0  ;;  %v8469_v5 = vld [vmem:[#allocation8 + $0x488] ss:$24 sps:$4 sm:$0xff]   ;;  %v8477_v3 = vld [vmem:[#allocation8 + $0x4bc] ss:$24 sps:$4 sm:$0xff]  }
 0xb57   :  { %v4581_v54 = vrot.slane %v4565_v7, %v11504_v17  ;;  %v4738_v58 = vrot.slane %v4659_v15, %v11504_v17  ;;  %v4567_v25 = vpop.f32.mrb[41].mxu1  ;;  %v4661_v35 = vpop.f32.mrb[19].mxu0  ;;  %v8475_v7 = vld [vmem:[#allocation8 + $0x4b8] ss:$24 sps:$4 sm:$0xff]   ;;  %v8480_v15 = vld [vmem:[#allocation8 + $0x4e4] ss:$24 sps:$4 sm:$0xff]  }
 0xb58   :  { %v4585_v16 = vrot.slane %v4567_v25, %v11504_v17  ;;  %v4742_v24 = vrot.slane %v4661_v35, %v11504_v17  ;;  %v8481_v25 = vld [vmem:[#allocation8 + $0x4e8] ss:$24 sps:$4 sm:$0xff]   ;;  %v8486_v35 = vld [vmem:[#allocation8 + $0x514] ss:$24 sps:$4 sm:$0xff]  }
 0xb59   :  { %v4588_v28 = vmul.f32 %v4581_v54, %v10512_v55  ;;  %v4751_v46 = vadd.f32 %v4738_v58, %v4586_v61  ;;  %v8474_v61 = vld [vmem:[#allocation8 + $0x4b4] ss:$24 sps:$4 sm:$0xff]   ;;  %v8478_v58 = vld [vmem:[#allocation8 + $0x4e0] ss:$24 sps:$4 sm:$0xff]  }
 0xb5a   :  { %v4589_v6 = vmul.f32 %v4585_v16, %v11506_v31  ;;  %v4752_v23 = vadd.f32 %v4742_v24, %v4587_v22  ;;  %v4730_v50 = vpop.f32.mrb[42].mxu1  ;;  %v8472_v22 = vld [vmem:[#allocation8 + $0x4b0] ss:$24 sps:$4 sm:$0xff]   ;;  %v8483_v54 = vld [vmem:[#allocation8 + $0x4ec] ss:$24 sps:$4 sm:$0xff]  }
 0xb5b   :  { %v4755_v12 = vmax.f32 %v4751_v46, 0.0  ;;  %v4746_v41 = vrot.slane %v4730_v50, %v11504_v17  ;;  %v4732_v4 = vpop.f32.mrb[43].mxu1  ;;  %v8489_v16 = vld [vmem:[#allocation8 + $0x51c] ss:$24 sps:$4 sm:$0xff]   ;;  %v8484_v24 = vld [vmem:[#allocation8 + $0x510] ss:$24 sps:$4 sm:$0xff]  }
 0xb5c   :  { %v4756_v20 = vmax.f32 %v4752_v23, 0.0  ;;  %v4750_v30 = vrot.slane %v4732_v4, %v11504_v17  ;;  %v8492_v46 = vld [vmem:[#allocation8 + $0x544] ss:$24 sps:$4 sm:$0xff]   ;;  %v8493_v23 = vld [vmem:[#allocation8 + $0x548] ss:$24 sps:$4 sm:$0xff]  }
 0xb5d   :  { %v10768_v36 = vadd.f32 %v4746_v41, %v4588_v28  ;;  %v10772_v55 = vpack.c.bf16 %v4755_v12, %v4755_v12  ;;  %v8487_v28 = vld [vmem:[#allocation8 + $0x518] ss:$24 sps:$4 sm:$0xff]   ;;  %v8495_v31 = vld [vmem:[#allocation8 + $0x54c] ss:$24 sps:$4 sm:$0xff]   ;;  %v8501_v12 = vld [vmem:[#allocation8 + $0x57c] ss:$24 sps:$4 sm:$0xff]  }
 0xb5e   :  { %v10770_v32 = vpack.c.bf16 %v4756_v20, %v4756_v20  ;;  %v4754_v29 = vadd.f32 %v4750_v30, %v4589_v6  ;;  %v8490_v6 = vld [vmem:[#allocation8 + $0x540] ss:$24 sps:$4 sm:$0xff]   ;;  %v8498_v50 = vld [vmem:[#allocation8 + $0x574] ss:$24 sps:$4 sm:$0xff]   ;;  %v8496_v41 = vld [vmem:[#allocation8 + $0x570] ss:$24 sps:$4 sm:$0xff]  }
 0xb5f   :  { %v8499_v4 = vld [vmem:[#allocation8 + $0x578] ss:$24 sps:$4 sm:$0xff]   ;;  %v8504_v20 = vld [vmem:[#allocation8 + $0x5a4] ss:$24 sps:$4 sm:$0xff]  }
 0xb60   :  { %v4758_v43 = vmax.f32 %v4754_v29, 0.0  ;;  %5979 = vmatprep.mubr.bf16.mxu0 %v10770_v32  ;;  %6061 = vmatprep.mubr.bf16.mxu1 %v10770_v32  ;;  %v8507_v30 = vld [vmem:[#allocation8 + $0x5ac] ss:$24 sps:$4 sm:$0xff]   ;;  %v8502_v29 = vld [vmem:[#allocation8 + $0x5a0] ss:$24 sps:$4 sm:$0xff]  }
 0xb61   :  { %5980 = vmatmul.mubr.bf16.vlgmr.msra.gmra.mrb[20].mxu0 %v10772_v55  ;;  %6062 = vmatmul.mubr.bf16.vlgmr.msra.gmra.mrb[44].mxu1 %v10772_v55 }
 0xb62   :  { %v10778_v62 = vpack.c.bf16 %v4758_v43, %v4758_v43  ;;  %5989 = vmatpush1.bf16.msra.mxu0 %v8418_v40  ;;  %6071 = vmatpush1.bf16.msra.mxu1 %v8421_v33  ;;  %v8505_v40 = vld [vmem:[#allocation8 + $0x5a8] ss:$24 sps:$4 sm:$0xff]   ;;  %v8510_v33 = vld [vmem:[#allocation8 + $0x5d4] ss:$24 sps:$4 sm:$0xff]   ;;  %v8511_v43 = vld [vmem:[#allocation8 + $0x5d8] ss:$24 sps:$4 sm:$0xff]  }
 0xb63   :  { %5990 = vmatprep.subr.bf16.mxu0 %v8426_v26  ;;  %6072 = vmatprep.subr.bf16.mxu1 %v8429_v59  ;;  %v8513_v26 = vld [vmem:[#allocation8 + $0x5dc] ss:$24 sps:$4 sm:$0xff]   ;;  %v8508_v59 = vld [vmem:[#allocation8 + $0x5d0] ss:$24 sps:$4 sm:$0xff]  }
 0xb64   :  { %6020 = vmatprep.mubr.bf16.mxu0 %v10778_v62  ;;  %6102 = vmatprep.mubr.bf16.mxu1 %v10778_v62 }
 0xb66   :  { %5991 = vmatpush1.bf16.msra.mxu0 %v8424_v45  ;;  %6073 = vmatpush1.bf16.msra.mxu1 %v8427_v47  ;;  %v4757_v45 = vmax.f32 %v10768_v36, 0.0  ;;  %v8516_v47 = vld [vmem:[#allocation8 + $0x14] ss:$24 sps:$4 sm:$0xff]  }
 0xb67   :  { %5992 = vmatprep.subr.bf16.mxu0 %v8432_v37  ;;  %6074 = vmatprep.subr.bf16.mxu1 %v8435_v39  ;;  %v8514_v37 = vld [vmem:[#allocation8 + $0x10] ss:$24 sps:$4 sm:$0xff]   ;;  %v8522_v36 = vld [vmem:[#allocation8 + $0x74] ss:$24 sps:$4 sm:$0xff]  }
 0xb68   :  { %v10783_v39 = vpack.c.bf16 %v4757_v45, %v4757_v45  ;;  %v8606_v45 = vld [vmem:[#allocation8 + $0x5b4] ss:$24 sps:$4 sm:$0xff]  }
 0xb6a   :  { %5993 = vmatpush1.bf16.msra.mxu0 %v8430_v18  ;;  %6075 = vmatpush1.bf16.msra.mxu1 %v8433_v38  ;;  %v8519_v18 = vld [vmem:[#allocation8 + $0x44] ss:$24 sps:$4 sm:$0xff]   ;;  %v8517_v38 = vld [vmem:[#allocation8 + $0x40] ss:$24 sps:$4 sm:$0xff]  }
 0xb6b   :  { %5994 = vmatprep.subr.bf16.mxu0 %v8438_v34  ;;  %6076 = vmatprep.subr.bf16.mxu1 %v8441_v63  ;;  %v8520_v34 = vld [vmem:[#allocation8 + $0x70] ss:$24 sps:$4 sm:$0xff]   ;;  %v8525_v63 = vld [vmem:[#allocation8 + $0xa4] ss:$24 sps:$4 sm:$0xff]  }
 0xb6e   :  { %5995 = vmatpush1.bf16.msra.mxu0 %v8436_v13  ;;  %6077 = vmatpush1.bf16.msra.mxu1 %v8439_v44  ;;  %v8523_v13 = vld [vmem:[#allocation8 + $0xa0] ss:$24 sps:$4 sm:$0xff]   ;;  %v8528_v44 = vld [vmem:[#allocation8 + $0xd4] ss:$24 sps:$4 sm:$0xff]  }
 0xb6f   :  { %5996 = vmatprep.subr.bf16.mxu0 %v8444_v11  ;;  %6078 = vmatprep.subr.bf16.mxu1 %v8447_v49  ;;  %v8526_v11 = vld [vmem:[#allocation8 + $0xd0] ss:$24 sps:$4 sm:$0xff]   ;;  %v8531_v49 = vld [vmem:[#allocation8 + $0x104] ss:$24 sps:$4 sm:$0xff]  }
 0xb72   :  { %5997 = vmatpush1.bf16.msra.mxu0 %v8442_v42  ;;  %6079 = vmatpush1.bf16.msra.mxu1 %v8445_v19  ;;  %v8529_v42 = vld [vmem:[#allocation8 + $0x100] ss:$24 sps:$4 sm:$0xff]   ;;  %v8534_v19 = vld [vmem:[#allocation8 + $0x134] ss:$24 sps:$4 sm:$0xff]  }
 0xb73   :  { %5998 = vmatprep.subr.bf16.mxu0 %v8450_v52  ;;  %6080 = vmatprep.subr.bf16.mxu1 %v8453_v1  ;;  %v8537_v52 = vld [vmem:[#allocation8 + $0x164] ss:$24 sps:$4 sm:$0xff]   ;;  %v8535_v1 = vld [vmem:[#allocation8 + $0x160] ss:$24 sps:$4 sm:$0xff]  }
 0xb76   :  { %5999 = vmatpush1.bf16.msra.mxu0 %v8448_v14  ;;  %6081 = vmatpush1.bf16.msra.mxu1 %v8451_v57  ;;  %v8540_v14 = vld [vmem:[#allocation8 + $0x194] ss:$24 sps:$4 sm:$0xff]   ;;  %v8538_v57 = vld [vmem:[#allocation8 + $0x190] ss:$24 sps:$4 sm:$0xff]  }
 0xb77   :  { %6000 = vmatprep.subr.bf16.mxu0 %v8456_v53  ;;  %6082 = vmatprep.subr.bf16.mxu1 %v8459_v60  ;;  %v8543_v53 = vld [vmem:[#allocation8 + $0x1c4] ss:$24 sps:$4 sm:$0xff]   ;;  %v8541_v60 = vld [vmem:[#allocation8 + $0x1c0] ss:$24 sps:$4 sm:$0xff]  }
 0xb7a   :  { %6001 = vmatpush1.bf16.msra.mxu0 %v8454_v9  ;;  %6083 = vmatpush1.bf16.msra.mxu1 %v8457_v21  ;;  %v8546_v9 = vld [vmem:[#allocation8 + $0x1f4] ss:$24 sps:$4 sm:$0xff]   ;;  %v8544_v21 = vld [vmem:[#allocation8 + $0x1f0] ss:$24 sps:$4 sm:$0xff]  }
 0xb7b   :  { %6002 = vmatprep.subr.bf16.mxu0 %v8462_v27  ;;  %6084 = vmatprep.subr.bf16.mxu1 %v8465_v51  ;;  %v8549_v27 = vld [vmem:[#allocation8 + $0x224] ss:$24 sps:$4 sm:$0xff]   ;;  %v8547_v51 = vld [vmem:[#allocation8 + $0x220] ss:$24 sps:$4 sm:$0xff]  }
 0xb7e   :  { %6003 = vmatpush1.bf16.msra.mxu0 %v8460_v10  ;;  %6085 = vmatpush1.bf16.msra.mxu1 %v8463_v0  ;;  %v8552_v10 = vld [vmem:[#allocation8 + $0x254] ss:$24 sps:$4 sm:$0xff]   ;;  %v8550_v0 = vld [vmem:[#allocation8 + $0x250] ss:$24 sps:$4 sm:$0xff]  }
 0xb7f   :  { %6004 = vmatprep.subr.bf16.mxu0 %v8468_v8  ;;  %6086 = vmatprep.subr.bf16.mxu1 %v8471_v48  ;;  %v8555_v8 = vld [vmem:[#allocation8 + $0x284] ss:$24 sps:$4 sm:$0xff]   ;;  %v8553_v48 = vld [vmem:[#allocation8 + $0x280] ss:$24 sps:$4 sm:$0xff]  }
 0xb82   :  { %6005 = vmatpush1.bf16.msra.mxu0 %v8466_v2  ;;  %6087 = vmatpush1.bf16.msra.mxu1 %v8469_v5  ;;  %v8558_v2 = vld [vmem:[#allocation8 + $0x2b4] ss:$24 sps:$4 sm:$0xff]   ;;  %v8556_v5 = vld [vmem:[#allocation8 + $0x2b0] ss:$24 sps:$4 sm:$0xff]  }
 0xb83   :  { %6006 = vmatprep.subr.bf16.mxu0 %v8474_v61  ;;  %6088 = vmatprep.subr.bf16.mxu1 %v8477_v3  ;;  %v8561_v61 = vld [vmem:[#allocation8 + $0x2e4] ss:$24 sps:$4 sm:$0xff]   ;;  %v8559_v3 = vld [vmem:[#allocation8 + $0x2e0] ss:$24 sps:$4 sm:$0xff]  }
 0xb86   :  { %6007 = vmatpush1.bf16.msra.mxu0 %v8472_v22  ;;  %6089 = vmatpush1.bf16.msra.mxu1 %v8475_v7  ;;  %v8564_v22 = vld [vmem:[#allocation8 + $0x314] ss:$24 sps:$4 sm:$0xff]   ;;  %v8562_v7 = vld [vmem:[#allocation8 + $0x310] ss:$24 sps:$4 sm:$0xff]  }
 0xb87   :  { %6008 = vmatprep.subr.bf16.mxu0 %v8480_v15  ;;  %6090 = vmatprep.subr.bf16.mxu1 %v8483_v54  ;;  %v8567_v15 = vld [vmem:[#allocation8 + $0x344] ss:$24 sps:$4 sm:$0xff]   ;;  %v8565_v54 = vld [vmem:[#allocation8 + $0x340] ss:$24 sps:$4 sm:$0xff]  }
 0xb8a   :  { %6009 = vmatpush1.bf16.msra.mxu0 %v8478_v58  ;;  %6091 = vmatpush1.bf16.msra.mxu1 %v8481_v25  ;;  %v8570_v58 = vld [vmem:[#allocation8 + $0x374] ss:$24 sps:$4 sm:$0xff]   ;;  %v8568_v25 = vld [vmem:[#allocation8 + $0x370] ss:$24 sps:$4 sm:$0xff]  }
 0xb8b   :  { %6010 = vmatprep.subr.bf16.mxu0 %v8486_v35  ;;  %6092 = vmatprep.subr.bf16.mxu1 %v8489_v16  ;;  %v8573_v35 = vld [vmem:[#allocation8 + $0x3a4] ss:$24 sps:$4 sm:$0xff]   ;;  %v8571_v16 = vld [vmem:[#allocation8 + $0x3a0] ss:$24 sps:$4 sm:$0xff]  }
 0xb8e   :  { %6011 = vmatpush1.bf16.msra.mxu0 %v8484_v24  ;;  %6093 = vmatpush1.bf16.msra.mxu1 %v8487_v28  ;;  %v8576_v24 = vld [vmem:[#allocation8 + $0x3d4] ss:$24 sps:$4 sm:$0xff]   ;;  %v8574_v28 = vld [vmem:[#allocation8 + $0x3d0] ss:$24 sps:$4 sm:$0xff]  }
 0xb8f   :  { %6012 = vmatprep.subr.bf16.mxu0 %v8492_v46  ;;  %6094 = vmatprep.subr.bf16.mxu1 %v8495_v31  ;;  %v8579_v46 = vld [vmem:[#allocation8 + $0x404] ss:$24 sps:$4 sm:$0xff]   ;;  %v8582_v31 = vld [vmem:[#allocation8 + $0x434] ss:$24 sps:$4 sm:$0xff]  }
 0xb92   :  { %6013 = vmatpush1.bf16.msra.mxu0 %v8490_v6  ;;  %6095 = vmatpush1.bf16.msra.mxu1 %v8493_v23  ;;  %v8585_v6 = vld [vmem:[#allocation8 + $0x464] ss:$24 sps:$4 sm:$0xff]   ;;  %v8583_v23 = vld [vmem:[#allocation8 + $0x460] ss:$24 sps:$4 sm:$0xff]  }
 0xb93   :  { %6014 = vmatprep.subr.bf16.mxu0 %v8498_v50  ;;  %6096 = vmatprep.subr.bf16.mxu1 %v8501_v12  ;;  %v8588_v50 = vld [vmem:[#allocation8 + $0x494] ss:$24 sps:$4 sm:$0xff]   ;;  %v8586_v12 = vld [vmem:[#allocation8 + $0x490] ss:$24 sps:$4 sm:$0xff]  }
 0xb96   :  { %6015 = vmatpush1.bf16.msra.mxu0 %v8496_v41  ;;  %6097 = vmatpush1.bf16.msra.mxu1 %v8499_v4  ;;  %v8591_v41 = vld [vmem:[#allocation8 + $0x4c4] ss:$24 sps:$4 sm:$0xff]   ;;  %v8589_v4 = vld [vmem:[#allocation8 + $0x4c0] ss:$24 sps:$4 sm:$0xff]  }
 0xb97   :  { %6016 = vmatprep.subr.bf16.mxu0 %v8504_v20  ;;  %6098 = vmatprep.subr.bf16.mxu1 %v8507_v30  ;;  %v8594_v20 = vld [vmem:[#allocation8 + $0x4f4] ss:$24 sps:$4 sm:$0xff]   ;;  %v8592_v30 = vld [vmem:[#allocation8 + $0x4f0] ss:$24 sps:$4 sm:$0xff]  }
 0xb9a   :  { %6017 = vmatpush1.bf16.msra.mxu0 %v8502_v29  ;;  %6099 = vmatpush1.bf16.msra.mxu1 %v8505_v40  ;;  %v8597_v29 = vld [vmem:[#allocation8 + $0x524] ss:$24 sps:$4 sm:$0xff]   ;;  %v8595_v40 = vld [vmem:[#allocation8 + $0x520] ss:$24 sps:$4 sm:$0xff]  }
 0xb9b   :  { %6018 = vmatprep.subr.bf16.mxu0 %v8510_v33  ;;  %6100 = vmatprep.subr.bf16.mxu1 %v8513_v26  ;;  %v8600_v33 = vld [vmem:[#allocation8 + $0x554] ss:$24 sps:$4 sm:$0xff]   ;;  %v8598_v26 = vld [vmem:[#allocation8 + $0x550] ss:$24 sps:$4 sm:$0xff]  }
 0xb9e   :  { %6019 = vmatpush1.bf16.msra.mxu0 %v8508_v59  ;;  %6101 = vmatpush1.bf16.msra.mxu1 %v8511_v43  ;;  %v8603_v59 = vld [vmem:[#allocation8 + $0x584] ss:$24 sps:$4 sm:$0xff]   ;;  %v8601_v43 = vld [vmem:[#allocation8 + $0x580] ss:$24 sps:$4 sm:$0xff]  }
 0xb9f   :  { %6111 = vmatprep.subr.bf16.mxu0 %v8516_v47  ;;  %v8604_v47 = vld [vmem:[#allocation8 + $0x5b0] ss:$24 sps:$4 sm:$0xff]  }
 0xba1   :  { %6021 = vmatmul.mubr.bf16.vlgmr.msra.gmra.mrb[20].mxu0 %v10783_v39  ;;  %6103 = vmatmul.mubr.bf16.vlgmr.msra.gmra.mrb[44].mxu1 %v10783_v39 }
 0xba2   :  { %6112 = vmatpush1.bf16.msra.mxu0 %v8514_v37  ;;  %6143 = vmatprep.mubr.bf16.mxu0 %v10770_v32  ;;  %v8532_v32 = vld [vmem:[#allocation8 + $0x130] ss:$24 sps:$4 sm:$0xff]   ;;  %v8609_v37 = vld [vmem:[#allocation8 + $0x5e4] ss:$24 sps:$4 sm:$0xff]  }
 0xba3   :  { %6113 = vmatprep.subr.bf16.mxu0 %v8519_v18  ;;  %v8607_v18 = vld [vmem:[#allocation8 + $0x5e0] ss:$24 sps:$4 sm:$0xff]  }
 0xba6   :  { %6114 = vmatpush1.bf16.msra.mxu0 %v8517_v38  ;;  %v4955_v38 = vld [vmem:[%s10844_s15] sm:$0x3f]  ;;  %s8785_s15 = smov [#allocation10]  }
 0xba7   :  { %6115 = vmatprep.subr.bf16.mxu0 %v8522_v36  ;;  %v4960_v36 = vrot.slane %v4955_v38, %v11504_v17  ;;  %s6240_s20 = sshll.u32 %s8785_s15, 4  ;;  %s6241_s20 = int_to_ptr.vmem [resolvable:$true] %s6240_s20 }
 0xba8   :  { %s8716_s21 = scalar_lea.vmem %s6241_s20, 32  ;;  %p8721_p5 = scmp.lt.s32.totalorder %s6241_s20, %s6241_s20 }
 0xba9   :  { %p8717_p4 = scmp.ne.s32.totalorder %s6241_s20, %s8716_s21  ;;  %p8722_p6 = scmp.lt.s32.totalorder %s8716_s21, %s8716_s21 }
 0xbaa   :  { %6116 = vmatpush1.bf16.msra.mxu0 %v8520_v34  ;;  %v11507_v34 = vsub.s32 2, %v11497_v56 }
 0xbab   :  { %6117 = vmatprep.subr.bf16.mxu0 %v8525_v63  ;;  %p8723_p7 = por %p8722_p6, %p8721_p5 }
 0xbac   :  { %v4968_v63 = vrot.slane %v4955_v38, %v11507_v34 }
 0xbad   :  { %p8724_p8 = pnand %p8723_p7, %p8717_p4 }
 0xbae   :  { %6118 = vmatpush1.bf16.msra.mxu0 %v8523_v13  ;;  %v11508_v13 = vsub.s32 1, %v11497_v56 }
 0xbaf   :  { %6119 = vmatprep.subr.bf16.mxu0 %v8528_v44 }
 0xbb0   :  { %v4964_v44 = vrot.slane %v4955_v38, %v11508_v13 }
 0xbb2   :  { %6120 = vmatpush1.bf16.msra.mxu0 %v8526_v11  ;;  %v11509_v11 = vsub.s32 3, %v11497_v56 }
 0xbb3   :  { %6121 = vmatprep.subr.bf16.mxu0 %v8531_v49 }
 0xbb4   :  { %v4972_v49 = vrot.slane %v4955_v38, %v11509_v11 }
 0xbb6   :  { %6122 = vmatpush1.bf16.msra.mxu0 %v8529_v42 }
 0xbb7   :  { %6123 = vmatprep.subr.bf16.mxu0 %v8534_v19 }
 0xbba   :  { %6124 = vmatpush1.bf16.msra.mxu0 %v8532_v32 }
 0xbbb   :  { %6125 = vmatprep.subr.bf16.mxu0 %v8537_v52 }
 0xbbe   :  { %6126 = vmatpush1.bf16.msra.mxu0 %v8535_v1 }
 0xbbf   :  { %6127 = vmatprep.subr.bf16.mxu0 %v8540_v14 }
 0xbc2   :  { %6128 = vmatpush1.bf16.msra.mxu0 %v8538_v57 }
 0xbc3   :  { %6129 = vmatprep.subr.bf16.mxu0 %v8543_v53 }
 0xbc6   :  { %6130 = vmatpush1.bf16.msra.mxu0 %v8541_v60 }
 0xbc7   :  { %6131 = vmatprep.subr.bf16.mxu0 %v8546_v9 }
 0xbca   :  { %6132 = vmatpush1.bf16.msra.mxu0 %v8544_v21 }
 0xbcb   :  { %6133 = vmatprep.subr.bf16.mxu0 %v8549_v27 }
 0xbce   :  { %6134 = vmatpush1.bf16.msra.mxu0 %v8547_v51 }
 0xbcf   :  { %6135 = vmatprep.subr.bf16.mxu0 %v8552_v10 }
 0xbd2   :  { %6136 = vmatpush1.bf16.msra.mxu0 %v8550_v0 }
 0xbd3   :  { %6137 = vmatprep.subr.bf16.mxu0 %v8555_v8 }
 0xbd6   :  { %6138 = vmatpush1.bf16.msra.mxu0 %v8553_v48 }
 0xbd7   :  { %6139 = vmatprep.subr.bf16.mxu0 %v8558_v2 }
 0xbda   :  { %6140 = vmatpush1.bf16.msra.mxu0 %v8556_v5 }
 0xbdb   :  { %6141 = vmatprep.subr.bf16.mxu0 %v8561_v61 }
 0xbde   :  { %6142 = vmatpush1.bf16.msra.mxu0 %v8559_v3 }
 0xbdf   :  { %6152 = vmatprep.subr.bf16.mxu0 %v8564_v22 }
 0xbe1   :  { %6144 = vmatmul.mubr.bf16.vlgmr.msra.gmra.mrb[24].mxu0 %v10772_v55  ;;  %v8577_v55 = vld [vmem:[#allocation8 + $0x400] ss:$24 sps:$4 sm:$0xff]  }
 0xbe2   :  { %6153 = vmatpush1.bf16.msra.mxu0 %v8562_v7  ;;  %6184 = vmatprep.mubr.bf16.mxu0 %v10778_v62  ;;  %v8580_v62 = vld [vmem:[#allocation8 + $0x430] ss:$24 sps:$4 sm:$0xff]  }
 0xbe3   :  { %6154 = vmatprep.subr.bf16.mxu0 %v8567_v15 }
 0xbe6   :  { %6155 = vmatpush1.bf16.msra.mxu0 %v8565_v54 }
 0xbe7   :  { %6156 = vmatprep.subr.bf16.mxu0 %v8570_v58 }
 0xbea   :  { %6157 = vmatpush1.bf16.msra.mxu0 %v8568_v25 }
 0xbeb   :  { %6158 = vmatprep.subr.bf16.mxu0 %v8573_v35 }
 0xbee   :  { %6159 = vmatpush1.bf16.msra.mxu0 %v8571_v16 }
 0xbef   :  { %6160 = vmatprep.subr.bf16.mxu0 %v8576_v24 }
 0xbf2   :  { %6161 = vmatpush1.bf16.msra.mxu0 %v8574_v28 }
 0xbf3   :  { %6162 = vmatprep.subr.bf16.mxu0 %v8579_v46 }
 0xbf6   :  { %6163 = vmatpush1.bf16.msra.mxu0 %v8577_v55 }
 0xbf7   :  { %6164 = vmatprep.subr.bf16.mxu0 %v8582_v31 }
 0xbfa   :  { %6165 = vmatpush1.bf16.msra.mxu0 %v8580_v62 }
 0xbfb   :  { %6166 = vmatprep.subr.bf16.mxu0 %v8585_v6 }
 0xbfe   :  { %6167 = vmatpush1.bf16.msra.mxu0 %v8583_v23 }
 0xbff   :  { %6168 = vmatprep.subr.bf16.mxu0 %v8588_v50 }
 0xc02   :  { %6169 = vmatpush1.bf16.msra.mxu0 %v8586_v12 }
 0xc03   :  { %6170 = vmatprep.subr.bf16.mxu0 %v8591_v41 }
 0xc06   :  { %6171 = vmatpush1.bf16.msra.mxu0 %v8589_v4 }
 0xc07   :  { %6172 = vmatprep.subr.bf16.mxu0 %v8594_v20 }
 0xc0a   :  { %6173 = vmatpush1.bf16.msra.mxu0 %v8592_v30 }
 0xc0b   :  { %6174 = vmatprep.subr.bf16.mxu0 %v8597_v29 }
 0xc0e   :  { %6175 = vmatpush1.bf16.msra.mxu0 %v8595_v40 }
 0xc0f   :  { %6176 = vmatprep.subr.bf16.mxu0 %v8600_v33 }
 0xc12   :  { %6177 = vmatpush1.bf16.msra.mxu0 %v8598_v26 }
 0xc13   :  { %6178 = vmatprep.subr.bf16.mxu0 %v8603_v59 }
 0xc16   :  { %6179 = vmatpush1.bf16.msra.mxu0 %v8601_v43 }
 0xc17   :  { %6180 = vmatprep.subr.bf16.mxu0 %v8606_v45 }
 0xc1a   :  { %6181 = vmatpush1.bf16.msra.mxu0 %v8604_v47 }
 0xc1b   :  { %6182 = vmatprep.subr.bf16.mxu0 %v8609_v37 }
 0xc1e   :  { %6183 = vmatpush1.bf16.msra.mxu0 %v8607_v18 }
 0xc21   :  { %6185 = vmatmul.mubr.bf16.vlgmr.msra.gmra.mrb[24].mxu0 %v10783_v39 }
 0xc74   :  { %v6022_v42 = vpop.f32.mrb[20].mxu0  ;;  %v6104_v19 = vpop.f32.mrb[44].mxu1 }
 0xc75   :  { %v7771_v32 = vadd.f32 %v6022_v42, %v4960_v36  ;;  %v7773_v52 = vadd.f32 %v6104_v19, %v4968_v63  ;;  %v6024_v39 = vpop.f32.mrb[21].mxu0  ;;  %v6106_v1 = vpop.f32.mrb[45].mxu1 }
 0xc76   :  { %v7772_v14 = vadd.f32 %v6024_v39, %v4964_v44  ;;  %v7774_v57 = vadd.f32 %v6106_v1, %v4972_v49  ;;  %v6026_v53 = vpop.f32.mrb[22].mxu0  ;;  %v6108_v60 = vpop.f32.mrb[46].mxu1 }
 0xc77   :  { %8616 = vtanh.f32 %v7771_v32  ;;  %v6027_v17 = vpop.f32.mrb[23].mxu0  ;;  %v6109_v9 = vpop.f32.mrb[47].mxu1 }
 0xc78   :  { %8618 = vtanh.f32 %v7773_v52 }
 0xc79   :  { %8620 = vtanh.f32 %v7772_v14 }
 0xc7a   :  { %8622 = vtanh.f32 %v7774_v57 }
 0xc7b   :  { %8727 = shalt.err (!%p8724_p8)
}
 0xc7c   :  { %s8728_s29 = scalar_lea.hbm %s10845_s16, 32 }
 0xc7d   :  { %p8729_p9 = scmp.ne.s32.totalorder %s10845_s16, %s8728_s29  ;;  %p8732_p10 = scmp.lt.u32.totalorder %s8728_s29, %s10845_s16 }
 0xc7f   :  { %p8734_p11 = pnand %p8732_p10, %p8729_p9 }
 0xc81   :  { %8737 = shalt.err (!%p8734_p11)
}
 0xc82   :  { %6243 = dma.vmem_to_hbm [thread:$0]  %s6241_s20, 32, %s10845_s16, [#allocation4]   ;;  %v8617_v21 = vpop.eup %8616  ;;  %v11510_v48 = vld [vmem:[#allocation19_spill] sm:$0xff]  ;;  %v4975_v3 = vsub.s32 4, %v11497_v56  ;;  %v4979_v22 = vsub.s32 5, %v11497_v56 }
 0xc83   :  { %v8619_v27 = vpop.eup %8618  ;;  %s8786_s16 = smov [#allocation11]  }
 0xc84   :  { %v8621_v51 = vpop.eup %8620  ;;  %v4976_v7 = vrot.slane %v4955_v38, %v4975_v3  ;;  %v4980_v15 = vrot.slane %v4955_v38, %v4979_v22  ;;  %s6250_s3 = sshll.u32 %s8786_s16, 4  ;;  %s6251_s3 = int_to_ptr.vmem [resolvable:$true] %s6250_s3 }
 0xc85   :  { %v8623_v10 = vpop.eup %8622  ;;  %v6205_v0 = vcombine.low %v8617_v21, %v8621_v51  ;;  %s8738_s25 = scalar_lea.vmem %s6251_s3, 192  ;;  %p8743_p13 = scmp.lt.s32.totalorder %s6251_s3, %s6251_s3 }
 0xc86   :  { %v6206_v8 = vcombine.low %v8619_v27, %v8623_v10  ;;  %p8739_p12 = scmp.ne.s32.totalorder %s6251_s3, %s8738_s25  ;;  %p8744_p0 = scmp.lt.s32.totalorder %s8738_s25, %s8738_s25 }
 0xc87   :  { %v6213_v2 = vrot.slane %v6205_v0, %v11510_v48 }
 0xc88   :  { %v6220_v5 = vrot.slane %v6206_v8, %v11510_v48  ;;  %p8745_p1 = por %p8744_p0, %p8743_p13 }
 0xc8a   :  { %v6221_v61 = vcombine.low %v6213_v2, %v6220_v5  ;;  %p8746_p2 = pnand %p8745_p1, %p8739_p12 }
 0xc8c   :  { %6232 = vst [vmem:[#allocation11] sm:$0xff] %v6221_v61 }
 0xcf4   :  { %v6186_v54 = vpop.f32.mrb[24].mxu0 }
 0xcf5   :  { %v7775_v58 = vadd.f32 %v6186_v54, %v4976_v7  ;;  %v6188_v25 = vpop.f32.mrb[25].mxu0 }
 0xcf6   :  { %v7776_v35 = vadd.f32 %v6188_v25, %v4980_v15  ;;  %v6190_v16 = vpop.f32.mrb[26].mxu0 }
 0xcf7   :  { %8624 = vtanh.f32 %v7775_v58  ;;  %v6191_v24 = vpop.f32.mrb[27].mxu0 }
 0xcf8   :  { %8626 = vtanh.f32 %v7776_v35 }
 0xd01   :  { %v8625_v28 = vpop.eup %8624 }
 0xd02   :  { %v8627_v46 = vpop.eup %8626 }
 0xd03   :  { %v6222_v55 = vcombine.low %v8625_v28, %v8627_v46 }
 0xd05   :  { %7190 = vst.sshfl [vmem:[#allocation11 + $0x8] sm:$0x33 pattern:$0x76325410] %v6222_v55 }
 0xd06   :  { %8749 = shalt.err (!%p8746_p2)
}
 0xd07   :  { %s11511_s6 = sld [smem:[#allocation57_spill]] }
 0xd0d   :  { %s8750_s26 = scalar_lea.hbm %s11511_s6, 192 }
 0xd0e   :  { %p8751_p3 = scmp.ne.s32.totalorder %s11511_s6, %s8750_s26  ;;  %p8754_p4 = scmp.lt.u32.totalorder %s8750_s26, %s11511_s6 }
 0xd10   :  { %p8756_p5 = pnand %p8754_p4, %p8751_p3 }
 0xd12   :  { %8759 = shalt.err (!%p8756_p5)
}
 0xd13   :  { %6253 = dma.vmem_to_hbm [thread:$0]  %s6251_s3, 192, %s11511_s6, [#allocation12]  }
 0xd14   :  { %8766 = dma.done.wait [#allocation4], 32  }
 0xd15   :  { %8767 = vsyncadd [#allocation4], 4294967264 }
 0xd16   :  { %8768 = dma.done.wait [#allocation12], 192  }
 0xd17   :  { %8769 = vsyncadd [#allocation12], 4294967104 }
 0xd18   :  { %6260 = vsyncpa [#allocation3], 1 }
 0xd19   :  { %6261 = vsyncpa [#allocation6], 1 }
 0xd1a   :  { %6262 = vsyncpa [#allocation9], 1 }
 0xd1b   :  { %6263 = vsyncpa [#allocation4], 1 }
 0xd1c   :  { %6264 = vsyncpa [#allocation12], 1 }

</bundles_post_ra>
